<compile_context>
chip_gen: v5e
topology: v5e:2x2
jax: 0.10.0
libtpu: 0.0.40
codegen_flags: <defaults>
</compile_context>

<pallas_src>
import functools
import math

import jax
import jax.numpy as jnp
from jax import lax
from jax.experimental import pallas as pl
from jax.experimental.pallas import tpu as pltpu

LN_EPS = 1e-5
_INV_SQRT2 = 0.7071067811865476


def _layer_norm(y, gamma, beta):
    mu = jnp.mean(y, axis=-1, keepdims=True)
    var = jnp.mean((y - mu) ** 2, axis=-1, keepdims=True)
    return (y - mu) * lax.rsqrt(var + LN_EPS) * gamma + beta


def _gelu_exact(x):
    # torch.nn.GELU() default = exact erf formulation
    return 0.5 * x * (1.0 + lax.erf(x * jnp.float32(_INV_SQRT2)))


# --------------------------------------------------------------------------
# Fused TransformerBlock kernel
# --------------------------------------------------------------------------
def transformer_block_kernel(*refs, num_heads, causal):
    f32 = jnp.float32
    bf16 = jnp.bfloat16

    if causal:
        (xq_ref,
         wq_ref, bq_ref, wkv_ref, bkv_ref, wc_ref, bc_ref,
         g1_ref, be1_ref, w1_ref, b1_ref, w2_ref, b2_ref,
         g2_ref, be2_ref,
         o_ref, k_scr, v_scr, sa_scr) = refs
        xkv_ref = None
    else:
        (xq_ref, xkv_ref,
         wq_ref, bq_ref, wkv_ref, bkv_ref, wc_ref, bc_ref,
         g1_ref, be1_ref, w1_ref, b1_ref, w2_ref, b2_ref,
         g2_ref, be2_ref,
         o_ref, k_scr, v_scr, sa_scr) = refs

    qi = pl.program_id(1)
    n_q_blocks = pl.num_programs(1)

    xq = xq_ref[0]                       # (TQ, D) f32 -- query rows (residual path)
    TQ = xq.shape[0]
    HD = wq_ref.shape[1]
    Dh = HD // num_heads
    T = k_scr.shape[1]
    TK = TQ                              # KV tile size == query tile size
    xq_b = xq.astype(bf16)

    # ---- K/V projection into persistent (grid-carried) VMEM scratch --------
    def write_kv(rows_bf16, row_off, nrows):
        kv = jnp.dot(rows_bf16, wkv_ref[...], preferred_element_type=f32) + bkv_ref[0]
        kv = kv.astype(bf16)             # (nrows, 2*HD)
        for h in range(num_heads):
            k_scr[h, pl.ds(row_off, nrows), :] = kv[:, h * Dh:(h + 1) * Dh]
            v_scr[h, pl.ds(row_off, nrows), :] = kv[:, HD + h * Dh:HD + (h + 1) * Dh]

    if causal:
        # Incremental build: only this block's rows are projected; keys for
        # future blocks are never needed by any query in or before this block.
        write_kv(xq_b, pl.multiple_of(qi * TQ, TQ), TQ)
        n_kv = qi + 1                    # dynamic trip count (causal prefix)
    else:
        @pl.when(qi == 0)
        def _():
            write_kv(xkv_ref[0].astype(bf16), 0, T)
        n_kv = n_q_blocks

    # ---- Q projection (1/sqrt(Dh) scale already folded into wq/bq) ---------
    q = jnp.dot(xq_b, wq_ref[...], preferred_element_type=f32) + bq_ref[0]
    q = q.astype(bf16)                   # (TQ, H*Dh)

    # ---- Per-head attention: online softmax over KV tiles ------------------
    NEG = jnp.float32(-1e30)
    row_ids = qi * TQ + lax.broadcasted_iota(jnp.int32, (TQ, TK), 0)
    col_iota = lax.broadcasted_iota(jnp.int32, (TQ, TK), 1)

    # TODO(synk): for large H switch this static Python loop to lax.fori_loop
    # over heads (with ref slicing) to bound vreg live ranges.
    for h in range(num_heads):
        qh = q[:, h * Dh:(h + 1) * Dh]   # (TQ, Dh) bf16

        def kv_step(j, carry, qh=qh, h=h):
            m, l, acc = carry
            off = pl.multiple_of(j * TK, TK)
            kh = k_scr[h, pl.ds(off, TK), :]               # (TK, Dh) bf16
            vh = v_scr[h, pl.ds(off, TK), :]               # (TK, Dh) bf16
            s = lax.dot_general(qh, kh, (((1,), (1,)), ((), ())),
                                preferred_element_type=f32)  # (TQ, TK)
            if causal:
                # Only the diagonal tile actually masks anything; the where on
                # earlier tiles is negligible VPU work vs the MXU matmul.
                s = jnp.where(row_ids >= j * TK + col_iota, s, NEG)
            m_new = jnp.maximum(m, jnp.max(s, axis=-1, keepdims=True))
            alpha = jnp.exp(m - m_new)
            p = jnp.exp(s - m_new)                          # unnormalized
            l_new = alpha * l + jnp.sum(p, axis=-1, keepdims=True)
            acc_new = alpha * acc + jnp.dot(p.astype(bf16), vh,
                                            preferred_element_type=f32)
            return m_new, l_new, acc_new

        m0 = jnp.full((TQ, 1), NEG, f32)
        l0 = jnp.zeros((TQ, 1), f32)
        acc0 = jnp.zeros((TQ, Dh), f32)
        m, l, acc = lax.fori_loop(0, n_kv, kv_step, (m0, l0, acc0))
        sa_scr[:, h * Dh:(h + 1) * Dh] = acc / l           # exact normalization

    # ---- Output projection over concatenated heads --------------------------
    sa = sa_scr[...].astype(bf16)
    x_attn = jnp.dot(sa, wc_ref[...], preferred_element_type=f32) + bc_ref[0]

    # Residual + LayerNorm 1 (f32).
    x1 = _layer_norm(x_attn + xq, g1_ref[0], be1_ref[0])

    # MLP: Linear -> GELU(exact erf) -> Linear (bf16 operands, f32 accumulate).
    h1 = jnp.dot(x1.astype(bf16), w1_ref[...], preferred_element_type=f32) + b1_ref[0]
    h1 = _gelu_exact(h1)
    x_mlp = jnp.dot(h1.astype(bf16), w2_ref[...], preferred_element_type=f32) + b2_ref[0]

    # Residual + LayerNorm 2 (f32).
    o_ref[0] = _layer_norm(x_mlp + x1, g2_ref[0], be2_ref[0])


# --------------------------------------------------------------------------
# pallas_call builder
# --------------------------------------------------------------------------
def _vmem_capacity_bytes():
    try:
        return int(pltpu.get_tpu_info().vmem_capacity_bytes)
    except Exception:
        return 128 << 20


def _pick_q_block(T, vmem_capacity):
    # 512 amortizes per-step pipeline overhead on 128-MiB parts (v5e/v6e);
    # 256 keeps the working set inside v7x's 64-MiB VMEM.
    max_tq = 512 if vmem_capacity >= (96 << 20) else 256
    if T <= max_tq:
        return T
    for cand in (512, 384, 256, 192, 128, 64, 32, 16, 8):
        if cand <= max_tq and T % cand == 0:
            return cand
    return T  # no aligned divisor: fall back to a single full-sequence block


def _build_block_call(B, T, D, HD, Hm, TQ, num_heads, causal, weight_pipeline_mode):
    nQ = T // TQ
    Dh = HD // num_heads
    kernel = functools.partial(
        transformer_block_kernel, num_heads=num_heads, causal=causal)

    def wspec(shape):
        index_map = lambda b, i, _n=len(shape): (0,) * _n
        if weight_pipeline_mode is None:
            return pl.BlockSpec(shape, index_map)
        return pl.BlockSpec(shape, index_map, pipeline_mode=weight_pipeline_mode)

    in_specs = [pl.BlockSpec((1, TQ, D), lambda b, i: (b, i, 0))]   # xq (query rows)
    if not causal:
        # Full sequence for the one-time K/V projection; block only changes on
        # the batch axis so single-buffer it when pipeline modes are enabled.
        if weight_pipeline_mode is None:
            in_specs.append(pl.BlockSpec((1, T, D), lambda b, i: (b, 0, 0)))
        else:
            in_specs.append(pl.BlockSpec((1, T, D), lambda b, i: (b, 0, 0),
                                         pipeline_mode=pl.Buffered(1)))
    in_specs += [
        wspec((D, HD)), wspec((1, HD)),            # w_q (pre-scaled), b_q
        wspec((D, 2 * HD)), wspec((1, 2 * HD)),    # fused w_kv, b_kv
        wspec((HD, D)), wspec((1, D)),             # w_c, b_c
        wspec((1, D)), wspec((1, D)),              # ln1 gamma / beta
        wspec((D, Hm)), wspec((1, Hm)),            # mlp W1, b1
        wspec((Hm, D)), wspec((1, D)),             # mlp W2, b2
        wspec((1, D)), wspec((1, D)),              # ln2 gamma / beta
    ]

    # Advisory cost estimate (executed FLOPs: KV projection once, causal ~1/2).
    cf = 0.5 if causal else 1.0
    flops = int(2 * B * T * D * (3 * HD)                   # q/k/v projections (once)
                + cf * 4 * B * num_heads * T * T * Dh      # scores + P@V
                + 2 * B * T * HD * D                       # output projection
                + 4 * B * T * D * Hm)                      # MLP
    transcendentals = int(cf * B * num_heads * T * T + B * T * Hm)
    weight_bytes = 2 * (D * HD + D * 2 * HD + HD * D + D * Hm + Hm * D)  # bf16
    bias_bytes = 4 * (3 * HD + Hm + 6 * D)                               # f32
    x_read_bytes = B * T * D * 4 * (1 if causal else 2)
    bytes_accessed = int(x_read_bytes + B * T * D * 4 + weight_bytes + bias_bytes)

    # VMEM working set (includes the persistent K/V scratches this time).
    Dh_pad = max(Dh, 128)                                  # lane padding of scratch
    kv_scr_bytes = 2 * num_heads * T * Dh_pad * 2          # k_scr + v_scr (bf16)
    act_bytes = (4 * (2 * TQ * D + 2 * TQ * D)             # xq in + out (dbl-buffered)
                 + (2 * T * D * 4 if not causal else 0)    # xkv
                 + kv_scr_bytes
                 + 4 * TQ * HD                             # sa scratch
                 + 2 * TQ * HD + 4 * TQ * TQ + 4 * TQ * Dh_pad   # q, scores, acc
                 + 6 * TQ * Hm + 16 * TQ * D)              # mlp hidden + residuals
    cap = _vmem_capacity_bytes()
    vmem_limit = int(min(cap * 3 // 4,
                         max(32 << 20,
                             int(1.25 * (weight_bytes + bias_bytes + act_bytes)))))

    return pl.pallas_call(
        kernel,
        out_shape=jax.ShapeDtypeStruct((B, T, D), jnp.float32),
        grid_spec=pltpu.PrefetchScalarGridSpec(
            num_scalar_prefetch=0,
            grid=(B, nQ),
            in_specs=in_specs,
            out_specs=pl.BlockSpec((1, TQ, D), lambda b, i: (b, i, 0)),
            scratch_shapes=[
                pltpu.VMEM((num_heads, T, Dh), jnp.bfloat16),   # K (persists over i)
                pltpu.VMEM((num_heads, T, Dh), jnp.bfloat16),   # V (persists over i)
                pltpu.VMEM((TQ, HD), jnp.float32),              # concatenated heads
            ],
        ),
        # Inner axis must be "arbitrary": the K/V scratch carries across it.
        # Batch stays "parallel" so a second TensorCore (v7x) gets work.
        compiler_params=pltpu.CompilerParams(
            dimension_semantics=("parallel", "arbitrary"),
            vmem_limit_bytes=vmem_limit,
        ),
        cost_estimate=pl.CostEstimate(
            flops=flops, transcendentals=transcendentals,
            bytes_accessed=bytes_accessed),
    )


def transformer_block(x, params, *, num_heads, causal=True, q_block=None):
    """One TransformerBlock forward: x (B, T, D) f32 -> (B, T, D) f32."""
    B, T, D = x.shape
    HD = params["wq"].shape[1]
    Hm = params["w1"].shape[1]
    Dh = HD // num_heads
    if q_block is None:
        q_block = _pick_q_block(T, _vmem_capacity_bytes())
    assert T % q_block == 0, "sequence length must be divisible by q_block"
    if q_block < T:
        assert q_block % 8 == 0, "q_block must be a multiple of 8 when tiling T"

    bf16 = jnp.bfloat16
    # Fold the combined q/k scale (1/sqrt(Dh)) into the Q projection weights.
    scale = jnp.float32(1.0 / math.sqrt(Dh))
    wq = (params["wq"] * scale).astype(bf16)
    bq = (params["bq"] * scale).astype(jnp.float32)
    # Fuse K and V projections into a single (D, 2*H*Dh) weight.
    wkv = jnp.concatenate([params["wk"], params["wv"]], axis=1).astype(bf16)
    bkv = jnp.concatenate([params["bk"], params["bv"]], axis=1).astype(jnp.float32)
    wc = params["wc"].astype(bf16)
    w1 = params["w1"].astype(bf16)
    w2 = params["w2"].astype(bf16)

    common = (wq, bq, wkv, bkv, wc, params["bc"],
              params["g1"], params["be1"],
              w1, params["b1"], w2, params["b2"],
              params["g2"], params["be2"])
    args = ((x,) + common) if causal else ((x, x) + common)

    try:
        call = _build_block_call(B, T, D, HD, Hm, q_block, num_heads, causal,
                                 weight_pipeline_mode=pl.Buffered(1))
        return call(*args)
    except Exception:
        # Fallback if this JAX build rejects single-buffered BlockSpecs.
        call = _build_block_call(B, T, D, HD, Hm, q_block, num_heads, causal,
                                 weight_pipeline_mode=None)
        return call(*args)


# --------------------------------------------------------------------------
# Pure-JAX references (mirror the PyTorch math, all f32)
# --------------------------------------------------------------------------
def transformer_block_ref(x, p, *, num_heads, causal=True):
    B, T, D = x.shape
    H = num_heads
    q = x @ p["wq"] + p["bq"][0]
    k = x @ p["wk"] + p["bk"][0]
    v = x @ p["wv"] + p["bv"][0]
    q = q.reshape(B, T, H, D).transpose(0, 2, 1, 3) / D ** 0.25
    k = k.reshape(B, T, H, D).transpose(0, 2, 1, 3) / D ** 0.25
    v = v.reshape(B, T, H, D).transpose(0, 2, 1, 3)
    s = jnp.einsum("bhtd,bhsd->bhts", q, k)
    if causal:
        mask = jnp.tril(jnp.ones((T, T), bool))
        s = jnp.where(mask[None, None], s, -jnp.inf)
    a = jax.nn.softmax(s, axis=-1)
    sa = jnp.einsum("bhts,bhsd->bhtd", a, v).transpose(0, 2, 1, 3).reshape(B, T, H * D)
    attn = sa @ p["wc"] + p["bc"][0]

    def ln(y, g, b):
        mu = y.mean(-1, keepdims=True)
        var = ((y - mu) ** 2).mean(-1, keepdims=True)
        return (y - mu) / jnp.sqrt(var + LN_EPS) * g[0] + b[0]

    x1 = ln(attn + x, p["g1"], p["be1"])
    h = x1 @ p["w1"] + p["b1"][0]
    h = 0.5 * h * (1.0 + lax.erf(h / jnp.sqrt(2.0)))
    x_mlp = h @ p["w2"] + p["b2"][0]
    return ln(x_mlp + x1, p["g2"], p["be2"])


# --------------------------------------------------------------------------
# Full Transformer forward (eval mode): embedding / logits head in plain JAX.
# --------------------------------------------------------------------------
def _transformer_forward(tokens, mp, block_fn, *, num_heads, causal=True,
                         temperature=1.0):
    emb = jnp.take(mp["embedding"], tokens, axis=0)          # (B, T, E)
    T = tokens.shape[1]
    x = emb + mp["pos_embedding"][:T][None]                  # dropout = identity (eval)
    for bp in mp["blocks"]:
        x = block_fn(x, bp, num_heads=num_heads, causal=causal)
    logits = x @ mp["w_logits"] + mp["b_logits"][0]
    return jax.nn.log_softmax(logits / temperature, axis=-1)


def transformer_forward(tokens, mp, **kw):
    return _transformer_forward(tokens, mp, transformer_block, **kw)


def transformer_forward_ref(tokens, mp, **kw):
    return _transformer_forward(tokens, mp, transformer_block_ref, **kw)


def nll_loss(log_prob, tokens, reduction="mean"):
    # Matches Transformer.forward + LossFun: NLL of next-token targets.
    lp = log_prob[:, :-1]
    tgt = tokens[:, 1:]
    nll = -jnp.take_along_axis(lp, tgt[..., None], axis=-1)[..., 0]  # (B, T-1)
    if reduction == "sum":
        return jnp.sum(nll)
    if reduction == "mean":
        return jnp.mean(jnp.sum(nll, axis=1))
    raise ValueError("Reduction could be either `sum` or `mean`.")


# --------------------------------------------------------------------------
# Parameter initialization
# --------------------------------------------------------------------------
def init_block_params(key, D, H, neurons):
    HD = D * H
    Hm = neurons * D
    ks = jax.random.split(key, 12)
    n = lambda k, shp, s=0.05: (s * jax.random.normal(k, shp)).astype(jnp.float32)
    return {
        "wq": n(ks[0], (D, HD)), "bq": n(ks[1], (1, HD)),
        "wk": n(ks[2], (D, HD)), "bk": n(ks[3], (1, HD)),
        "wv": n(ks[4], (D, HD)), "bv": n(ks[5], (1, HD)),
        "wc": n(ks[6], (HD, D)), "bc": n(ks[7], (1, D)),
        "g1": jnp.ones((1, D), jnp.float32), "be1": jnp.zeros((1, D), jnp.float32),
        "w1": n(ks[8], (D, Hm)), "b1": n(ks[9], (1, Hm)),
        "w2": n(ks[10], (Hm, D)), "b2": n(ks[11], (1, D)),
        "g2": jnp.ones((1, D), jnp.float32), "be2": jnp.zeros((1, D), jnp.float32),
    }


def init_transformer_params(key, num_tokens, num_token_vals, num_emb,
                            num_neurons, num_heads, num_blocks):
    keys = jax.random.split(key, num_blocks + 4)
    blocks = [init_block_params(keys[i], num_emb, num_heads, num_neurons)
              for i in range(num_blocks)]
    return {
        "embedding": jax.random.normal(keys[-4], (num_token_vals, num_emb),
                                       jnp.float32),
        "pos_embedding": jax.random.normal(keys[-3], (num_tokens, num_emb),
                                           jnp.float32),
        "w_logits": (0.05 * jax.random.normal(keys[-2], (num_emb, num_token_vals))
                     ).astype(jnp.float32),
        "b_logits": (0.05 * jax.random.normal(keys[-1], (1, num_token_vals))
                     ).astype(jnp.float32),
        "blocks": blocks,
    }


if __name__ == "__main__":
    key = jax.random.PRNGKey(0)
    kx, kp, kt, km, kx2, kp2 = jax.random.split(key, 6)

    # ---- 1) single fused TransformerBlock (T == q_block), causal + non-causal
    B, T, D, H, NEURONS = 2, 8, 32, 4, 2
    x = jax.random.normal(kx, (B, T, D), jnp.float32)
    bparams = init_block_params(kp, D, H, NEURONS)

    out = jax.block_until_ready(
        transformer_block(x, bparams, num_heads=H, causal=True))
    ref = transformer_block_ref(x, bparams, num_heads=H, causal=True)
    assert out.shape == (B, T, D)
    blk_err = float(jnp.max(jnp.abs(out - ref)))
    assert blk_err < 5e-2, f"causal block max abs err {blk_err}"

    out_nc = jax.block_until_ready(
        transformer_block(x, bparams, num_heads=H, causal=False))
    ref_nc = transformer_block_ref(x, bparams, num_heads=H, causal=False)
    nc_err = float(jnp.max(jnp.abs(out_nc - ref_nc)))
    assert nc_err < 5e-2, f"non-causal block max abs err {nc_err}"

    # ---- 2) multi-tile sequence (T > q_block): exercises the persistent K/V
    #         scratch, dynamic-trip-count online softmax and diagonal masking.
    B2, T2, D2, H2 = 2, 32, 32, 2
    x2 = jax.random.normal(kx2, (B2, T2, D2), jnp.float32)
    bparams2 = init_block_params(kp2, D2, H2, NEURONS)
    out2 = jax.block_until_ready(
        transformer_block(x2, bparams2, num_heads=H2, causal=True, q_block=8))
    ref2 = transformer_block_ref(x2, bparams2, num_heads=H2, causal=True)
    tile_err = float(jnp.max(jnp.abs(out2 - ref2)))
    assert tile_err < 5e-2, f"tiled block max abs err {tile_err}"

    # ---- 3) full Transformer forward (eval) built on the Pallas block ------
    NUM_TOKENS, NUM_VALS, NUM_BLOCKS, MODEL_H = 8, 16, 2, 2
    mp = init_transformer_params(km, NUM_TOKENS, NUM_VALS, D, NEURONS,
                                 MODEL_H, NUM_BLOCKS)
    tokens = jax.random.randint(kt, (B, NUM_TOKENS), 0, NUM_VALS)

    logp = jax.block_until_ready(transformer_forward(tokens, mp,
                                                     num_heads=MODEL_H))
    logp_ref = transformer_forward_ref(tokens, mp, num_heads=MODEL_H)
    assert logp.shape == (B, NUM_TOKENS, NUM_VALS)
    mdl_err = float(jnp.max(jnp.abs(logp - logp_ref)))
    assert mdl_err < 1e-1, f"model max abs err {mdl_err}"

    loss = float(nll_loss(logp, tokens, reduction="mean"))
    loss_ref = float(nll_loss(logp_ref, tokens, reduction="mean"))
    assert abs(loss - loss_ref) < 1e-1 * max(1.0, abs(loss_ref)), (loss, loss_ref)

    print("KERNEL_OK")
</pallas_src>

<mosaic_0001>
module attributes {stable_mosaic.version = 11 : i64} {
  func.func @transformer_block_kernel(%arg0: i32, %arg1: i32, %arg2: memref<1x8x32xf32, #tpu.memory_space<vmem>>, %arg3: memref<32x128xbf16, #tpu.memory_space<vmem>>, %arg4: memref<1x128xf32, #tpu.memory_space<vmem>>, %arg5: memref<32x256xbf16, #tpu.memory_space<vmem>>, %arg6: memref<1x256xf32, #tpu.memory_space<vmem>>, %arg7: memref<128x32xbf16, #tpu.memory_space<vmem>>, %arg8: memref<1x32xf32, #tpu.memory_space<vmem>>, %arg9: memref<1x32xf32, #tpu.memory_space<vmem>>, %arg10: memref<1x32xf32, #tpu.memory_space<vmem>>, %arg11: memref<32x64xbf16, #tpu.memory_space<vmem>>, %arg12: memref<1x64xf32, #tpu.memory_space<vmem>>, %arg13: memref<64x32xbf16, #tpu.memory_space<vmem>>, %arg14: memref<1x32xf32, #tpu.memory_space<vmem>>, %arg15: memref<1x32xf32, #tpu.memory_space<vmem>>, %arg16: memref<1x32xf32, #tpu.memory_space<vmem>>, %arg17: memref<1x8x32xf32, #tpu.memory_space<vmem>>, %arg18: memref<4x8x32xbf16, #tpu.memory_space<vmem>>, %arg19: memref<4x8x32xbf16, #tpu.memory_space<vmem>>, %arg20: memref<8x128xf32, #tpu.memory_space<vmem>>) attributes {dimension_semantics = [#tpu.dimension_semantics<parallel>, #tpu.dimension_semantics<arbitrary>], iteration_bounds = array<i64: 2, 1>, scalar_prefetch = 0 : i64, scratch_operands = 3 : i64, tpu.core_type = #tpu.core_type<tc>, window_params = [{transform_indices = @transform_0, window_bounds = array<i64: 1, 8, 32>}, {pipeline_mode = #tpu.pipeline_mode<synchronous>, transform_indices = @transform_1, window_bounds = array<i64: 32, 128>}, {pipeline_mode = #tpu.pipeline_mode<synchronous>, transform_indices = @transform_2, window_bounds = array<i64: 1, 128>}, {pipeline_mode = #tpu.pipeline_mode<synchronous>, transform_indices = @transform_3, window_bounds = array<i64: 32, 256>}, {pipeline_mode = #tpu.pipeline_mode<synchronous>, transform_indices = @transform_4, window_bounds = array<i64: 1, 256>}, {pipeline_mode = #tpu.pipeline_mode<synchronous>, transform_indices = @transform_5, window_bounds = array<i64: 128, 32>}, {pipeline_mode = #tpu.pipeline_mode<synchronous>, transform_indices = @transform_6, window_bounds = array<i64: 1, 32>}, {pipeline_mode = #tpu.pipeline_mode<synchronous>, transform_indices = @transform_7, window_bounds = array<i64: 1, 32>}, {pipeline_mode = #tpu.pipeline_mode<synchronous>, transform_indices = @transform_8, window_bounds = array<i64: 1, 32>}, {pipeline_mode = #tpu.pipeline_mode<synchronous>, transform_indices = @transform_9, window_bounds = array<i64: 32, 64>}, {pipeline_mode = #tpu.pipeline_mode<synchronous>, transform_indices = @transform_10, window_bounds = array<i64: 1, 64>}, {pipeline_mode = #tpu.pipeline_mode<synchronous>, transform_indices = @transform_11, window_bounds = array<i64: 64, 32>}, {pipeline_mode = #tpu.pipeline_mode<synchronous>, transform_indices = @transform_12, window_bounds = array<i64: 1, 32>}, {pipeline_mode = #tpu.pipeline_mode<synchronous>, transform_indices = @transform_13, window_bounds = array<i64: 1, 32>}, {pipeline_mode = #tpu.pipeline_mode<synchronous>, transform_indices = @transform_14, window_bounds = array<i64: 1, 32>}, {transform_indices = @transform_15, window_bounds = array<i64: 1, 8, 32>}]} {
    %c0 = arith.constant 0 : index
    %c0_0 = arith.constant 0 : index
    %c0_1 = arith.constant 0 : index
    %0 = vector.load %arg2[%c0, %c0_0, %c0_1] : memref<1x8x32xf32, #tpu.memory_space<vmem>>, vector<1x8x32xf32>
    %1 = vector.shape_cast %0 : vector<1x8x32xf32> to vector<8x32xf32>
    %2 = arith.truncf %1 : vector<8x32xf32> to vector<8x32xbf16>
    %c8_i32 = arith.constant 8 : i32
    %3 = arith.muli %arg1, %c8_i32 : i32
    %4 = tpu.assume_multiple %3, 8 : i32
    %c0_2 = arith.constant 0 : index
    %c0_3 = arith.constant 0 : index
    %5 = vector.load %arg5[%c0_2, %c0_3] : memref<32x256xbf16, #tpu.memory_space<vmem>>, vector<32x256xbf16>
    %cst = arith.constant dense<0.000000e+00> : vector<8x256xf32>
    %6 = tpu.matmul %2, %5, %cst {dimension_numbers = #tpu.dot_dimension_numbers<[1], [0], [0], [1], [0, 0, 1, 1], [], []>} : vector<8x32xbf16>, vector<32x256xbf16>, vector<8x256xf32> -> vector<8x256xf32>
    %c0_4 = arith.constant 0 : index
    %c0_5 = arith.constant 0 : index
    %7 = vector.load %arg6[%c0_4, %c0_5] : memref<1x256xf32, #tpu.memory_space<vmem>>, vector<1x256xf32>
    %8 = vector.shape_cast %7 : vector<1x256xf32> to vector<256xf32>
    %9 = vector.shape_cast %8 : vector<256xf32> to vector<1x256xf32>
    %10 = vector.broadcast %9 : vector<1x256xf32> to vector<8x256xf32>
    %11 = arith.addf %6, %10 : vector<8x256xf32>
    %12 = arith.truncf %11 : vector<8x256xf32> to vector<8x256xbf16>
    %13 = vector.extract_strided_slice %12 {offsets = [0, 0], sizes = [8, 32], strides = [1, 1]} : vector<8x256xbf16> to vector<8x32xbf16>
    %c0_6 = arith.constant 0 : index
    %14 = arith.index_cast %4 : i32 to index
    %c0_7 = arith.constant 0 : index
    %15 = vector.load %arg18[%c0_6, %14, %c0_7] : memref<4x8x32xbf16, #tpu.memory_space<vmem>>, vector<1x8x32xbf16>
    %16 = vector.shape_cast %15 : vector<1x8x32xbf16> to vector<8x32xbf16>
    %17 = vector.shape_cast %13 : vector<8x32xbf16> to vector<1x8x32xbf16>
    tpu.vector_store %arg18[%c0_6, %14, %c0_7], %17 {strides = array<i32>} : memref<4x8x32xbf16, #tpu.memory_space<vmem>>, vector<1x8x32xbf16>,
    %18 = vector.extract_strided_slice %12 {offsets = [0, 128], sizes = [8, 32], strides = [1, 1]} : vector<8x256xbf16> to vector<8x32xbf16>
    %c0_8 = arith.constant 0 : index
    %19 = arith.index_cast %4 : i32 to index
    %c0_9 = arith.constant 0 : index
    %20 = vector.load %arg19[%c0_8, %19, %c0_9] : memref<4x8x32xbf16, #tpu.memory_space<vmem>>, vector<1x8x32xbf16>
    %21 = vector.shape_cast %20 : vector<1x8x32xbf16> to vector<8x32xbf16>
    %22 = vector.shape_cast %18 : vector<8x32xbf16> to vector<1x8x32xbf16>
    tpu.vector_store %arg19[%c0_8, %19, %c0_9], %22 {strides = array<i32>} : memref<4x8x32xbf16, #tpu.memory_space<vmem>>, vector<1x8x32xbf16>,
    %23 = vector.extract_strided_slice %12 {offsets = [0, 32], sizes = [8, 32], strides = [1, 1]} : vector<8x256xbf16> to vector<8x32xbf16>
    %c1 = arith.constant 1 : index
    %24 = arith.index_cast %4 : i32 to index
    %c0_10 = arith.constant 0 : index
    %25 = vector.load %arg18[%c1, %24, %c0_10] : memref<4x8x32xbf16, #tpu.memory_space<vmem>>, vector<1x8x32xbf16>
    %26 = vector.shape_cast %25 : vector<1x8x32xbf16> to vector<8x32xbf16>
    %27 = vector.shape_cast %23 : vector<8x32xbf16> to vector<1x8x32xbf16>
    tpu.vector_store %arg18[%c1, %24, %c0_10], %27 {strides = array<i32>} : memref<4x8x32xbf16, #tpu.memory_space<vmem>>, vector<1x8x32xbf16>,
    %28 = vector.extract_strided_slice %12 {offsets = [0, 160], sizes = [8, 32], strides = [1, 1]} : vector<8x256xbf16> to vector<8x32xbf16>
    %c1_11 = arith.constant 1 : index
    %29 = arith.index_cast %4 : i32 to index
    %c0_12 = arith.constant 0 : index
    %30 = vector.load %arg19[%c1_11, %29, %c0_12] : memref<4x8x32xbf16, #tpu.memory_space<vmem>>, vector<1x8x32xbf16>
    %31 = vector.shape_cast %30 : vector<1x8x32xbf16> to vector<8x32xbf16>
    %32 = vector.shape_cast %28 : vector<8x32xbf16> to vector<1x8x32xbf16>
    tpu.vector_store %arg19[%c1_11, %29, %c0_12], %32 {strides = array<i32>} : memref<4x8x32xbf16, #tpu.memory_space<vmem>>, vector<1x8x32xbf16>,
    %33 = vector.extract_strided_slice %12 {offsets = [0, 64], sizes = [8, 32], strides = [1, 1]} : vector<8x256xbf16> to vector<8x32xbf16>
    %c2 = arith.constant 2 : index
    %34 = arith.index_cast %4 : i32 to index
    %c0_13 = arith.constant 0 : index
    %35 = vector.load %arg18[%c2, %34, %c0_13] : memref<4x8x32xbf16, #tpu.memory_space<vmem>>, vector<1x8x32xbf16>
    %36 = vector.shape_cast %35 : vector<1x8x32xbf16> to vector<8x32xbf16>
    %37 = vector.shape_cast %33 : vector<8x32xbf16> to vector<1x8x32xbf16>
    tpu.vector_store %arg18[%c2, %34, %c0_13], %37 {strides = array<i32>} : memref<4x8x32xbf16, #tpu.memory_space<vmem>>, vector<1x8x32xbf16>,
    %38 = vector.extract_strided_slice %12 {offsets = [0, 192], sizes = [8, 32], strides = [1, 1]} : vector<8x256xbf16> to vector<8x32xbf16>
    %c2_14 = arith.constant 2 : index
    %39 = arith.index_cast %4 : i32 to index
    %c0_15 = arith.constant 0 : index
    %40 = vector.load %arg19[%c2_14, %39, %c0_15] : memref<4x8x32xbf16, #tpu.memory_space<vmem>>, vector<1x8x32xbf16>
    %41 = vector.shape_cast %40 : vector<1x8x32xbf16> to vector<8x32xbf16>
    %42 = vector.shape_cast %38 : vector<8x32xbf16> to vector<1x8x32xbf16>
    tpu.vector_store %arg19[%c2_14, %39, %c0_15], %42 {strides = array<i32>} : memref<4x8x32xbf16, #tpu.memory_space<vmem>>, vector<1x8x32xbf16>,
    %43 = vector.extract_strided_slice %12 {offsets = [0, 96], sizes = [8, 32], strides = [1, 1]} : vector<8x256xbf16> to vector<8x32xbf16>
    %c3 = arith.constant 3 : index
    %44 = arith.index_cast %4 : i32 to index
    %c0_16 = arith.constant 0 : index
    %45 = vector.load %arg18[%c3, %44, %c0_16] : memref<4x8x32xbf16, #tpu.memory_space<vmem>>, vector<1x8x32xbf16>
    %46 = vector.shape_cast %45 : vector<1x8x32xbf16> to vector<8x32xbf16>
    %47 = vector.shape_cast %43 : vector<8x32xbf16> to vector<1x8x32xbf16>
    tpu.vector_store %arg18[%c3, %44, %c0_16], %47 {strides = array<i32>} : memref<4x8x32xbf16, #tpu.memory_space<vmem>>, vector<1x8x32xbf16>,
    %48 = vector.extract_strided_slice %12 {offsets = [0, 224], sizes = [8, 32], strides = [1, 1]} : vector<8x256xbf16> to vector<8x32xbf16>
    %c3_17 = arith.constant 3 : index
    %49 = arith.index_cast %4 : i32 to index
    %c0_18 = arith.constant 0 : index
    %50 = vector.load %arg19[%c3_17, %49, %c0_18] : memref<4x8x32xbf16, #tpu.memory_space<vmem>>, vector<1x8x32xbf16>
    %51 = vector.shape_cast %50 : vector<1x8x32xbf16> to vector<8x32xbf16>
    %52 = vector.shape_cast %48 : vector<8x32xbf16> to vector<1x8x32xbf16>
    tpu.vector_store %arg19[%c3_17, %49, %c0_18], %52 {strides = array<i32>} : memref<4x8x32xbf16, #tpu.memory_space<vmem>>, vector<1x8x32xbf16>,
    %c1_i32 = arith.constant 1 : i32
    %53 = arith.addi %arg1, %c1_i32 : i32
    %c0_19 = arith.constant 0 : index
    %c0_20 = arith.constant 0 : index
    %54 = vector.load %arg3[%c0_19, %c0_20] : memref<32x128xbf16, #tpu.memory_space<vmem>>, vector<32x128xbf16>
    %cst_21 = arith.constant dense<0.000000e+00> : vector<8x128xf32>
    %55 = tpu.matmul %2, %54, %cst_21 {dimension_numbers = #tpu.dot_dimension_numbers<[1], [0], [0], [1], [0, 0, 1, 1], [], []>} : vector<8x32xbf16>, vector<32x128xbf16>, vector<8x128xf32> -> vector<8x128xf32>
    %c0_22 = arith.constant 0 : index
    %c0_23 = arith.constant 0 : index
    %56 = vector.load %arg4[%c0_22, %c0_23] : memref<1x128xf32, #tpu.memory_space<vmem>>, vector<1x128xf32>
    %57 = vector.shape_cast %56 : vector<1x128xf32> to vector<128xf32>
    %58 = vector.shape_cast %57 : vector<128xf32> to vector<1x128xf32>
    %59 = vector.broadcast %58 : vector<1x128xf32> to vector<8x128xf32>
    %60 = arith.addf %55, %59 : vector<8x128xf32>
    %61 = arith.truncf %60 : vector<8x128xf32> to vector<8x128xbf16>
    %c8_i32_24 = arith.constant 8 : i32
    %62 = arith.muli %arg1, %c8_i32_24 : i32
    %63 = tpu.iota {dimensions = array<i32: 0>} : vector<8x8xi32>
    %64 = vector.broadcast %62 : i32 to vector<8x8xi32>
    %65 = arith.addi %64, %63 : vector<8x8xi32>
    %66 = tpu.iota {dimensions = array<i32: 1>} : vector<8x8xi32>
    %67 = vector.extract_strided_slice %61 {offsets = [0, 0], sizes = [8, 32], strides = [1, 1]} : vector<8x128xbf16> to vector<8x32xbf16>
    %cst_25 = arith.constant -1.000000e+30 : f32
    %68 = vector.broadcast %cst_25 : f32 to vector<8x1xf32>
    %cst_26 = arith.constant 0.000000e+00 : f32
    %69 = vector.broadcast %cst_26 : f32 to vector<8x1xf32>
    %cst_27 = arith.constant 0.000000e+00 : f32
    %70 = vector.broadcast %cst_27 : f32 to vector<8x32xf32>
    %cst_28 = arith.constant -1.000000e+30 : f32
    %c0_i32 = arith.constant 0 : i32
    %71 = arith.subi %53, %c0_i32 : i32
    %72 = arith.addi %c0_i32, %71 : i32
    %c1_i32_29 = arith.constant 1 : i32
    %73:3 = scf.for %arg21 = %c0_i32 to %72 step %c1_i32_29 iter_args(%arg22 = %68, %arg23 = %69, %arg24 = %70) -> (vector<8x1xf32>, vector<8x1xf32>, vector<8x32xf32>)  : i32 {
      %c8_i32_94 = arith.constant 8 : i32
      %201 = arith.muli %arg21, %c8_i32_94 : i32
      %202 = tpu.assume_multiple %201, 8 : i32
      %c0_95 = arith.constant 0 : index
      %203 = arith.index_cast %202 : i32 to index
      %c0_96 = arith.constant 0 : index
      %204 = vector.load %arg18[%c0_95, %203, %c0_96] : memref<4x8x32xbf16, #tpu.memory_space<vmem>>, vector<1x8x32xbf16>
      %205 = vector.shape_cast %204 : vector<1x8x32xbf16> to vector<8x32xbf16>
      %c0_97 = arith.constant 0 : index
      %206 = arith.index_cast %202 : i32 to index
      %c0_98 = arith.constant 0 : index
      %207 = vector.load %arg19[%c0_97, %206, %c0_98] : memref<4x8x32xbf16, #tpu.memory_space<vmem>>, vector<1x8x32xbf16>
      %208 = vector.shape_cast %207 : vector<1x8x32xbf16> to vector<8x32xbf16>
      %cst_99 = arith.constant dense<0.000000e+00> : vector<8x8xf32>
      %209 = tpu.matmul %67, %205, %cst_99 {dimension_numbers = #tpu.dot_dimension_numbers<[1], [1], [0], [0], [0, 0, 1, 0], [], []>} : vector<8x32xbf16>, vector<8x32xbf16>, vector<8x8xf32> -> vector<8x8xf32>
      %c8_i32_100 = arith.constant 8 : i32
      %210 = arith.muli %arg21, %c8_i32_100 : i32
      %211 = vector.broadcast %210 : i32 to vector<8x8xi32>
      %212 = arith.addi %211, %66 : vector<8x8xi32>
      %213 = arith.cmpi sge, %65, %212 : vector<8x8xi32>
      %214 = vector.broadcast %cst_28 : f32 to vector<8x8xf32>
      %215 = arith.select %213, %209, %214 : vector<8x8xi1>, vector<8x8xf32>
      %cst_101 = arith.constant dense<0xFF800000> : vector<8xf32>
      %216 = vector.multi_reduction <maximumf>, %215, %cst_101 [1] : vector<8x8xf32> to vector<8xf32>
      %217 = vector.shape_cast %216 : vector<8xf32> to vector<8x1xf32>
      %218 = arith.maximumf %arg22, %217 : vector<8x1xf32>
      %219 = arith.subf %arg22, %218 : vector<8x1xf32>
      %220 = math.exp %219 : vector<8x1xf32>
      %221 = vector.broadcast %218 : vector<8x1xf32> to vector<8x8xf32>
      %222 = arith.subf %215, %221 : vector<8x8xf32>
      %223 = math.exp %222 : vector<8x8xf32>
      %224 = arith.mulf %220, %arg23 : vector<8x1xf32>
      %cst_102 = arith.constant dense<0.000000e+00> : vector<8xf32>
      %225 = vector.multi_reduction <add>, %223, %cst_102 [1] : vector<8x8xf32> to vector<8xf32>
      %226 = vector.shape_cast %225 : vector<8xf32> to vector<8x1xf32>
      %227 = arith.addf %224, %226 : vector<8x1xf32>
      %228 = vector.broadcast %220 : vector<8x1xf32> to vector<8x32xf32>
      %229 = arith.mulf %228, %arg24 : vector<8x32xf32>
      %230 = arith.truncf %223 : vector<8x8xf32> to vector<8x8xbf16>
      %cst_103 = arith.constant dense<0.000000e+00> : vector<8x32xf32>
      %231 = tpu.matmul %230, %208, %cst_103 {dimension_numbers = #tpu.dot_dimension_numbers<[1], [0], [0], [1], [0, 0, 1, 1], [], []>} : vector<8x8xbf16>, vector<8x32xbf16>, vector<8x32xf32> -> vector<8x32xf32>
      %232 = arith.addf %229, %231 : vector<8x32xf32>
      scf.yield %218, %227, %232 : vector<8x1xf32>, vector<8x1xf32>, vector<8x32xf32>
    }
    %74 = vector.broadcast %73#1 : vector<8x1xf32> to vector<8x32xf32>
    %75 = arith.divf %73#2, %74 : vector<8x32xf32>
    %c0_30 = arith.constant 0 : index
    %c0_31 = arith.constant 0 : index
    %76 = vector.load %arg20[%c0_30, %c0_31] : memref<8x128xf32, #tpu.memory_space<vmem>>, vector<8x32xf32>
    tpu.vector_store %arg20[%c0_30, %c0_31], %75 {strides = array<i32>} : memref<8x128xf32, #tpu.memory_space<vmem>>, vector<8x32xf32>,
    %77 = vector.extract_strided_slice %61 {offsets = [0, 32], sizes = [8, 32], strides = [1, 1]} : vector<8x128xbf16> to vector<8x32xbf16>
    %cst_32 = arith.constant -1.000000e+30 : f32
    %78 = vector.broadcast %cst_32 : f32 to vector<8x1xf32>
    %cst_33 = arith.constant 0.000000e+00 : f32
    %79 = vector.broadcast %cst_33 : f32 to vector<8x1xf32>
    %cst_34 = arith.constant 0.000000e+00 : f32
    %80 = vector.broadcast %cst_34 : f32 to vector<8x32xf32>
    %cst_35 = arith.constant -1.000000e+30 : f32
    %c0_i32_36 = arith.constant 0 : i32
    %81 = arith.subi %53, %c0_i32_36 : i32
    %82 = arith.addi %c0_i32_36, %81 : i32
    %c1_i32_37 = arith.constant 1 : i32
    %83:3 = scf.for %arg21 = %c0_i32_36 to %82 step %c1_i32_37 iter_args(%arg22 = %78, %arg23 = %79, %arg24 = %80) -> (vector<8x1xf32>, vector<8x1xf32>, vector<8x32xf32>)  : i32 {
      %c8_i32_94 = arith.constant 8 : i32
      %201 = arith.muli %arg21, %c8_i32_94 : i32
      %202 = tpu.assume_multiple %201, 8 : i32
      %c1_95 = arith.constant 1 : index
      %203 = arith.index_cast %202 : i32 to index
      %c0_96 = arith.constant 0 : index
      %204 = vector.load %arg18[%c1_95, %203, %c0_96] : memref<4x8x32xbf16, #tpu.memory_space<vmem>>, vector<1x8x32xbf16>
      %205 = vector.shape_cast %204 : vector<1x8x32xbf16> to vector<8x32xbf16>
      %c1_97 = arith.constant 1 : index
      %206 = arith.index_cast %202 : i32 to index
      %c0_98 = arith.constant 0 : index
      %207 = vector.load %arg19[%c1_97, %206, %c0_98] : memref<4x8x32xbf16, #tpu.memory_space<vmem>>, vector<1x8x32xbf16>
      %208 = vector.shape_cast %207 : vector<1x8x32xbf16> to vector<8x32xbf16>
      %cst_99 = arith.constant dense<0.000000e+00> : vector<8x8xf32>
      %209 = tpu.matmul %77, %205, %cst_99 {dimension_numbers = #tpu.dot_dimension_numbers<[1], [1], [0], [0], [0, 0, 1, 0], [], []>} : vector<8x32xbf16>, vector<8x32xbf16>, vector<8x8xf32> -> vector<8x8xf32>
      %c8_i32_100 = arith.constant 8 : i32
      %210 = arith.muli %arg21, %c8_i32_100 : i32
      %211 = vector.broadcast %210 : i32 to vector<8x8xi32>
      %212 = arith.addi %211, %66 : vector<8x8xi32>
      %213 = arith.cmpi sge, %65, %212 : vector<8x8xi32>
      %214 = vector.broadcast %cst_35 : f32 to vector<8x8xf32>
      %215 = arith.select %213, %209, %214 : vector<8x8xi1>, vector<8x8xf32>
      %cst_101 = arith.constant dense<0xFF800000> : vector<8xf32>
      %216 = vector.multi_reduction <maximumf>, %215, %cst_101 [1] : vector<8x8xf32> to vector<8xf32>
      %217 = vector.shape_cast %216 : vector<8xf32> to vector<8x1xf32>
      %218 = arith.maximumf %arg22, %217 : vector<8x1xf32>
      %219 = arith.subf %arg22, %218 : vector<8x1xf32>
      %220 = math.exp %219 : vector<8x1xf32>
      %221 = vector.broadcast %218 : vector<8x1xf32> to vector<8x8xf32>
      %222 = arith.subf %215, %221 : vector<8x8xf32>
      %223 = math.exp %222 : vector<8x8xf32>
      %224 = arith.mulf %220, %arg23 : vector<8x1xf32>
      %cst_102 = arith.constant dense<0.000000e+00> : vector<8xf32>
      %225 = vector.multi_reduction <add>, %223, %cst_102 [1] : vector<8x8xf32> to vector<8xf32>
      %226 = vector.shape_cast %225 : vector<8xf32> to vector<8x1xf32>
      %227 = arith.addf %224, %226 : vector<8x1xf32>
      %228 = vector.broadcast %220 : vector<8x1xf32> to vector<8x32xf32>
      %229 = arith.mulf %228, %arg24 : vector<8x32xf32>
      %230 = arith.truncf %223 : vector<8x8xf32> to vector<8x8xbf16>
      %cst_103 = arith.constant dense<0.000000e+00> : vector<8x32xf32>
      %231 = tpu.matmul %230, %208, %cst_103 {dimension_numbers = #tpu.dot_dimension_numbers<[1], [0], [0], [1], [0, 0, 1, 1], [], []>} : vector<8x8xbf16>, vector<8x32xbf16>, vector<8x32xf32> -> vector<8x32xf32>
      %232 = arith.addf %229, %231 : vector<8x32xf32>
      scf.yield %218, %227, %232 : vector<8x1xf32>, vector<8x1xf32>, vector<8x32xf32>
    }
    %84 = vector.broadcast %83#1 : vector<8x1xf32> to vector<8x32xf32>
    %85 = arith.divf %83#2, %84 : vector<8x32xf32>
    %c0_38 = arith.constant 0 : index
    %c32 = arith.constant 32 : index
    %86 = vector.load %arg20[%c0_38, %c32] : memref<8x128xf32, #tpu.memory_space<vmem>>, vector<8x32xf32>
    tpu.vector_store %arg20[%c0_38, %c32], %85 {strides = array<i32>} : memref<8x128xf32, #tpu.memory_space<vmem>>, vector<8x32xf32>,
    %87 = vector.extract_strided_slice %61 {offsets = [0, 64], sizes = [8, 32], strides = [1, 1]} : vector<8x128xbf16> to vector<8x32xbf16>
    %cst_39 = arith.constant -1.000000e+30 : f32
    %88 = vector.broadcast %cst_39 : f32 to vector<8x1xf32>
    %cst_40 = arith.constant 0.000000e+00 : f32
    %89 = vector.broadcast %cst_40 : f32 to vector<8x1xf32>
    %cst_41 = arith.constant 0.000000e+00 : f32
    %90 = vector.broadcast %cst_41 : f32 to vector<8x32xf32>
    %cst_42 = arith.constant -1.000000e+30 : f32
    %c0_i32_43 = arith.constant 0 : i32
    %91 = arith.subi %53, %c0_i32_43 : i32
    %92 = arith.addi %c0_i32_43, %91 : i32
    %c1_i32_44 = arith.constant 1 : i32
    %93:3 = scf.for %arg21 = %c0_i32_43 to %92 step %c1_i32_44 iter_args(%arg22 = %88, %arg23 = %89, %arg24 = %90) -> (vector<8x1xf32>, vector<8x1xf32>, vector<8x32xf32>)  : i32 {
      %c8_i32_94 = arith.constant 8 : i32
      %201 = arith.muli %arg21, %c8_i32_94 : i32
      %202 = tpu.assume_multiple %201, 8 : i32
      %c2_95 = arith.constant 2 : index
      %203 = arith.index_cast %202 : i32 to index
      %c0_96 = arith.constant 0 : index
      %204 = vector.load %arg18[%c2_95, %203, %c0_96] : memref<4x8x32xbf16, #tpu.memory_space<vmem>>, vector<1x8x32xbf16>
      %205 = vector.shape_cast %204 : vector<1x8x32xbf16> to vector<8x32xbf16>
      %c2_97 = arith.constant 2 : index
      %206 = arith.index_cast %202 : i32 to index
      %c0_98 = arith.constant 0 : index
      %207 = vector.load %arg19[%c2_97, %206, %c0_98] : memref<4x8x32xbf16, #tpu.memory_space<vmem>>, vector<1x8x32xbf16>
      %208 = vector.shape_cast %207 : vector<1x8x32xbf16> to vector<8x32xbf16>
      %cst_99 = arith.constant dense<0.000000e+00> : vector<8x8xf32>
      %209 = tpu.matmul %87, %205, %cst_99 {dimension_numbers = #tpu.dot_dimension_numbers<[1], [1], [0], [0], [0, 0, 1, 0], [], []>} : vector<8x32xbf16>, vector<8x32xbf16>, vector<8x8xf32> -> vector<8x8xf32>
      %c8_i32_100 = arith.constant 8 : i32
      %210 = arith.muli %arg21, %c8_i32_100 : i32
      %211 = vector.broadcast %210 : i32 to vector<8x8xi32>
      %212 = arith.addi %211, %66 : vector<8x8xi32>
      %213 = arith.cmpi sge, %65, %212 : vector<8x8xi32>
      %214 = vector.broadcast %cst_42 : f32 to vector<8x8xf32>
      %215 = arith.select %213, %209, %214 : vector<8x8xi1>, vector<8x8xf32>
      %cst_101 = arith.constant dense<0xFF800000> : vector<8xf32>
      %216 = vector.multi_reduction <maximumf>, %215, %cst_101 [1] : vector<8x8xf32> to vector<8xf32>
      %217 = vector.shape_cast %216 : vector<8xf32> to vector<8x1xf32>
      %218 = arith.maximumf %arg22, %217 : vector<8x1xf32>
      %219 = arith.subf %arg22, %218 : vector<8x1xf32>
      %220 = math.exp %219 : vector<8x1xf32>
      %221 = vector.broadcast %218 : vector<8x1xf32> to vector<8x8xf32>
      %222 = arith.subf %215, %221 : vector<8x8xf32>
      %223 = math.exp %222 : vector<8x8xf32>
      %224 = arith.mulf %220, %arg23 : vector<8x1xf32>
      %cst_102 = arith.constant dense<0.000000e+00> : vector<8xf32>
      %225 = vector.multi_reduction <add>, %223, %cst_102 [1] : vector<8x8xf32> to vector<8xf32>
      %226 = vector.shape_cast %225 : vector<8xf32> to vector<8x1xf32>
      %227 = arith.addf %224, %226 : vector<8x1xf32>
      %228 = vector.broadcast %220 : vector<8x1xf32> to vector<8x32xf32>
      %229 = arith.mulf %228, %arg24 : vector<8x32xf32>
      %230 = arith.truncf %223 : vector<8x8xf32> to vector<8x8xbf16>
      %cst_103 = arith.constant dense<0.000000e+00> : vector<8x32xf32>
      %231 = tpu.matmul %230, %208, %cst_103 {dimension_numbers = #tpu.dot_dimension_numbers<[1], [0], [0], [1], [0, 0, 1, 1], [], []>} : vector<8x8xbf16>, vector<8x32xbf16>, vector<8x32xf32> -> vector<8x32xf32>
      %232 = arith.addf %229, %231 : vector<8x32xf32>
      scf.yield %218, %227, %232 : vector<8x1xf32>, vector<8x1xf32>, vector<8x32xf32>
    }
    %94 = vector.broadcast %93#1 : vector<8x1xf32> to vector<8x32xf32>
    %95 = arith.divf %93#2, %94 : vector<8x32xf32>
    %c0_45 = arith.constant 0 : index
    %c64 = arith.constant 64 : index
    %96 = vector.load %arg20[%c0_45, %c64] : memref<8x128xf32, #tpu.memory_space<vmem>>, vector<8x32xf32>
    tpu.vector_store %arg20[%c0_45, %c64], %95 {strides = array<i32>} : memref<8x128xf32, #tpu.memory_space<vmem>>, vector<8x32xf32>,
    %97 = vector.extract_strided_slice %61 {offsets = [0, 96], sizes = [8, 32], strides = [1, 1]} : vector<8x128xbf16> to vector<8x32xbf16>
    %cst_46 = arith.constant -1.000000e+30 : f32
    %98 = vector.broadcast %cst_46 : f32 to vector<8x1xf32>
    %cst_47 = arith.constant 0.000000e+00 : f32
    %99 = vector.broadcast %cst_47 : f32 to vector<8x1xf32>
    %cst_48 = arith.constant 0.000000e+00 : f32
    %100 = vector.broadcast %cst_48 : f32 to vector<8x32xf32>
    %cst_49 = arith.constant -1.000000e+30 : f32
    %c0_i32_50 = arith.constant 0 : i32
    %101 = arith.subi %53, %c0_i32_50 : i32
    %102 = arith.addi %c0_i32_50, %101 : i32
    %c1_i32_51 = arith.constant 1 : i32
    %103:3 = scf.for %arg21 = %c0_i32_50 to %102 step %c1_i32_51 iter_args(%arg22 = %98, %arg23 = %99, %arg24 = %100) -> (vector<8x1xf32>, vector<8x1xf32>, vector<8x32xf32>)  : i32 {
      %c8_i32_94 = arith.constant 8 : i32
      %201 = arith.muli %arg21, %c8_i32_94 : i32
      %202 = tpu.assume_multiple %201, 8 : i32
      %c3_95 = arith.constant 3 : index
      %203 = arith.index_cast %202 : i32 to index
      %c0_96 = arith.constant 0 : index
      %204 = vector.load %arg18[%c3_95, %203, %c0_96] : memref<4x8x32xbf16, #tpu.memory_space<vmem>>, vector<1x8x32xbf16>
      %205 = vector.shape_cast %204 : vector<1x8x32xbf16> to vector<8x32xbf16>
      %c3_97 = arith.constant 3 : index
      %206 = arith.index_cast %202 : i32 to index
      %c0_98 = arith.constant 0 : index
      %207 = vector.load %arg19[%c3_97, %206, %c0_98] : memref<4x8x32xbf16, #tpu.memory_space<vmem>>, vector<1x8x32xbf16>
      %208 = vector.shape_cast %207 : vector<1x8x32xbf16> to vector<8x32xbf16>
      %cst_99 = arith.constant dense<0.000000e+00> : vector<8x8xf32>
      %209 = tpu.matmul %97, %205, %cst_99 {dimension_numbers = #tpu.dot_dimension_numbers<[1], [1], [0], [0], [0, 0, 1, 0], [], []>} : vector<8x32xbf16>, vector<8x32xbf16>, vector<8x8xf32> -> vector<8x8xf32>
      %c8_i32_100 = arith.constant 8 : i32
      %210 = arith.muli %arg21, %c8_i32_100 : i32
      %211 = vector.broadcast %210 : i32 to vector<8x8xi32>
      %212 = arith.addi %211, %66 : vector<8x8xi32>
      %213 = arith.cmpi sge, %65, %212 : vector<8x8xi32>
      %214 = vector.broadcast %cst_49 : f32 to vector<8x8xf32>
      %215 = arith.select %213, %209, %214 : vector<8x8xi1>, vector<8x8xf32>
      %cst_101 = arith.constant dense<0xFF800000> : vector<8xf32>
      %216 = vector.multi_reduction <maximumf>, %215, %cst_101 [1] : vector<8x8xf32> to vector<8xf32>
      %217 = vector.shape_cast %216 : vector<8xf32> to vector<8x1xf32>
      %218 = arith.maximumf %arg22, %217 : vector<8x1xf32>
      %219 = arith.subf %arg22, %218 : vector<8x1xf32>
      %220 = math.exp %219 : vector<8x1xf32>
      %221 = vector.broadcast %218 : vector<8x1xf32> to vector<8x8xf32>
      %222 = arith.subf %215, %221 : vector<8x8xf32>
      %223 = math.exp %222 : vector<8x8xf32>
      %224 = arith.mulf %220, %arg23 : vector<8x1xf32>
      %cst_102 = arith.constant dense<0.000000e+00> : vector<8xf32>
      %225 = vector.multi_reduction <add>, %223, %cst_102 [1] : vector<8x8xf32> to vector<8xf32>
      %226 = vector.shape_cast %225 : vector<8xf32> to vector<8x1xf32>
      %227 = arith.addf %224, %226 : vector<8x1xf32>
      %228 = vector.broadcast %220 : vector<8x1xf32> to vector<8x32xf32>
      %229 = arith.mulf %228, %arg24 : vector<8x32xf32>
      %230 = arith.truncf %223 : vector<8x8xf32> to vector<8x8xbf16>
      %cst_103 = arith.constant dense<0.000000e+00> : vector<8x32xf32>
      %231 = tpu.matmul %230, %208, %cst_103 {dimension_numbers = #tpu.dot_dimension_numbers<[1], [0], [0], [1], [0, 0, 1, 1], [], []>} : vector<8x8xbf16>, vector<8x32xbf16>, vector<8x32xf32> -> vector<8x32xf32>
      %232 = arith.addf %229, %231 : vector<8x32xf32>
      scf.yield %218, %227, %232 : vector<8x1xf32>, vector<8x1xf32>, vector<8x32xf32>
    }
    %104 = vector.broadcast %103#1 : vector<8x1xf32> to vector<8x32xf32>
    %105 = arith.divf %103#2, %104 : vector<8x32xf32>
    %c0_52 = arith.constant 0 : index
    %c96 = arith.constant 96 : index
    %106 = vector.load %arg20[%c0_52, %c96] : memref<8x128xf32, #tpu.memory_space<vmem>>, vector<8x32xf32>
    tpu.vector_store %arg20[%c0_52, %c96], %105 {strides = array<i32>} : memref<8x128xf32, #tpu.memory_space<vmem>>, vector<8x32xf32>,
    %c0_53 = arith.constant 0 : index
    %c0_54 = arith.constant 0 : index
    %107 = vector.load %arg20[%c0_53, %c0_54] : memref<8x128xf32, #tpu.memory_space<vmem>>, vector<8x128xf32>
    %108 = arith.truncf %107 : vector<8x128xf32> to vector<8x128xbf16>
    %c0_55 = arith.constant 0 : index
    %c0_56 = arith.constant 0 : index
    %109 = vector.load %arg7[%c0_55, %c0_56] : memref<128x32xbf16, #tpu.memory_space<vmem>>, vector<128x32xbf16>
    %cst_57 = arith.constant dense<0.000000e+00> : vector<8x32xf32>
    %110 = tpu.matmul %108, %109, %cst_57 {dimension_numbers = #tpu.dot_dimension_numbers<[1], [0], [0], [1], [0, 0, 1, 1], [], []>} : vector<8x128xbf16>, vector<128x32xbf16>, vector<8x32xf32> -> vector<8x32xf32>
    %c0_58 = arith.constant 0 : index
    %c0_59 = arith.constant 0 : index
    %111 = vector.load %arg8[%c0_58, %c0_59] : memref<1x32xf32, #tpu.memory_space<vmem>>, vector<1x32xf32>
    %112 = vector.shape_cast %111 : vector<1x32xf32> to vector<32xf32>
    %113 = vector.shape_cast %112 : vector<32xf32> to vector<1x32xf32>
    %114 = vector.broadcast %113 : vector<1x32xf32> to vector<8x32xf32>
    %115 = arith.addf %110, %114 : vector<8x32xf32>
    %116 = arith.addf %115, %1 : vector<8x32xf32>
    %c0_60 = arith.constant 0 : index
    %c0_61 = arith.constant 0 : index
    %117 = vector.load %arg9[%c0_60, %c0_61] : memref<1x32xf32, #tpu.memory_space<vmem>>, vector<1x32xf32>
    %118 = vector.shape_cast %117 : vector<1x32xf32> to vector<32xf32>
    %c0_62 = arith.constant 0 : index
    %c0_63 = arith.constant 0 : index
    %119 = vector.load %arg10[%c0_62, %c0_63] : memref<1x32xf32, #tpu.memory_space<vmem>>, vector<1x32xf32>
    %120 = vector.shape_cast %119 : vector<1x32xf32> to vector<32xf32>
    %cst_64 = arith.constant dense<0.000000e+00> : vector<8xf32>
    %121 = vector.multi_reduction <add>, %116, %cst_64 [1] : vector<8x32xf32> to vector<8xf32>
    %122 = vector.shape_cast %121 : vector<8xf32> to vector<8x1xf32>
    %cst_65 = arith.constant 3.200000e+01 : f32
    %123 = vector.broadcast %cst_65 : f32 to vector<8x1xf32>
    %124 = arith.divf %122, %123 : vector<8x1xf32>
    %125 = vector.broadcast %124 : vector<8x1xf32> to vector<8x32xf32>
    %126 = arith.subf %116, %125 : vector<8x32xf32>
    %127 = arith.mulf %126, %126 : vector<8x32xf32>
    %cst_66 = arith.constant dense<0.000000e+00> : vector<8xf32>
    %128 = vector.multi_reduction <add>, %127, %cst_66 [1] : vector<8x32xf32> to vector<8xf32>
    %129 = vector.shape_cast %128 : vector<8xf32> to vector<8x1xf32>
    %cst_67 = arith.constant 3.200000e+01 : f32
    %130 = vector.broadcast %cst_67 : f32 to vector<8x1xf32>
    %131 = arith.divf %129, %130 : vector<8x1xf32>
    %132 = vector.broadcast %124 : vector<8x1xf32> to vector<8x32xf32>
    %133 = arith.subf %116, %132 : vector<8x32xf32>
    %cst_68 = arith.constant 9.99999974E-6 : f32
    %134 = vector.broadcast %cst_68 : f32 to vector<8x1xf32>
    %135 = arith.addf %131, %134 : vector<8x1xf32>
    %136 = math.rsqrt %135 : vector<8x1xf32>
    %137 = vector.broadcast %136 : vector<8x1xf32> to vector<8x32xf32>
    %138 = arith.mulf %133, %137 : vector<8x32xf32>
    %139 = vector.shape_cast %118 : vector<32xf32> to vector<1x32xf32>
    %140 = vector.broadcast %139 : vector<1x32xf32> to vector<8x32xf32>
    %141 = arith.mulf %138, %140 : vector<8x32xf32>
    %142 = vector.shape_cast %120 : vector<32xf32> to vector<1x32xf32>
    %143 = vector.broadcast %142 : vector<1x32xf32> to vector<8x32xf32>
    %144 = arith.addf %141, %143 : vector<8x32xf32>
    %145 = arith.truncf %144 : vector<8x32xf32> to vector<8x32xbf16>
    %c0_69 = arith.constant 0 : index
    %c0_70 = arith.constant 0 : index
    %146 = vector.load %arg11[%c0_69, %c0_70] : memref<32x64xbf16, #tpu.memory_space<vmem>>, vector<32x64xbf16>
    %cst_71 = arith.constant dense<0.000000e+00> : vector<8x64xf32>
    %147 = tpu.matmul %145, %146, %cst_71 {dimension_numbers = #tpu.dot_dimension_numbers<[1], [0], [0], [1], [0, 0, 1, 1], [], []>} : vector<8x32xbf16>, vector<32x64xbf16>, vector<8x64xf32> -> vector<8x64xf32>
    %c0_72 = arith.constant 0 : index
    %c0_73 = arith.constant 0 : index
    %148 = vector.load %arg12[%c0_72, %c0_73] : memref<1x64xf32, #tpu.memory_space<vmem>>, vector<1x64xf32>
    %149 = vector.shape_cast %148 : vector<1x64xf32> to vector<64xf32>
    %150 = vector.shape_cast %149 : vector<64xf32> to vector<1x64xf32>
    %151 = vector.broadcast %150 : vector<1x64xf32> to vector<8x64xf32>
    %152 = arith.addf %147, %151 : vector<8x64xf32>
    %cst_74 = arith.constant 5.000000e-01 : f32
    %153 = vector.broadcast %cst_74 : f32 to vector<8x64xf32>
    %154 = arith.mulf %153, %152 : vector<8x64xf32>
    %cst_75 = arith.constant 0.707106769 : f32
    %155 = vector.broadcast %cst_75 : f32 to vector<8x64xf32>
    %156 = arith.mulf %152, %155 : vector<8x64xf32>
    %157 = math.erf %156 : vector<8x64xf32>
    %cst_76 = arith.constant 1.000000e+00 : f32
    %158 = vector.broadcast %cst_76 : f32 to vector<8x64xf32>
    %159 = arith.addf %158, %157 : vector<8x64xf32>
    %160 = arith.mulf %154, %159 : vector<8x64xf32>
    %161 = arith.truncf %160 : vector<8x64xf32> to vector<8x64xbf16>
    %c0_77 = arith.constant 0 : index
    %c0_78 = arith.constant 0 : index
    %162 = vector.load %arg13[%c0_77, %c0_78] : memref<64x32xbf16, #tpu.memory_space<vmem>>, vector<64x32xbf16>
    %cst_79 = arith.constant dense<0.000000e+00> : vector<8x32xf32>
    %163 = tpu.matmul %161, %162, %cst_79 {dimension_numbers = #tpu.dot_dimension_numbers<[1], [0], [0], [1], [0, 0, 1, 1], [], []>} : vector<8x64xbf16>, vector<64x32xbf16>, vector<8x32xf32> -> vector<8x32xf32>
    %c0_80 = arith.constant 0 : index
    %c0_81 = arith.constant 0 : index
    %164 = vector.load %arg14[%c0_80, %c0_81] : memref<1x32xf32, #tpu.memory_space<vmem>>, vector<1x32xf32>
    %165 = vector.shape_cast %164 : vector<1x32xf32> to vector<32xf32>
    %166 = vector.shape_cast %165 : vector<32xf32> to vector<1x32xf32>
    %167 = vector.broadcast %166 : vector<1x32xf32> to vector<8x32xf32>
    %168 = arith.addf %163, %167 : vector<8x32xf32>
    %169 = arith.addf %168, %144 : vector<8x32xf32>
    %c0_82 = arith.constant 0 : index
    %c0_83 = arith.constant 0 : index
    %170 = vector.load %arg15[%c0_82, %c0_83] : memref<1x32xf32, #tpu.memory_space<vmem>>, vector<1x32xf32>
    %171 = vector.shape_cast %170 : vector<1x32xf32> to vector<32xf32>
    %c0_84 = arith.constant 0 : index
    %c0_85 = arith.constant 0 : index
    %172 = vector.load %arg16[%c0_84, %c0_85] : memref<1x32xf32, #tpu.memory_space<vmem>>, vector<1x32xf32>
    %173 = vector.shape_cast %172 : vector<1x32xf32> to vector<32xf32>
    %cst_86 = arith.constant dense<0.000000e+00> : vector<8xf32>
    %174 = vector.multi_reduction <add>, %169, %cst_86 [1] : vector<8x32xf32> to vector<8xf32>
    %175 = vector.shape_cast %174 : vector<8xf32> to vector<8x1xf32>
    %cst_87 = arith.constant 3.200000e+01 : f32
    %176 = vector.broadcast %cst_87 : f32 to vector<8x1xf32>
    %177 = arith.divf %175, %176 : vector<8x1xf32>
    %178 = vector.broadcast %177 : vector<8x1xf32> to vector<8x32xf32>
    %179 = arith.subf %169, %178 : vector<8x32xf32>
    %180 = arith.mulf %179, %179 : vector<8x32xf32>
    %cst_88 = arith.constant dense<0.000000e+00> : vector<8xf32>
    %181 = vector.multi_reduction <add>, %180, %cst_88 [1] : vector<8x32xf32> to vector<8xf32>
    %182 = vector.shape_cast %181 : vector<8xf32> to vector<8x1xf32>
    %cst_89 = arith.constant 3.200000e+01 : f32
    %183 = vector.broadcast %cst_89 : f32 to vector<8x1xf32>
    %184 = arith.divf %182, %183 : vector<8x1xf32>
    %185 = vector.broadcast %177 : vector<8x1xf32> to vector<8x32xf32>
    %186 = arith.subf %169, %185 : vector<8x32xf32>
    %cst_90 = arith.constant 9.99999974E-6 : f32
    %187 = vector.broadcast %cst_90 : f32 to vector<8x1xf32>
    %188 = arith.addf %184, %187 : vector<8x1xf32>
    %189 = math.rsqrt %188 : vector<8x1xf32>
    %190 = vector.broadcast %189 : vector<8x1xf32> to vector<8x32xf32>
    %191 = arith.mulf %186, %190 : vector<8x32xf32>
    %192 = vector.shape_cast %171 : vector<32xf32> to vector<1x32xf32>
    %193 = vector.broadcast %192 : vector<1x32xf32> to vector<8x32xf32>
    %194 = arith.mulf %191, %193 : vector<8x32xf32>
    %195 = vector.shape_cast %173 : vector<32xf32> to vector<1x32xf32>
    %196 = vector.broadcast %195 : vector<1x32xf32> to vector<8x32xf32>
    %197 = arith.addf %194, %196 : vector<8x32xf32>
    %c0_91 = arith.constant 0 : index
    %c0_92 = arith.constant 0 : index
    %c0_93 = arith.constant 0 : index
    %198 = vector.load %arg17[%c0_91, %c0_92, %c0_93] : memref<1x8x32xf32, #tpu.memory_space<vmem>>, vector<1x8x32xf32>
    %199 = vector.shape_cast %198 : vector<1x8x32xf32> to vector<8x32xf32>
    %200 = vector.shape_cast %197 : vector<8x32xf32> to vector<1x8x32xf32>
    tpu.vector_store %arg17[%c0_91, %c0_92, %c0_93], %200 {strides = array<i32>} : memref<1x8x32xf32, #tpu.memory_space<vmem>>, vector<1x8x32xf32>,
    return
  }
  func.func @transform_0(%arg0: i32, %arg1: i32) -> (i32, i32, i32) {
    %c0_i32 = arith.constant 0 : i32
    %c0_i32_0 = arith.constant 0 : i32
    return %arg0, %arg1, %c0_i32 : i32, i32, i32
  }
  func.func @transform_1(%arg0: i32, %arg1: i32) -> (i32, i32) {
    %c0_i32 = arith.constant 0 : i32
    %c0_i32_0 = arith.constant 0 : i32
    %c0_i32_1 = arith.constant 0 : i32
    return %c0_i32, %c0_i32_0 : i32, i32
  }
  func.func @transform_2(%arg0: i32, %arg1: i32) -> (i32, i32) {
    %c0_i32 = arith.constant 0 : i32
    %c0_i32_0 = arith.constant 0 : i32
    %c0_i32_1 = arith.constant 0 : i32
    return %c0_i32, %c0_i32_0 : i32, i32
  }
  func.func @transform_3(%arg0: i32, %arg1: i32) -> (i32, i32) {
    %c0_i32 = arith.constant 0 : i32
    %c0_i32_0 = arith.constant 0 : i32
    %c0_i32_1 = arith.constant 0 : i32
    return %c0_i32, %c0_i32_0 : i32, i32
  }
  func.func @transform_4(%arg0: i32, %arg1: i32) -> (i32, i32) {
    %c0_i32 = arith.constant 0 : i32
    %c0_i32_0 = arith.constant 0 : i32
    %c0_i32_1 = arith.constant 0 : i32
    return %c0_i32, %c0_i32_0 : i32, i32
  }
  func.func @transform_5(%arg0: i32, %arg1: i32) -> (i32, i32) {
    %c0_i32 = arith.constant 0 : i32
    %c0_i32_0 = arith.constant 0 : i32
    %c0_i32_1 = arith.constant 0 : i32
    return %c0_i32, %c0_i32_0 : i32, i32
  }
  func.func @transform_6(%arg0: i32, %arg1: i32) -> (i32, i32) {
    %c0_i32 = arith.constant 0 : i32
    %c0_i32_0 = arith.constant 0 : i32
    %c0_i32_1 = arith.constant 0 : i32
    return %c0_i32, %c0_i32_0 : i32, i32
  }
  func.func @transform_7(%arg0: i32, %arg1: i32) -> (i32, i32) {
    %c0_i32 = arith.constant 0 : i32
    %c0_i32_0 = arith.constant 0 : i32
    %c0_i32_1 = arith.constant 0 : i32
    return %c0_i32, %c0_i32_0 : i32, i32
  }
  func.func @transform_8(%arg0: i32, %arg1: i32) -> (i32, i32) {
    %c0_i32 = arith.constant 0 : i32
    %c0_i32_0 = arith.constant 0 : i32
    %c0_i32_1 = arith.constant 0 : i32
    return %c0_i32, %c0_i32_0 : i32, i32
  }
  func.func @transform_9(%arg0: i32, %arg1: i32) -> (i32, i32) {
    %c0_i32 = arith.constant 0 : i32
    %c0_i32_0 = arith.constant 0 : i32
    %c0_i32_1 = arith.constant 0 : i32
    return %c0_i32, %c0_i32_0 : i32, i32
  }
  func.func @transform_10(%arg0: i32, %arg1: i32) -> (i32, i32) {
    %c0_i32 = arith.constant 0 : i32
    %c0_i32_0 = arith.constant 0 : i32
    %c0_i32_1 = arith.constant 0 : i32
    return %c0_i32, %c0_i32_0 : i32, i32
  }
  func.func @transform_11(%arg0: i32, %arg1: i32) -> (i32, i32) {
    %c0_i32 = arith.constant 0 : i32
    %c0_i32_0 = arith.constant 0 : i32
    %c0_i32_1 = arith.constant 0 : i32
    return %c0_i32, %c0_i32_0 : i32, i32
  }
  func.func @transform_12(%arg0: i32, %arg1: i32) -> (i32, i32) {
    %c0_i32 = arith.constant 0 : i32
    %c0_i32_0 = arith.constant 0 : i32
    %c0_i32_1 = arith.constant 0 : i32
    return %c0_i32, %c0_i32_0 : i32, i32
  }
  func.func @transform_13(%arg0: i32, %arg1: i32) -> (i32, i32) {
    %c0_i32 = arith.constant 0 : i32
    %c0_i32_0 = arith.constant 0 : i32
    %c0_i32_1 = arith.constant 0 : i32
    return %c0_i32, %c0_i32_0 : i32, i32
  }
  func.func @transform_14(%arg0: i32, %arg1: i32) -> (i32, i32) {
    %c0_i32 = arith.constant 0 : i32
    %c0_i32_0 = arith.constant 0 : i32
    %c0_i32_1 = arith.constant 0 : i32
    return %c0_i32, %c0_i32_0 : i32, i32
  }
  func.func @transform_15(%arg0: i32, %arg1: i32) -> (i32, i32, i32) {
    %c0_i32 = arith.constant 0 : i32
    %c0_i32_0 = arith.constant 0 : i32
    return %arg0, %arg1, %c0_i32 : i32, i32, i32
  }
}

module attributes {stable_mosaic.version = 11 : i64} {
  func.func @transformer_block_kernel(%arg0: i32, %arg1: i32, %arg2: memref<1x8x32xf32, #tpu.memory_space<vmem>>, %arg3: memref<32x128xbf16, #tpu.memory_space<vmem>>, %arg4: memref<1x128xf32, #tpu.memory_space<vmem>>, %arg5: memref<32x256xbf16, #tpu.memory_space<vmem>>, %arg6: memref<1x256xf32, #tpu.memory_space<vmem>>, %arg7: memref<128x32xbf16, #tpu.memory_space<vmem>>, %arg8: memref<1x32xf32, #tpu.memory_space<vmem>>, %arg9: memref<1x32xf32, #tpu.memory_space<vmem>>, %arg10: memref<1x32xf32, #tpu.memory_space<vmem>>, %arg11: memref<32x64xbf16, #tpu.memory_space<vmem>>, %arg12: memref<1x64xf32, #tpu.memory_space<vmem>>, %arg13: memref<64x32xbf16, #tpu.memory_space<vmem>>, %arg14: memref<1x32xf32, #tpu.memory_space<vmem>>, %arg15: memref<1x32xf32, #tpu.memory_space<vmem>>, %arg16: memref<1x32xf32, #tpu.memory_space<vmem>>, %arg17: memref<1x8x32xf32, #tpu.memory_space<vmem>>, %arg18: memref<4x8x32xbf16, #tpu.memory_space<vmem>>, %arg19: memref<4x8x32xbf16, #tpu.memory_space<vmem>>, %arg20: memref<8x128xf32, #tpu.memory_space<vmem>>) attributes {dimension_semantics = [#tpu.dimension_semantics<parallel>, #tpu.dimension_semantics<arbitrary>], iteration_bounds = array<i64: 2, 1>, scalar_prefetch = 0 : i64, scratch_operands = 3 : i64, tpu.core_type = #tpu.core_type<tc>, window_params = [{transform_indices = @transform_0, window_bounds = array<i64: 1, 8, 32>}, {pipeline_mode = #tpu.pipeline_mode<synchronous>, transform_indices = @transform_1, window_bounds = array<i64: 32, 128>}, {pipeline_mode = #tpu.pipeline_mode<synchronous>, transform_indices = @transform_2, window_bounds = array<i64: 1, 128>}, {pipeline_mode = #tpu.pipeline_mode<synchronous>, transform_indices = @transform_3, window_bounds = array<i64: 32, 256>}, {pipeline_mode = #tpu.pipeline_mode<synchronous>, transform_indices = @transform_4, window_bounds = array<i64: 1, 256>}, {pipeline_mode = #tpu.pipeline_mode<synchronous>, transform_indices = @transform_5, window_bounds = array<i64: 128, 32>}, {pipeline_mode = #tpu.pipeline_mode<synchronous>, transform_indices = @transform_6, window_bounds = array<i64: 1, 32>}, {pipeline_mode = #tpu.pipeline_mode<synchronous>, transform_indices = @transform_7, window_bounds = array<i64: 1, 32>}, {pipeline_mode = #tpu.pipeline_mode<synchronous>, transform_indices = @transform_8, window_bounds = array<i64: 1, 32>}, {pipeline_mode = #tpu.pipeline_mode<synchronous>, transform_indices = @transform_9, window_bounds = array<i64: 32, 64>}, {pipeline_mode = #tpu.pipeline_mode<synchronous>, transform_indices = @transform_10, window_bounds = array<i64: 1, 64>}, {pipeline_mode = #tpu.pipeline_mode<synchronous>, transform_indices = @transform_11, window_bounds = array<i64: 64, 32>}, {pipeline_mode = #tpu.pipeline_mode<synchronous>, transform_indices = @transform_12, window_bounds = array<i64: 1, 32>}, {pipeline_mode = #tpu.pipeline_mode<synchronous>, transform_indices = @transform_13, window_bounds = array<i64: 1, 32>}, {pipeline_mode = #tpu.pipeline_mode<synchronous>, transform_indices = @transform_14, window_bounds = array<i64: 1, 32>}, {transform_indices = @transform_15, window_bounds = array<i64: 1, 8, 32>}]} {
    %c0 = arith.constant 0 : index
    %c0_0 = arith.constant 0 : index
    %c0_1 = arith.constant 0 : index
    %0 = vector.load %arg2[%c0, %c0_0, %c0_1] : memref<1x8x32xf32, #tpu.memory_space<vmem>>, vector<1x8x32xf32>
    %1 = vector.shape_cast %0 : vector<1x8x32xf32> to vector<8x32xf32>
    %2 = arith.truncf %1 : vector<8x32xf32> to vector<8x32xbf16>
    %c8_i32 = arith.constant 8 : i32
    %3 = arith.muli %arg1, %c8_i32 : i32
    %4 = tpu.assume_multiple %3, 8 : i32
    %c0_2 = arith.constant 0 : index
    %c0_3 = arith.constant 0 : index
    %5 = vector.load %arg5[%c0_2, %c0_3] : memref<32x256xbf16, #tpu.memory_space<vmem>>, vector<32x256xbf16>
    %cst = arith.constant dense<0.000000e+00> : vector<8x256xf32>
    %6 = tpu.matmul %2, %5, %cst {dimension_numbers = #tpu.dot_dimension_numbers<[1], [0], [0], [1], [0, 0, 1, 1], [], []>} : vector<8x32xbf16>, vector<32x256xbf16>, vector<8x256xf32> -> vector<8x256xf32>
    %c0_4 = arith.constant 0 : index
    %c0_5 = arith.constant 0 : index
    %7 = vector.load %arg6[%c0_4, %c0_5] : memref<1x256xf32, #tpu.memory_space<vmem>>, vector<1x256xf32>
    %8 = vector.shape_cast %7 : vector<1x256xf32> to vector<256xf32>
    %9 = vector.shape_cast %8 : vector<256xf32> to vector<1x256xf32>
    %10 = vector.broadcast %9 : vector<1x256xf32> to vector<8x256xf32>
    %11 = arith.addf %6, %10 : vector<8x256xf32>
    %12 = arith.truncf %11 : vector<8x256xf32> to vector<8x256xbf16>
    %13 = vector.extract_strided_slice %12 {offsets = [0, 0], sizes = [8, 32], strides = [1, 1]} : vector<8x256xbf16> to vector<8x32xbf16>
    %c0_6 = arith.constant 0 : index
    %14 = arith.index_cast %4 : i32 to index
    %c0_7 = arith.constant 0 : index
    %15 = vector.load %arg18[%c0_6, %14, %c0_7] : memref<4x8x32xbf16, #tpu.memory_space<vmem>>, vector<1x8x32xbf16>
    %16 = vector.shape_cast %15 : vector<1x8x32xbf16> to vector<8x32xbf16>
    %17 = vector.shape_cast %13 : vector<8x32xbf16> to vector<1x8x32xbf16>
    tpu.vector_store %arg18[%c0_6, %14, %c0_7], %17 {strides = array<i32>} : memref<4x8x32xbf16, #tpu.memory_space<vmem>>, vector<1x8x32xbf16>,
    %18 = vector.extract_strided_slice %12 {offsets = [0, 128], sizes = [8, 32], strides = [1, 1]} : vector<8x256xbf16> to vector<8x32xbf16>
    %c0_8 = arith.constant 0 : index
    %19 = arith.index_cast %4 : i32 to index
    %c0_9 = arith.constant 0 : index
    %20 = vector.load %arg19[%c0_8, %19, %c0_9] : memref<4x8x32xbf16, #tpu.memory_space<vmem>>, vector<1x8x32xbf16>
    %21 = vector.shape_cast %20 : vector<1x8x32xbf16> to vector<8x32xbf16>
    %22 = vector.shape_cast %18 : vector<8x32xbf16> to vector<1x8x32xbf16>
    tpu.vector_store %arg19[%c0_8, %19, %c0_9], %22 {strides = array<i32>} : memref<4x8x32xbf16, #tpu.memory_space<vmem>>, vector<1x8x32xbf16>,
    %23 = vector.extract_strided_slice %12 {offsets = [0, 32], sizes = [8, 32], strides = [1, 1]} : vector<8x256xbf16> to vector<8x32xbf16>
    %c1 = arith.constant 1 : index
    %24 = arith.index_cast %4 : i32 to index
    %c0_10 = arith.constant 0 : index
    %25 = vector.load %arg18[%c1, %24, %c0_10] : memref<4x8x32xbf16, #tpu.memory_space<vmem>>, vector<1x8x32xbf16>
    %26 = vector.shape_cast %25 : vector<1x8x32xbf16> to vector<8x32xbf16>
    %27 = vector.shape_cast %23 : vector<8x32xbf16> to vector<1x8x32xbf16>
    tpu.vector_store %arg18[%c1, %24, %c0_10], %27 {strides = array<i32>} : memref<4x8x32xbf16, #tpu.memory_space<vmem>>, vector<1x8x32xbf16>,
    %28 = vector.extract_strided_slice %12 {offsets = [0, 160], sizes = [8, 32], strides = [1, 1]} : vector<8x256xbf16> to vector<8x32xbf16>
    %c1_11 = arith.constant 1 : index
    %29 = arith.index_cast %4 : i32 to index
    %c0_12 = arith.constant 0 : index
    %30 = vector.load %arg19[%c1_11, %29, %c0_12] : memref<4x8x32xbf16, #tpu.memory_space<vmem>>, vector<1x8x32xbf16>
    %31 = vector.shape_cast %30 : vector<1x8x32xbf16> to vector<8x32xbf16>
    %32 = vector.shape_cast %28 : vector<8x32xbf16> to vector<1x8x32xbf16>
    tpu.vector_store %arg19[%c1_11, %29, %c0_12], %32 {strides = array<i32>} : memref<4x8x32xbf16, #tpu.memory_space<vmem>>, vector<1x8x32xbf16>,
    %33 = vector.extract_strided_slice %12 {offsets = [0, 64], sizes = [8, 32], strides = [1, 1]} : vector<8x256xbf16> to vector<8x32xbf16>
    %c2 = arith.constant 2 : index
    %34 = arith.index_cast %4 : i32 to index
    %c0_13 = arith.constant 0 : index
    %35 = vector.load %arg18[%c2, %34, %c0_13] : memref<4x8x32xbf16, #tpu.memory_space<vmem>>, vector<1x8x32xbf16>
    %36 = vector.shape_cast %35 : vector<1x8x32xbf16> to vector<8x32xbf16>
    %37 = vector.shape_cast %33 : vector<8x32xbf16> to vector<1x8x32xbf16>
    tpu.vector_store %arg18[%c2, %34, %c0_13], %37 {strides = array<i32>} : memref<4x8x32xbf16, #tpu.memory_space<vmem>>, vector<1x8x32xbf16>,
    %38 = vector.extract_strided_slice %12 {offsets = [0, 192], sizes = [8, 32], strides = [1, 1]} : vector<8x256xbf16> to vector<8x32xbf16>
    %c2_14 = arith.constant 2 : index
    %39 = arith.index_cast %4 : i32 to index
    %c0_15 = arith.constant 0 : index
    %40 = vector.load %arg19[%c2_14, %39, %c0_15] : memref<4x8x32xbf16, #tpu.memory_space<vmem>>, vector<1x8x32xbf16>
    %41 = vector.shape_cast %40 : vector<1x8x32xbf16> to vector<8x32xbf16>
    %42 = vector.shape_cast %38 : vector<8x32xbf16> to vector<1x8x32xbf16>
    tpu.vector_store %arg19[%c2_14, %39, %c0_15], %42 {strides = array<i32>} : memref<4x8x32xbf16, #tpu.memory_space<vmem>>, vector<1x8x32xbf16>,
    %43 = vector.extract_strided_slice %12 {offsets = [0, 96], sizes = [8, 32], strides = [1, 1]} : vector<8x256xbf16> to vector<8x32xbf16>
    %c3 = arith.constant 3 : index
    %44 = arith.index_cast %4 : i32 to index
    %c0_16 = arith.constant 0 : index
    %45 = vector.load %arg18[%c3, %44, %c0_16] : memref<4x8x32xbf16, #tpu.memory_space<vmem>>, vector<1x8x32xbf16>
    %46 = vector.shape_cast %45 : vector<1x8x32xbf16> to vector<8x32xbf16>
    %47 = vector.shape_cast %43 : vector<8x32xbf16> to vector<1x8x32xbf16>
    tpu.vector_store %arg18[%c3, %44, %c0_16], %47 {strides = array<i32>} : memref<4x8x32xbf16, #tpu.memory_space<vmem>>, vector<1x8x32xbf16>,
    %48 = vector.extract_strided_slice %12 {offsets = [0, 224], sizes = [8, 32], strides = [1, 1]} : vector<8x256xbf16> to vector<8x32xbf16>
    %c3_17 = arith.constant 3 : index
    %49 = arith.index_cast %4 : i32 to index
    %c0_18 = arith.constant 0 : index
    %50 = vector.load %arg19[%c3_17, %49, %c0_18] : memref<4x8x32xbf16, #tpu.memory_space<vmem>>, vector<1x8x32xbf16>
    %51 = vector.shape_cast %50 : vector<1x8x32xbf16> to vector<8x32xbf16>
    %52 = vector.shape_cast %48 : vector<8x32xbf16> to vector<1x8x32xbf16>
    tpu.vector_store %arg19[%c3_17, %49, %c0_18], %52 {strides = array<i32>} : memref<4x8x32xbf16, #tpu.memory_space<vmem>>, vector<1x8x32xbf16>,
    %c1_i32 = arith.constant 1 : i32
    %53 = arith.addi %arg1, %c1_i32 : i32
    %c0_19 = arith.constant 0 : index
    %c0_20 = arith.constant 0 : index
    %54 = vector.load %arg3[%c0_19, %c0_20] : memref<32x128xbf16, #tpu.memory_space<vmem>>, vector<32x128xbf16>
    %cst_21 = arith.constant dense<0.000000e+00> : vector<8x128xf32>
    %55 = tpu.matmul %2, %54, %cst_21 {dimension_numbers = #tpu.dot_dimension_numbers<[1], [0], [0], [1], [0, 0, 1, 1], [], []>} : vector<8x32xbf16>, vector<32x128xbf16>, vector<8x128xf32> -> vector<8x128xf32>
    %c0_22 = arith.constant 0 : index
    %c0_23 = arith.constant 0 : index
    %56 = vector.load %arg4[%c0_22, %c0_23] : memref<1x128xf32, #tpu.memory_space<vmem>>, vector<1x128xf32>
    %57 = vector.shape_cast %56 : vector<1x128xf32> to vector<128xf32>
    %58 = vector.shape_cast %57 : vector<128xf32> to vector<1x128xf32>
    %59 = vector.broadcast %58 : vector<1x128xf32> to vector<8x128xf32>
    %60 = arith.addf %55, %59 : vector<8x128xf32>
    %61 = arith.truncf %60 : vector<8x128xf32> to vector<8x128xbf16>
    %c8_i32_24 = arith.constant 8 : i32
    %62 = arith.muli %arg1, %c8_i32_24 : i32
    %63 = tpu.iota {dimensions = array<i32: 0>} : vector<8x8xi32>
    %64 = vector.broadcast %62 : i32 to vector<8x8xi32>
    %65 = arith.addi %64, %63 : vector<8x8xi32>
    %66 = tpu.iota {dimensions = array<i32: 1>} : vector<8x8xi32>
    %67 = vector.extract_strided_slice %61 {offsets = [0, 0], sizes = [8, 32], strides = [1, 1]} : vector<8x128xbf16> to vector<8x32xbf16>
    %cst_25 = arith.constant -1.000000e+30 : f32
    %68 = vector.broadcast %cst_25 : f32 to vector<8x1xf32>
    %cst_26 = arith.constant 0.000000e+00 : f32
    %69 = vector.broadcast %cst_26 : f32 to vector<8x1xf32>
    %cst_27 = arith.constant 0.000000e+00 : f32
    %70 = vector.broadcast %cst_27 : f32 to vector<8x32xf32>
    %cst_28 = arith.constant -1.000000e+30 : f32
    %c0_i32 = arith.constant 0 : i32
    %71 = arith.subi %53, %c0_i32 : i32
    %72 = arith.addi %c0_i32, %71 : i32
    %c1_i32_29 = arith.constant 1 : i32
    %73:3 = scf.for %arg21 = %c0_i32 to %72 step %c1_i32_29 iter_args(%arg22 = %68, %arg23 = %69, %arg24 = %70) -> (vector<8x1xf32>, vector<8x1xf32>, vector<8x32xf32>)  : i32 {
      %c8_i32_94 = arith.constant 8 : i32
      %201 = arith.muli %arg21, %c8_i32_94 : i32
      %202 = tpu.assume_multiple %201, 8 : i32
      %c0_95 = arith.constant 0 : index
      %203 = arith.index_cast %202 : i32 to index
      %c0_96 = arith.constant 0 : index
      %204 = vector.load %arg18[%c0_95, %203, %c0_96] : memref<4x8x32xbf16, #tpu.memory_space<vmem>>, vector<1x8x32xbf16>
      %205 = vector.shape_cast %204 : vector<1x8x32xbf16> to vector<8x32xbf16>
      %c0_97 = arith.constant 0 : index
      %206 = arith.index_cast %202 : i32 to index
      %c0_98 = arith.constant 0 : index
      %207 = vector.load %arg19[%c0_97, %206, %c0_98] : memref<4x8x32xbf16, #tpu.memory_space<vmem>>, vector<1x8x32xbf16>
      %208 = vector.shape_cast %207 : vector<1x8x32xbf16> to vector<8x32xbf16>
      %cst_99 = arith.constant dense<0.000000e+00> : vector<8x8xf32>
      %209 = tpu.matmul %67, %205, %cst_99 {dimension_numbers = #tpu.dot_dimension_numbers<[1], [1], [0], [0], [0, 0, 1, 0], [], []>} : vector<8x32xbf16>, vector<8x32xbf16>, vector<8x8xf32> -> vector<8x8xf32>
      %c8_i32_100 = arith.constant 8 : i32
      %210 = arith.muli %arg21, %c8_i32_100 : i32
      %211 = vector.broadcast %210 : i32 to vector<8x8xi32>
      %212 = arith.addi %211, %66 : vector<8x8xi32>
      %213 = arith.cmpi sge, %65, %212 : vector<8x8xi32>
      %214 = vector.broadcast %cst_28 : f32 to vector<8x8xf32>
      %215 = arith.select %213, %209, %214 : vector<8x8xi1>, vector<8x8xf32>
      %cst_101 = arith.constant dense<0xFF800000> : vector<8xf32>
      %216 = vector.multi_reduction <maximumf>, %215, %cst_101 [1] : vector<8x8xf32> to vector<8xf32>
      %217 = vector.shape_cast %216 : vector<8xf32> to vector<8x1xf32>
      %218 = arith.maximumf %arg22, %217 : vector<8x1xf32>
      %219 = arith.subf %arg22, %218 : vector<8x1xf32>
      %220 = math.exp %219 : vector<8x1xf32>
      %221 = vector.broadcast %218 : vector<8x1xf32> to vector<8x8xf32>
      %222 = arith.subf %215, %221 : vector<8x8xf32>
      %223 = math.exp %222 : vector<8x8xf32>
      %224 = arith.mulf %220, %arg23 : vector<8x1xf32>
      %cst_102 = arith.constant dense<0.000000e+00> : vector<8xf32>
      %225 = vector.multi_reduction <add>, %223, %cst_102 [1] : vector<8x8xf32> to vector<8xf32>
      %226 = vector.shape_cast %225 : vector<8xf32> to vector<8x1xf32>
      %227 = arith.addf %224, %226 : vector<8x1xf32>
      %228 = vector.broadcast %220 : vector<8x1xf32> to vector<8x32xf32>
      %229 = arith.mulf %228, %arg24 : vector<8x32xf32>
      %230 = arith.truncf %223 : vector<8x8xf32> to vector<8x8xbf16>
      %cst_103 = arith.constant dense<0.000000e+00> : vector<8x32xf32>
      %231 = tpu.matmul %230, %208, %cst_103 {dimension_numbers = #tpu.dot_dimension_numbers<[1], [0], [0], [1], [0, 0, 1, 1], [], []>} : vector<8x8xbf16>, vector<8x32xbf16>, vector<8x32xf32> -> vector<8x32xf32>
      %232 = arith.addf %229, %231 : vector<8x32xf32>
      scf.yield %218, %227, %232 : vector<8x1xf32>, vector<8x1xf32>, vector<8x32xf32>
    }
    %74 = vector.broadcast %73#1 : vector<8x1xf32> to vector<8x32xf32>
    %75 = arith.divf %73#2, %74 : vector<8x32xf32>
    %c0_30 = arith.constant 0 : index
    %c0_31 = arith.constant 0 : index
    %76 = vector.load %arg20[%c0_30, %c0_31] : memref<8x128xf32, #tpu.memory_space<vmem>>, vector<8x32xf32>
    tpu.vector_store %arg20[%c0_30, %c0_31], %75 {strides = array<i32>} : memref<8x128xf32, #tpu.memory_space<vmem>>, vector<8x32xf32>,
    %77 = vector.extract_strided_slice %61 {offsets = [0, 32], sizes = [8, 32], strides = [1, 1]} : vector<8x128xbf16> to vector<8x32xbf16>
    %cst_32 = arith.constant -1.000000e+30 : f32
    %78 = vector.broadcast %cst_32 : f32 to vector<8x1xf32>
    %cst_33 = arith.constant 0.000000e+00 : f32
    %79 = vector.broadcast %cst_33 : f32 to vector<8x1xf32>
    %cst_34 = arith.constant 0.000000e+00 : f32
    %80 = vector.broadcast %cst_34 : f32 to vector<8x32xf32>
    %cst_35 = arith.constant -1.000000e+30 : f32
    %c0_i32_36 = arith.constant 0 : i32
    %81 = arith.subi %53, %c0_i32_36 : i32
    %82 = arith.addi %c0_i32_36, %81 : i32
    %c1_i32_37 = arith.constant 1 : i32
    %83:3 = scf.for %arg21 = %c0_i32_36 to %82 step %c1_i32_37 iter_args(%arg22 = %78, %arg23 = %79, %arg24 = %80) -> (vector<8x1xf32>, vector<8x1xf32>, vector<8x32xf32>)  : i32 {
      %c8_i32_94 = arith.constant 8 : i32
      %201 = arith.muli %arg21, %c8_i32_94 : i32
      %202 = tpu.assume_multiple %201, 8 : i32
      %c1_95 = arith.constant 1 : index
      %203 = arith.index_cast %202 : i32 to index
      %c0_96 = arith.constant 0 : index
      %204 = vector.load %arg18[%c1_95, %203, %c0_96] : memref<4x8x32xbf16, #tpu.memory_space<vmem>>, vector<1x8x32xbf16>
      %205 = vector.shape_cast %204 : vector<1x8x32xbf16> to vector<8x32xbf16>
      %c1_97 = arith.constant 1 : index
      %206 = arith.index_cast %202 : i32 to index
      %c0_98 = arith.constant 0 : index
      %207 = vector.load %arg19[%c1_97, %206, %c0_98] : memref<4x8x32xbf16, #tpu.memory_space<vmem>>, vector<1x8x32xbf16>
      %208 = vector.shape_cast %207 : vector<1x8x32xbf16> to vector<8x32xbf16>
      %cst_99 = arith.constant dense<0.000000e+00> : vector<8x8xf32>
      %209 = tpu.matmul %77, %205, %cst_99 {dimension_numbers = #tpu.dot_dimension_numbers<[1], [1], [0], [0], [0, 0, 1, 0], [], []>} : vector<8x32xbf16>, vector<8x32xbf16>, vector<8x8xf32> -> vector<8x8xf32>
      %c8_i32_100 = arith.constant 8 : i32
      %210 = arith.muli %arg21, %c8_i32_100 : i32
      %211 = vector.broadcast %210 : i32 to vector<8x8xi32>
      %212 = arith.addi %211, %66 : vector<8x8xi32>
      %213 = arith.cmpi sge, %65, %212 : vector<8x8xi32>
      %214 = vector.broadcast %cst_35 : f32 to vector<8x8xf32>
      %215 = arith.select %213, %209, %214 : vector<8x8xi1>, vector<8x8xf32>
      %cst_101 = arith.constant dense<0xFF800000> : vector<8xf32>
      %216 = vector.multi_reduction <maximumf>, %215, %cst_101 [1] : vector<8x8xf32> to vector<8xf32>
      %217 = vector.shape_cast %216 : vector<8xf32> to vector<8x1xf32>
      %218 = arith.maximumf %arg22, %217 : vector<8x1xf32>
      %219 = arith.subf %arg22, %218 : vector<8x1xf32>
      %220 = math.exp %219 : vector<8x1xf32>
      %221 = vector.broadcast %218 : vector<8x1xf32> to vector<8x8xf32>
      %222 = arith.subf %215, %221 : vector<8x8xf32>
      %223 = math.exp %222 : vector<8x8xf32>
      %224 = arith.mulf %220, %arg23 : vector<8x1xf32>
      %cst_102 = arith.constant dense<0.000000e+00> : vector<8xf32>
      %225 = vector.multi_reduction <add>, %223, %cst_102 [1] : vector<8x8xf32> to vector<8xf32>
      %226 = vector.shape_cast %225 : vector<8xf32> to vector<8x1xf32>
      %227 = arith.addf %224, %226 : vector<8x1xf32>
      %228 = vector.broadcast %220 : vector<8x1xf32> to vector<8x32xf32>
      %229 = arith.mulf %228, %arg24 : vector<8x32xf32>
      %230 = arith.truncf %223 : vector<8x8xf32> to vector<8x8xbf16>
      %cst_103 = arith.constant dense<0.000000e+00> : vector<8x32xf32>
      %231 = tpu.matmul %230, %208, %cst_103 {dimension_numbers = #tpu.dot_dimension_numbers<[1], [0], [0], [1], [0, 0, 1, 1], [], []>} : vector<8x8xbf16>, vector<8x32xbf16>, vector<8x32xf32> -> vector<8x32xf32>
      %232 = arith.addf %229, %231 : vector<8x32xf32>
      scf.yield %218, %227, %232 : vector<8x1xf32>, vector<8x1xf32>, vector<8x32xf32>
    }
    %84 = vector.broadcast %83#1 : vector<8x1xf32> to vector<8x32xf32>
    %85 = arith.divf %83#2, %84 : vector<8x32xf32>
    %c0_38 = arith.constant 0 : index
    %c32 = arith.constant 32 : index
    %86 = vector.load %arg20[%c0_38, %c32] : memref<8x128xf32, #tpu.memory_space<vmem>>, vector<8x32xf32>
    tpu.vector_store %arg20[%c0_38, %c32], %85 {strides = array<i32>} : memref<8x128xf32, #tpu.memory_space<vmem>>, vector<8x32xf32>,
    %87 = vector.extract_strided_slice %61 {offsets = [0, 64], sizes = [8, 32], strides = [1, 1]} : vector<8x128xbf16> to vector<8x32xbf16>
    %cst_39 = arith.constant -1.000000e+30 : f32
    %88 = vector.broadcast %cst_39 : f32 to vector<8x1xf32>
    %cst_40 = arith.constant 0.000000e+00 : f32
    %89 = vector.broadcast %cst_40 : f32 to vector<8x1xf32>
    %cst_41 = arith.constant 0.000000e+00 : f32
    %90 = vector.broadcast %cst_41 : f32 to vector<8x32xf32>
    %cst_42 = arith.constant -1.000000e+30 : f32
    %c0_i32_43 = arith.constant 0 : i32
    %91 = arith.subi %53, %c0_i32_43 : i32
    %92 = arith.addi %c0_i32_43, %91 : i32
    %c1_i32_44 = arith.constant 1 : i32
    %93:3 = scf.for %arg21 = %c0_i32_43 to %92 step %c1_i32_44 iter_args(%arg22 = %88, %arg23 = %89, %arg24 = %90) -> (vector<8x1xf32>, vector<8x1xf32>, vector<8x32xf32>)  : i32 {
      %c8_i32_94 = arith.constant 8 : i32
      %201 = arith.muli %arg21, %c8_i32_94 : i32
      %202 = tpu.assume_multiple %201, 8 : i32
      %c2_95 = arith.constant 2 : index
      %203 = arith.index_cast %202 : i32 to index
      %c0_96 = arith.constant 0 : index
      %204 = vector.load %arg18[%c2_95, %203, %c0_96] : memref<4x8x32xbf16, #tpu.memory_space<vmem>>, vector<1x8x32xbf16>
      %205 = vector.shape_cast %204 : vector<1x8x32xbf16> to vector<8x32xbf16>
      %c2_97 = arith.constant 2 : index
      %206 = arith.index_cast %202 : i32 to index
      %c0_98 = arith.constant 0 : index
      %207 = vector.load %arg19[%c2_97, %206, %c0_98] : memref<4x8x32xbf16, #tpu.memory_space<vmem>>, vector<1x8x32xbf16>
      %208 = vector.shape_cast %207 : vector<1x8x32xbf16> to vector<8x32xbf16>
      %cst_99 = arith.constant dense<0.000000e+00> : vector<8x8xf32>
      %209 = tpu.matmul %87, %205, %cst_99 {dimension_numbers = #tpu.dot_dimension_numbers<[1], [1], [0], [0], [0, 0, 1, 0], [], []>} : vector<8x32xbf16>, vector<8x32xbf16>, vector<8x8xf32> -> vector<8x8xf32>
      %c8_i32_100 = arith.constant 8 : i32
      %210 = arith.muli %arg21, %c8_i32_100 : i32
      %211 = vector.broadcast %210 : i32 to vector<8x8xi32>
      %212 = arith.addi %211, %66 : vector<8x8xi32>
      %213 = arith.cmpi sge, %65, %212 : vector<8x8xi32>
      %214 = vector.broadcast %cst_42 : f32 to vector<8x8xf32>
      %215 = arith.select %213, %209, %214 : vector<8x8xi1>, vector<8x8xf32>
      %cst_101 = arith.constant dense<0xFF800000> : vector<8xf32>
      %216 = vector.multi_reduction <maximumf>, %215, %cst_101 [1] : vector<8x8xf32> to vector<8xf32>
      %217 = vector.shape_cast %216 : vector<8xf32> to vector<8x1xf32>
      %218 = arith.maximumf %arg22, %217 : vector<8x1xf32>
      %219 = arith.subf %arg22, %218 : vector<8x1xf32>
      %220 = math.exp %219 : vector<8x1xf32>
      %221 = vector.broadcast %218 : vector<8x1xf32> to vector<8x8xf32>
      %222 = arith.subf %215, %221 : vector<8x8xf32>
      %223 = math.exp %222 : vector<8x8xf32>
      %224 = arith.mulf %220, %arg23 : vector<8x1xf32>
      %cst_102 = arith.constant dense<0.000000e+00> : vector<8xf32>
      %225 = vector.multi_reduction <add>, %223, %cst_102 [1] : vector<8x8xf32> to vector<8xf32>
      %226 = vector.shape_cast %225 : vector<8xf32> to vector<8x1xf32>
      %227 = arith.addf %224, %226 : vector<8x1xf32>
      %228 = vector.broadcast %220 : vector<8x1xf32> to vector<8x32xf32>
      %229 = arith.mulf %228, %arg24 : vector<8x32xf32>
      %230 = arith.truncf %223 : vector<8x8xf32> to vector<8x8xbf16>
      %cst_103 = arith.constant dense<0.000000e+00> : vector<8x32xf32>
      %231 = tpu.matmul %230, %208, %cst_103 {dimension_numbers = #tpu.dot_dimension_numbers<[1], [0], [0], [1], [0, 0, 1, 1], [], []>} : vector<8x8xbf16>, vector<8x32xbf16>, vector<8x32xf32> -> vector<8x32xf32>
      %232 = arith.addf %229, %231 : vector<8x32xf32>
      scf.yield %218, %227, %232 : vector<8x1xf32>, vector<8x1xf32>, vector<8x32xf32>
    }
    %94 = vector.broadcast %93#1 : vector<8x1xf32> to vector<8x32xf32>
    %95 = arith.divf %93#2, %94 : vector<8x32xf32>
    %c0_45 = arith.constant 0 : index
    %c64 = arith.constant 64 : index
    %96 = vector.load %arg20[%c0_45, %c64] : memref<8x128xf32, #tpu.memory_space<vmem>>, vector<8x32xf32>
    tpu.vector_store %arg20[%c0_45, %c64], %95 {strides = array<i32>} : memref<8x128xf32, #tpu.memory_space<vmem>>, vector<8x32xf32>,
    %97 = vector.extract_strided_slice %61 {offsets = [0, 96], sizes = [8, 32], strides = [1, 1]} : vector<8x128xbf16> to vector<8x32xbf16>
    %cst_46 = arith.constant -1.000000e+30 : f32
    %98 = vector.broadcast %cst_46 : f32 to vector<8x1xf32>
    %cst_47 = arith.constant 0.000000e+00 : f32
    %99 = vector.broadcast %cst_47 : f32 to vector<8x1xf32>
    %cst_48 = arith.constant 0.000000e+00 : f32
    %100 = vector.broadcast %cst_48 : f32 to vector<8x32xf32>
    %cst_49 = arith.constant -1.000000e+30 : f32
    %c0_i32_50 = arith.constant 0 : i32
    %101 = arith.subi %53, %c0_i32_50 : i32
    %102 = arith.addi %c0_i32_50, %101 : i32
    %c1_i32_51 = arith.constant 1 : i32
    %103:3 = scf.for %arg21 = %c0_i32_50 to %102 step %c1_i32_51 iter_args(%arg22 = %98, %arg23 = %99, %arg24 = %100) -> (vector<8x1xf32>, vector<8x1xf32>, vector<8x32xf32>)  : i32 {
      %c8_i32_94 = arith.constant 8 : i32
      %201 = arith.muli %arg21, %c8_i32_94 : i32
      %202 = tpu.assume_multiple %201, 8 : i32
      %c3_95 = arith.constant 3 : index
      %203 = arith.index_cast %202 : i32 to index
      %c0_96 = arith.constant 0 : index
      %204 = vector.load %arg18[%c3_95, %203, %c0_96] : memref<4x8x32xbf16, #tpu.memory_space<vmem>>, vector<1x8x32xbf16>
      %205 = vector.shape_cast %204 : vector<1x8x32xbf16> to vector<8x32xbf16>
      %c3_97 = arith.constant 3 : index
      %206 = arith.index_cast %202 : i32 to index
      %c0_98 = arith.constant 0 : index
      %207 = vector.load %arg19[%c3_97, %206, %c0_98] : memref<4x8x32xbf16, #tpu.memory_space<vmem>>, vector<1x8x32xbf16>
      %208 = vector.shape_cast %207 : vector<1x8x32xbf16> to vector<8x32xbf16>
      %cst_99 = arith.constant dense<0.000000e+00> : vector<8x8xf32>
      %209 = tpu.matmul %97, %205, %cst_99 {dimension_numbers = #tpu.dot_dimension_numbers<[1], [1], [0], [0], [0, 0, 1, 0], [], []>} : vector<8x32xbf16>, vector<8x32xbf16>, vector<8x8xf32> -> vector<8x8xf32>
      %c8_i32_100 = arith.constant 8 : i32
      %210 = arith.muli %arg21, %c8_i32_100 : i32
      %211 = vector.broadcast %210 : i32 to vector<8x8xi32>
      %212 = arith.addi %211, %66 : vector<8x8xi32>
      %213 = arith.cmpi sge, %65, %212 : vector<8x8xi32>
      %214 = vector.broadcast %cst_49 : f32 to vector<8x8xf32>
      %215 = arith.select %213, %209, %214 : vector<8x8xi1>, vector<8x8xf32>
      %cst_101 = arith.constant dense<0xFF800000> : vector<8xf32>
      %216 = vector.multi_reduction <maximumf>, %215, %cst_101 [1] : vector<8x8xf32> to vector<8xf32>
      %217 = vector.shape_cast %216 : vector<8xf32> to vector<8x1xf32>
      %218 = arith.maximumf %arg22, %217 : vector<8x1xf32>
      %219 = arith.subf %arg22, %218 : vector<8x1xf32>
      %220 = math.exp %219 : vector<8x1xf32>
      %221 = vector.broadcast %218 : vector<8x1xf32> to vector<8x8xf32>
      %222 = arith.subf %215, %221 : vector<8x8xf32>
      %223 = math.exp %222 : vector<8x8xf32>
      %224 = arith.mulf %220, %arg23 : vector<8x1xf32>
      %cst_102 = arith.constant dense<0.000000e+00> : vector<8xf32>
      %225 = vector.multi_reduction <add>, %223, %cst_102 [1] : vector<8x8xf32> to vector<8xf32>
      %226 = vector.shape_cast %225 : vector<8xf32> to vector<8x1xf32>
      %227 = arith.addf %224, %226 : vector<8x1xf32>
      %228 = vector.broadcast %220 : vector<8x1xf32> to vector<8x32xf32>
      %229 = arith.mulf %228, %arg24 : vector<8x32xf32>
      %230 = arith.truncf %223 : vector<8x8xf32> to vector<8x8xbf16>
      %cst_103 = arith.constant dense<0.000000e+00> : vector<8x32xf32>
      %231 = tpu.matmul %230, %208, %cst_103 {dimension_numbers = #tpu.dot_dimension_numbers<[1], [0], [0], [1], [0, 0, 1, 1], [], []>} : vector<8x8xbf16>, vector<8x32xbf16>, vector<8x32xf32> -> vector<8x32xf32>
      %232 = arith.addf %229, %231 : vector<8x32xf32>
      scf.yield %218, %227, %232 : vector<8x1xf32>, vector<8x1xf32>, vector<8x32xf32>
    }
    %104 = vector.broadcast %103#1 : vector<8x1xf32> to vector<8x32xf32>
    %105 = arith.divf %103#2, %104 : vector<8x32xf32>
    %c0_52 = arith.constant 0 : index
    %c96 = arith.constant 96 : index
    %106 = vector.load %arg20[%c0_52, %c96] : memref<8x128xf32, #tpu.memory_space<vmem>>, vector<8x32xf32>
    tpu.vector_store %arg20[%c0_52, %c96], %105 {strides = array<i32>} : memref<8x128xf32, #tpu.memory_space<vmem>>, vector<8x32xf32>,
    %c0_53 = arith.constant 0 : index
    %c0_54 = arith.constant 0 : index
    %107 = vector.load %arg20[%c0_53, %c0_54] : memref<8x128xf32, #tpu.memory_space<vmem>>, vector<8x128xf32>
    %108 = arith.truncf %107 : vector<8x128xf32> to vector<8x128xbf16>
    %c0_55 = arith.constant 0 : index
    %c0_56 = arith.constant 0 : index
    %109 = vector.load %arg7[%c0_55, %c0_56] : memref<128x32xbf16, #tpu.memory_space<vmem>>, vector<128x32xbf16>
    %cst_57 = arith.constant dense<0.000000e+00> : vector<8x32xf32>
    %110 = tpu.matmul %108, %109, %cst_57 {dimension_numbers = #tpu.dot_dimension_numbers<[1], [0], [0], [1], [0, 0, 1, 1], [], []>} : vector<8x128xbf16>, vector<128x32xbf16>, vector<8x32xf32> -> vector<8x32xf32>
    %c0_58 = arith.constant 0 : index
    %c0_59 = arith.constant 0 : index
    %111 = vector.load %arg8[%c0_58, %c0_59] : memref<1x32xf32, #tpu.memory_space<vmem>>, vector<1x32xf32>
    %112 = vector.shape_cast %111 : vector<1x32xf32> to vector<32xf32>
    %113 = vector.shape_cast %112 : vector<32xf32> to vector<1x32xf32>
    %114 = vector.broadcast %113 : vector<1x32xf32> to vector<8x32xf32>
    %115 = arith.addf %110, %114 : vector<8x32xf32>
    %116 = arith.addf %115, %1 : vector<8x32xf32>
    %c0_60 = arith.constant 0 : index
    %c0_61 = arith.constant 0 : index
    %117 = vector.load %arg9[%c0_60, %c0_61] : memref<1x32xf32, #tpu.memory_space<vmem>>, vector<1x32xf32>
    %118 = vector.shape_cast %117 : vector<1x32xf32> to vector<32xf32>
    %c0_62 = arith.constant 0 : index
    %c0_63 = arith.constant 0 : index
    %119 = vector.load %arg10[%c0_62, %c0_63] : memref<1x32xf32, #tpu.memory_space<vmem>>, vector<1x32xf32>
    %120 = vector.shape_cast %119 : vector<1x32xf32> to vector<32xf32>
    %cst_64 = arith.constant dense<0.000000e+00> : vector<8xf32>
    %121 = vector.multi_reduction <add>, %116, %cst_64 [1] : vector<8x32xf32> to vector<8xf32>
    %122 = vector.shape_cast %121 : vector<8xf32> to vector<8x1xf32>
    %cst_65 = arith.constant 3.200000e+01 : f32
    %123 = vector.broadcast %cst_65 : f32 to vector<8x1xf32>
    %124 = arith.divf %122, %123 : vector<8x1xf32>
    %125 = vector.broadcast %124 : vector<8x1xf32> to vector<8x32xf32>
    %126 = arith.subf %116, %125 : vector<8x32xf32>
    %127 = arith.mulf %126, %126 : vector<8x32xf32>
    %cst_66 = arith.constant dense<0.000000e+00> : vector<8xf32>
    %128 = vector.multi_reduction <add>, %127, %cst_66 [1] : vector<8x32xf32> to vector<8xf32>
    %129 = vector.shape_cast %128 : vector<8xf32> to vector<8x1xf32>
    %cst_67 = arith.constant 3.200000e+01 : f32
    %130 = vector.broadcast %cst_67 : f32 to vector<8x1xf32>
    %131 = arith.divf %129, %130 : vector<8x1xf32>
    %132 = vector.broadcast %124 : vector<8x1xf32> to vector<8x32xf32>
    %133 = arith.subf %116, %132 : vector<8x32xf32>
    %cst_68 = arith.constant 9.99999974E-6 : f32
    %134 = vector.broadcast %cst_68 : f32 to vector<8x1xf32>
    %135 = arith.addf %131, %134 : vector<8x1xf32>
    %136 = math.rsqrt %135 : vector<8x1xf32>
    %137 = vector.broadcast %136 : vector<8x1xf32> to vector<8x32xf32>
    %138 = arith.mulf %133, %137 : vector<8x32xf32>
    %139 = vector.shape_cast %118 : vector<32xf32> to vector<1x32xf32>
    %140 = vector.broadcast %139 : vector<1x32xf32> to vector<8x32xf32>
    %141 = arith.mulf %138, %140 : vector<8x32xf32>
    %142 = vector.shape_cast %120 : vector<32xf32> to vector<1x32xf32>
    %143 = vector.broadcast %142 : vector<1x32xf32> to vector<8x32xf32>
    %144 = arith.addf %141, %143 : vector<8x32xf32>
    %145 = arith.truncf %144 : vector<8x32xf32> to vector<8x32xbf16>
    %c0_69 = arith.constant 0 : index
    %c0_70 = arith.constant 0 : index
    %146 = vector.load %arg11[%c0_69, %c0_70] : memref<32x64xbf16, #tpu.memory_space<vmem>>, vector<32x64xbf16>
    %cst_71 = arith.constant dense<0.000000e+00> : vector<8x64xf32>
    %147 = tpu.matmul %145, %146, %cst_71 {dimension_numbers = #tpu.dot_dimension_numbers<[1], [0], [0], [1], [0, 0, 1, 1], [], []>} : vector<8x32xbf16>, vector<32x64xbf16>, vector<8x64xf32> -> vector<8x64xf32>
    %c0_72 = arith.constant 0 : index
    %c0_73 = arith.constant 0 : index
    %148 = vector.load %arg12[%c0_72, %c0_73] : memref<1x64xf32, #tpu.memory_space<vmem>>, vector<1x64xf32>
    %149 = vector.shape_cast %148 : vector<1x64xf32> to vector<64xf32>
    %150 = vector.shape_cast %149 : vector<64xf32> to vector<1x64xf32>
    %151 = vector.broadcast %150 : vector<1x64xf32> to vector<8x64xf32>
    %152 = arith.addf %147, %151 : vector<8x64xf32>
    %cst_74 = arith.constant 5.000000e-01 : f32
    %153 = vector.broadcast %cst_74 : f32 to vector<8x64xf32>
    %154 = arith.mulf %153, %152 : vector<8x64xf32>
    %cst_75 = arith.constant 0.707106769 : f32
    %155 = vector.broadcast %cst_75 : f32 to vector<8x64xf32>
    %156 = arith.mulf %152, %155 : vector<8x64xf32>
    %157 = math.erf %156 : vector<8x64xf32>
    %cst_76 = arith.constant 1.000000e+00 : f32
    %158 = vector.broadcast %cst_76 : f32 to vector<8x64xf32>
    %159 = arith.addf %158, %157 : vector<8x64xf32>
    %160 = arith.mulf %154, %159 : vector<8x64xf32>
    %161 = arith.truncf %160 : vector<8x64xf32> to vector<8x64xbf16>
    %c0_77 = arith.constant 0 : index
    %c0_78 = arith.constant 0 : index
    %162 = vector.load %arg13[%c0_77, %c0_78] : memref<64x32xbf16, #tpu.memory_space<vmem>>, vector<64x32xbf16>
    %cst_79 = arith.constant dense<0.000000e+00> : vector<8x32xf32>
    %163 = tpu.matmul %161, %162, %cst_79 {dimension_numbers = #tpu.dot_dimension_numbers<[1], [0], [0], [1], [0, 0, 1, 1], [], []>} : vector<8x64xbf16>, vector<64x32xbf16>, vector<8x32xf32> -> vector<8x32xf32>
    %c0_80 = arith.constant 0 : index
    %c0_81 = arith.constant 0 : index
    %164 = vector.load %arg14[%c0_80, %c0_81] : memref<1x32xf32, #tpu.memory_space<vmem>>, vector<1x32xf32>
    %165 = vector.shape_cast %164 : vector<1x32xf32> to vector<32xf32>
    %166 = vector.shape_cast %165 : vector<32xf32> to vector<1x32xf32>
    %167 = vector.broadcast %166 : vector<1x32xf32> to vector<8x32xf32>
    %168 = arith.addf %163, %167 : vector<8x32xf32>
    %169 = arith.addf %168, %144 : vector<8x32xf32>
    %c0_82 = arith.constant 0 : index
    %c0_83 = arith.constant 0 : index
    %170 = vector.load %arg15[%c0_82, %c0_83] : memref<1x32xf32, #tpu.memory_space<vmem>>, vector<1x32xf32>
    %171 = vector.shape_cast %170 : vector<1x32xf32> to vector<32xf32>
    %c0_84 = arith.constant 0 : index
    %c0_85 = arith.constant 0 : index
    %172 = vector.load %arg16[%c0_84, %c0_85] : memref<1x32xf32, #tpu.memory_space<vmem>>, vector<1x32xf32>
    %173 = vector.shape_cast %172 : vector<1x32xf32> to vector<32xf32>
    %cst_86 = arith.constant dense<0.000000e+00> : vector<8xf32>
    %174 = vector.multi_reduction <add>, %169, %cst_86 [1] : vector<8x32xf32> to vector<8xf32>
    %175 = vector.shape_cast %174 : vector<8xf32> to vector<8x1xf32>
    %cst_87 = arith.constant 3.200000e+01 : f32
    %176 = vector.broadcast %cst_87 : f32 to vector<8x1xf32>
    %177 = arith.divf %175, %176 : vector<8x1xf32>
    %178 = vector.broadcast %177 : vector<8x1xf32> to vector<8x32xf32>
    %179 = arith.subf %169, %178 : vector<8x32xf32>
    %180 = arith.mulf %179, %179 : vector<8x32xf32>
    %cst_88 = arith.constant dense<0.000000e+00> : vector<8xf32>
    %181 = vector.multi_reduction <add>, %180, %cst_88 [1] : vector<8x32xf32> to vector<8xf32>
    %182 = vector.shape_cast %181 : vector<8xf32> to vector<8x1xf32>
    %cst_89 = arith.constant 3.200000e+01 : f32
    %183 = vector.broadcast %cst_89 : f32 to vector<8x1xf32>
    %184 = arith.divf %182, %183 : vector<8x1xf32>
    %185 = vector.broadcast %177 : vector<8x1xf32> to vector<8x32xf32>
    %186 = arith.subf %169, %185 : vector<8x32xf32>
    %cst_90 = arith.constant 9.99999974E-6 : f32
    %187 = vector.broadcast %cst_90 : f32 to vector<8x1xf32>
    %188 = arith.addf %184, %187 : vector<8x1xf32>
    %189 = math.rsqrt %188 : vector<8x1xf32>
    %190 = vector.broadcast %189 : vector<8x1xf32> to vector<8x32xf32>
    %191 = arith.mulf %186, %190 : vector<8x32xf32>
    %192 = vector.shape_cast %171 : vector<32xf32> to vector<1x32xf32>
    %193 = vector.broadcast %192 : vector<1x32xf32> to vector<8x32xf32>
    %194 = arith.mulf %191, %193 : vector<8x32xf32>
    %195 = vector.shape_cast %173 : vector<32xf32> to vector<1x32xf32>
    %196 = vector.broadcast %195 : vector<1x32xf32> to vector<8x32xf32>
    %197 = arith.addf %194, %196 : vector<8x32xf32>
    %c0_91 = arith.constant 0 : index
    %c0_92 = arith.constant 0 : index
    %c0_93 = arith.constant 0 : index
    %198 = vector.load %arg17[%c0_91, %c0_92, %c0_93] : memref<1x8x32xf32, #tpu.memory_space<vmem>>, vector<1x8x32xf32>
    %199 = vector.shape_cast %198 : vector<1x8x32xf32> to vector<8x32xf32>
    %200 = vector.shape_cast %197 : vector<8x32xf32> to vector<1x8x32xf32>
    tpu.vector_store %arg17[%c0_91, %c0_92, %c0_93], %200 {strides = array<i32>} : memref<1x8x32xf32, #tpu.memory_space<vmem>>, vector<1x8x32xf32>,
    return
  }
  func.func @transform_0(%arg0: i32, %arg1: i32) -> (i32, i32, i32) {
    %c0_i32 = arith.constant 0 : i32
    %c0_i32_0 = arith.constant 0 : i32
    return %arg0, %arg1, %c0_i32 : i32, i32, i32
  }
  func.func @transform_1(%arg0: i32, %arg1: i32) -> (i32, i32) {
    %c0_i32 = arith.constant 0 : i32
    %c0_i32_0 = arith.constant 0 : i32
    %c0_i32_1 = arith.constant 0 : i32
    return %c0_i32, %c0_i32_0 : i32, i32
  }
  func.func @transform_2(%arg0: i32, %arg1: i32) -> (i32, i32) {
    %c0_i32 = arith.constant 0 : i32
    %c0_i32_0 = arith.constant 0 : i32
    %c0_i32_1 = arith.constant 0 : i32
    return %c0_i32, %c0_i32_0 : i32, i32
  }
  func.func @transform_3(%arg0: i32, %arg1: i32) -> (i32, i32) {
    %c0_i32 = arith.constant 0 : i32
    %c0_i32_0 = arith.constant 0 : i32
    %c0_i32_1 = arith.constant 0 : i32
    return %c0_i32, %c0_i32_0 : i32, i32
  }
  func.func @transform_4(%arg0: i32, %arg1: i32) -> (i32, i32) {
    %c0_i32 = arith.constant 0 : i32
    %c0_i32_0 = arith.constant 0 : i32
    %c0_i32_1 = arith.constant 0 : i32
    return %c0_i32, %c0_i32_0 : i32, i32
  }
  func.func @transform_5(%arg0: i32, %arg1: i32) -> (i32, i32) {
    %c0_i32 = arith.constant 0 : i32
    %c0_i32_0 = arith.constant 0 : i32
    %c0_i32_1 = arith.constant 0 : i32
    return %c0_i32, %c0_i32_0 : i32, i32
  }
  func.func @transform_6(%arg0: i32, %arg1: i32) -> (i32, i32) {
    %c0_i32 = arith.constant 0 : i32
    %c0_i32_0 = arith.constant 0 : i32
    %c0_i32_1 = arith.constant 0 : i32
    return %c0_i32, %c0_i32_0 : i32, i32
  }
  func.func @transform_7(%arg0: i32, %arg1: i32) -> (i32, i32) {
    %c0_i32 = arith.constant 0 : i32
    %c0_i32_0 = arith.constant 0 : i32
    %c0_i32_1 = arith.constant 0 : i32
    return %c0_i32, %c0_i32_0 : i32, i32
  }
  func.func @transform_8(%arg0: i32, %arg1: i32) -> (i32, i32) {
    %c0_i32 = arith.constant 0 : i32
    %c0_i32_0 = arith.constant 0 : i32
    %c0_i32_1 = arith.constant 0 : i32
    return %c0_i32, %c0_i32_0 : i32, i32
  }
  func.func @transform_9(%arg0: i32, %arg1: i32) -> (i32, i32) {
    %c0_i32 = arith.constant 0 : i32
    %c0_i32_0 = arith.constant 0 : i32
    %c0_i32_1 = arith.constant 0 : i32
    return %c0_i32, %c0_i32_0 : i32, i32
  }
  func.func @transform_10(%arg0: i32, %arg1: i32) -> (i32, i32) {
    %c0_i32 = arith.constant 0 : i32
    %c0_i32_0 = arith.constant 0 : i32
    %c0_i32_1 = arith.constant 0 : i32
    return %c0_i32, %c0_i32_0 : i32, i32
  }
  func.func @transform_11(%arg0: i32, %arg1: i32) -> (i32, i32) {
    %c0_i32 = arith.constant 0 : i32
    %c0_i32_0 = arith.constant 0 : i32
    %c0_i32_1 = arith.constant 0 : i32
    return %c0_i32, %c0_i32_0 : i32, i32
  }
  func.func @transform_12(%arg0: i32, %arg1: i32) -> (i32, i32) {
    %c0_i32 = arith.constant 0 : i32
    %c0_i32_0 = arith.constant 0 : i32
    %c0_i32_1 = arith.constant 0 : i32
    return %c0_i32, %c0_i32_0 : i32, i32
  }
  func.func @transform_13(%arg0: i32, %arg1: i32) -> (i32, i32) {
    %c0_i32 = arith.constant 0 : i32
    %c0_i32_0 = arith.constant 0 : i32
    %c0_i32_1 = arith.constant 0 : i32
    return %c0_i32, %c0_i32_0 : i32, i32
  }
  func.func @transform_14(%arg0: i32, %arg1: i32) -> (i32, i32) {
    %c0_i32 = arith.constant 0 : i32
    %c0_i32_0 = arith.constant 0 : i32
    %c0_i32_1 = arith.constant 0 : i32
    return %c0_i32, %c0_i32_0 : i32, i32
  }
  func.func @transform_15(%arg0: i32, %arg1: i32) -> (i32, i32, i32) {
    %c0_i32 = arith.constant 0 : i32
    %c0_i32_0 = arith.constant 0 : i32
    return %arg0, %arg1, %c0_i32 : i32, i32, i32
  }
}

</mosaic_0001>

<bundles_post_ra>
// kernel: tpu_custom_call.1
= control target key start
LH: loop header
LB: loop body
LE: loop exit
PB: predicated region body
PF: predicated region fallthrough
CT: control target
= control target key end

     0   :  { %s2568_s0 = inlined_call_operand.vmem [shape: f32[2,8,32], index: 0, kind: input, shape index: {}]   ;;  %s2569_s1 = inlined_call_operand.vmem [shape: bf16[32,128], index: 1, kind: input, shape index: {}]   ;;  %s2570_s2 = inlined_call_operand.vmem [shape: f32[1,128], index: 2, kind: input, shape index: {}]   ;;  %s2571_s3 = inlined_call_operand.vmem [shape: bf16[32,256], index: 3, kind: input, shape index: {}]   ;;  %s2572_s4 = inlined_call_operand.vmem [shape: f32[1,256], index: 4, kind: input, shape index: {}]   ;;  %s2573_s5 = inlined_call_operand.vmem [shape: bf16[128,32], index: 5, kind: input, shape index: {}]   ;;  %s2574_s6 = inlined_call_operand.vmem [shape: f32[1,32], index: 6, kind: input, shape index: {}]   ;;  %s2575_s7 = inlined_call_operand.vmem [shape: f32[1,32], index: 7, kind: input, shape index: {}]   ;;  %s2576_s8 = inlined_call_operand.vmem [shape: f32[1,32], index: 8, kind: input, shape index: {}]   ;;  %s2577_s9 = inlined_call_operand.vmem [shape: bf16[32,64], index: 9, kind: input, shape index: {}]   ;;  %s2578_s10 = inlined_call_operand.vmem [shape: f32[1,64], index: 10, kind: input, shape index: {}]   ;;  %s2579_s11 = inlined_call_operand.vmem [shape: bf16[64,32], index: 11, kind: input, shape index: {}]   ;;  %s2580_s12 = inlined_call_operand.vmem [shape: f32[1,32], index: 12, kind: input, shape index: {}]   ;;  %s2581_s13 = inlined_call_operand.vmem [shape: f32[1,32], index: 13, kind: input, shape index: {}]   ;;  %s2582_s14 = inlined_call_operand.vmem [shape: f32[1,32], index: 14, kind: input, shape index: {}]   ;;  %s2583_s15 = inlined_call_operand.hbm [shape: f32[2,8,32], index: 15, kind: output, shape index: {}]  }
   0x1   :  { %2592 = sst [smem:[#allocation15_spill]] %s2568_s0 }
   0x2   :  { %20 = vsyncpa [#allocation6], 0 }
   0x3   :  { %22 = vsyncpa [#allocation6 + $0x1], 0  ;;  %s2240_s18 = smov 0   ;;  %s2242_s19 = smov 0  }
   0x4   :  { %s2244_s20 = smov 0   ;;  %s2246_s21 = smov 0  }
   0x5   :  { %s2248_s22 = smov 0   ;;  %s2250_s23 = smov 0  }
   0x6 LB: > { %2593 = sst [smem:[#allocation8_spill]] %s2067_s18  ;;  %s1566_s24 = sadd.s32 4294967295, %s2087_s23   ;;  %s2087_s23 = sphi %s2250_s23, %s28_s23   ;;  %s2083_s22 = sphi %s2248_s22, %s2610_s22   ;;  %s2079_s21 = sphi %s2246_s21, %s2609_s21   ;;  %s2075_s20 = sphi %s2244_s20, %s2608_s20   ;;  %s2071_s19 = sphi %s2242_s19, %s2612_s19   ;;  %s2067_s18 = sphi %s2240_s18, %s2611_s18  }
   0x7   : > { %2594 = sst [smem:[#allocation9_spill]] %s2075_s20  ;;  %s1567_s25 = sadd.s32 4294967294, %s2087_s23  }
   0x8   : > { %2595 = sst [smem:[#allocation10_spill]] %s2083_s22  ;;  %s40_s26 = sadd.s32 1, %s2083_s22 }
   0x9   : > { %2596 = sst [smem:[#allocation11_spill]] %s2087_s23  ;;  %s371_s27 = sadd.s32 1, %s2075_s20 }
   0xa   : > { %p42_p0 = scmp.ge.s32.totalorder %s40_s26, 2  ;;  %p381_p1 = scmp.ne.s32.totalorder %s2075_s20, %s2071_s19 }
   0xb   : > { %p382_p2 = scmp.eq.s32.totalorder %s1566_s24, 1  ;;  %p387_p3 = scmp.ne.s32.totalorder %s2071_s19, %s2067_s18 }
   0xc   : > { %s2614_s26 = smov (%p42_p0, %s40_s26), 0  ;;  %p388_p5 = scmp.eq.s32.totalorder %s1567_s25, 1 }
   0xd   : > { %2597 = sst [smem:[#allocation12_spill]] %s2614_s26  ;;  %p2280_p4 = por %p382_p2, %p381_p1 }
   0xe   : > { %s366_s29 = ssub.s32 %s2083_s22, %s2614_s26  ;;  %p1570_p6 = scmp.ge.s32.totalorder %s2087_s23, 1 }
   0xf   : > { %p369_p7 = scmp.eq.s32.totalorder %s366_s29, 0  ;;  %p2287_p8 = por %p388_p5, %p387_p3 }
  0x10   : > { %p458_p9 = scmp.lt.s32.totalorder %s2087_s23, 3 }
  0x11   : > { %s2599_s30 = scalar_select %p2287_p8, 1, 0 }
  0x12   : > { %s2293_s16 = scalar_select %p369_p7, %s2075_s20, %s371_s27  }
  0x13   : > { %2600 = sst [smem:[#allocation13_spill]] %s2599_s30  ;;  %p459_p10 = pnand %p1570_p6, %p458_p9 }
  0x14   : > { %2601 = sst [smem:[#allocation14_spill]] %s2293_s16  ;;  %s2588_s17 = sand.u32 (!%p459_p10), 1, %s2071_s19  }
  0x15   : > { %462 = sbr.rel (%p459_p10) target bundleno = 3583 (0xdff), region = 80  ;;  %p508_p11 = scmp.lt.s32.totalorder (!%p459_p10), %s2079_s21, 1 }
  0x16   : > { %s2305_s26 = sshll.u32 (!%p459_p10), %s2588_s17, 3  ;;  %s2602_s0 = sld [smem:[#allocation15_spill]] (!%p459_p10) }
  0x17   : > { %s2153_s16 = smov (!%p459_p10), 32   ;;  %s2155_s24 = smov (!%p459_p10), 64  }
  0x18   : > { %s507_s25 = scalar_lea.vmem (!%p459_p10), [#allocation5], %s2305_s26 }
  0x1a   : > { %v1583_v0 = vld [vmem:[%s2571_s3 + $0x10] sm:$0xf]  ;;  %v1698_v1 = vld [vmem:[%s2571_s3 + $0x14] sm:$0xf0]  ;;  %v1697_v3 = vld [vmem:[%s2571_s3 + $0x14] sm:$0xf]  ;;  %v663_v32 = vlaneseq }
  0x1b   : > { %v1584_v2 = vor.u32 %v1698_v1, %v1583_v0  ;;  %v1585_v4 = vld [vmem:[%s2571_s3 + $0x18] sm:$0xf0]  ;;  %v1575_v6 = vld [vmem:[%s2571_s3] sm:$0xf]  ;;  %v1696_v7 = vld [vmem:[%s2571_s3 + $0x4] sm:$0xf0] }
  0x1c   : > { %v1588_v5 = vor.u32 %v1697_v3, %v1585_v4  ;;  %v1700_v8 = vld [vmem:[%s2569_s1 + $0x8] sm:$0xff]  ;;  %v1576_v9 = vor.u32 %v1696_v7, %v1575_v6  ;;  %v1695_v10 = vld [vmem:[%s2571_s3 + $0x4] sm:$0xf]  ;;  %s509_s18 = scalar_select %p508_p11, %s2079_s21, 1  ;;  %vm549_vm0 = vcmask 261120   ;;  %vm584_vm1 = vcmask 257024  }
  0x1d   : > { %559 = vmatpush.bf16.msra.mxu0 %v1584_v2  ;;  %v1577_v11 = vld [vmem:[%s2571_s3 + $0x8] sm:$0xf0]  ;;  %655 = vmatpush.bf16.msra.mxu2 %v1700_v8  ;;  %v1699_v13 = vld [vmem:[%s2569_s1] sm:$0xff]  ;;  %v2355_v33 = vshrl.u32 %v663_v32, 7  ;;  %v2357_v34 = vand.u32 127, %v663_v32  ;;  %v2089_v41 = vmov 0.0  }
  0x1e   : > { %572 = vmatpush.bf16.msra.mxu1 %v1588_v5  ;;  %v1580_v12 = vor.u32 %v1695_v10, %v1577_v11  ;;  %s1572_s30 = sshll.u32 %s509_s18, 3  ;;  %v523_v16 = vld [vmem:[%s2572_s4] sm:$0x3]  ;;  %s2154_s18 = smov 96   ;;  %v2093_v42 = vmov 0.0  }
  0x1f   : > { %s514_s23 = scalar_lea.vmem %s2602_s0, %s1572_s30  ;;  %v525_v17 = vperm.slane %v523_v16, 0  ;;  %v526_v18 = vperm.slane %v523_v16, 1  ;;  %v1905_v24 = vld [vmem:[%s2570_s2] ss:$0 sm:$0xff]  ;;  %v2097_v43 = vmov -1e+30  }
  0x20   : > { %v2335_v14 = vld [vmem:[%s514_s23] sm:$0xff]  ;;  %s2366_s30 = smov 0  }
  0x21   : > { %560 = vmatpush.bf16.msra.mxu0 %v1576_v9  ;;  %v517_v15 = vpack.c.bf16 %v2335_v14, %v2335_v14  ;;  %656 = vmatpush.bf16.msra.mxu2 %v1699_v13 }
  0x22   : > { %573 = vmatpush.bf16.msra.mxu1 %v1580_v12 }
  0x24   : > { %1589 = vmatmul.msk.bf16.vlgmr.msra.gmra.mxu0 %vm549_vm0, %v517_v15  ;;  %1605 = vmatmul.msk.bf16.vlgmr.msra.gmra.mxu2 %vm549_vm0, %v517_v15 }
  0x25   : > { %1590 = vmatmul.msk.bf16.vlgmr.msra.gmra.mxu1 %vm549_vm0, %v517_v15 }
  0xa1   : > { %v562_v19 = vpop.f32.mrf.mxu0 }
  0xa2   : > { %v563_v20 = vadd.f32 %v562_v19, %v525_v17  ;;  %v575_v21 = vpop.f32.mrf.mxu1 }
  0xa3   : > { %v576_v22 = vadd.f32 %v575_v21, %v526_v18 }
  0xa5   : > { %v579_v23 = vpack.c.bf16 %v576_v22, %v563_v20 }
  0xa7   : > { %585 = vst.msk [vmem:[#allocation2] sm:$0xf] %vm584_vm1, %v579_v23  ;;  %v587_v25 = vrot.slane %v579_v23, 4  ;;  %616 = vrot.lane.b32.xlu1 %v579_v23, %s2153_s16  ;;  %592 = vrot.lane.b32.xlu0 %v579_v23, %s2154_s18  ;;  %v658_v26 = vpop.f32.mrf.mxu2 }
  0xa8   : > { %v659_v28 = vadd.f32 %v1905_v24, %v658_v26 }
  0xa9   : > { %591 = vst.msk [vmem:[#allocation3] sm:$0xf] %vm584_vm1, %v587_v25  ;;  %v564_v27 = vpop.f32.mrf.mxu0 }
  0xaa   : > { %v577_v29 = vpop.f32.mrf.mxu1  ;;  %v2352_v30 = vpack.c.bf16 %v659_v28, %v659_v28 }
  0xaf   : > { %604 = vrot.lane.b32.xlu0 %v579_v23, %s2155_s24  ;;  %v660_v31 = vpop.f32.mrf.mxu2 }
 0x119   : > { %v617_v35 = vpop.permute.xlu1 %616  ;;  %v593_v36 = vpop.permute.xlu0 %592 }
 0x11a   : > { %1595 = vst.msk [vmem:[#allocation2 + $0xc] sm:$0xf] %vm584_vm1, %v617_v35  ;;  %v623_v37 = vrot.slane %v617_v35, 4  ;;  %v599_v38 = vrot.slane %v593_v36, 4 }
 0x11b   : > { %1591 = vst.msk [vmem:[#allocation2 + $0x4] sm:$0xf] %vm584_vm1, %v593_v36 }
 0x11c   : > { %1596 = vst.msk [vmem:[#allocation3 + $0xc] sm:$0xf] %vm584_vm1, %v623_v37 }
 0x11d   : > { %1592 = vst.msk [vmem:[#allocation3 + $0x4] sm:$0xf] %vm584_vm1, %v599_v38 }
 0x121   : > { %v605_v39 = vpop.permute.xlu0 %604 }
 0x122   : > { %1593 = vst.msk [vmem:[#allocation2 + $0x8] sm:$0xf] %vm584_vm1, %v605_v39  ;;  %v611_v40 = vrot.slane %v605_v39, 4 }
 0x124   : > { %1594 = vst.msk [vmem:[#allocation3 + $0x8] sm:$0xf] %vm584_vm1, %v611_v40 }
 0x125 LB: >> { %s1606_s17 = sshll.u32 %s2103_s30, 3  ;;  %vm710_vm3 = vcmask 64512   ;;  %vm731_vm4 = vcmask 1043456   ;;  %s672_s30 = sadd.s32 1, %s2103_s30   ;;  %s2103_s30 = sphi %s2366_s30, %s672_s30   ;;  %v2099_v43 = vphi %v2097_v43, %v2098_v43   ;;  %v2095_v42 = vphi %v2093_v42, %v2094_v42   ;;  %v2091_v41 = vphi %v2089_v41, %v2090_v41  }
 0x126   : >> { %s679_s29 = sshra.s32 %s1606_s17, 3  ;;  %v706_v46 = vstv %s1606_s17  ;;  %p671_p12 = scmp.ge.s32.totalorder %s672_s30, 1 }
 0x127   : >> { %s1607_s22 = sshll.u32 %s679_s29, 2  ;;  %v707_v47 = vadd.s32 %v706_v46, %v2357_v34  ;;  %v2105_v19 = vmov (%p671_p12), 0.0   ;;  %v2109_v20 = vmov (%p671_p12), 0.0   ;;  %v2113_v21 = vmov (%p671_p12), -1e+30   ;;  %s2385_s20 = smov (%p671_p12), 0  }
 0x128   : >> { %s682_s27 = scalar_lea.vmem [#allocation2], %s1607_s22  ;;  %s685_s23 = scalar_lea.vmem [#allocation3], %s1607_s22 }
 0x129   : >> { %v683_v44 = vld [vmem:[%s682_s27] sm:$0xf]  ;;  %vm708_vm2 = vcmp.ge.s32.totalorder %v2355_v33, %v707_v47 }
 0x12a   : >> { %v691_v45 = vsel %vm549_vm0, %v683_v44, 0 }
 0x12b   : >> { %700 = vmatpush.bf16.xpose.msra.mxu0 %v691_v45  ;;  %v686_v52 = vld [vmem:[%s685_s23] sm:$0xf] }
 0x12c   : >> { %v733_v53 = vsel %vm731_vm4, %v686_v52, 0 }
 0x12d   : >> { %742 = vmatpush.bf16.msra.mxu1 %v733_v53 }
 0x132   : >> { %1609 = vmatmul.msk.bf16.vlgmr.msra.gmra.mxu0 %vm549_vm0, %v2352_v30 }
 0x1af   : >> { %v702_v48 = vpop.f32.mrf.mxu0 }
 0x1b0   : >> { %v709_v49 = vsel %vm708_vm2, %v702_v48, -1e+30 }
 0x1b1   : >> { %v711_v50 = vsel %vm710_vm3, %v709_v49, -inf }
 0x1b2   : >> { %712 = vmax.xlane.f32.xlu0 %v711_v50 }
 0x1b7   : >> { %v704_v51 = vpop.f32.mrf.mxu0 }
 0x225   : >> { %v713_v54 = vpop.xlane.xlu0 %712 }
 0x226   : >> { %v714_v55 = vmax.f32 %v2099_v43, %v713_v54  }
 0x228   : >> { %v715_v56 = vsub.f32 %v2099_v43, %v714_v55  ;;  %v718_v57 = vsub.f32 %v709_v49, %v714_v55  ;;  %v2098_v43 = vmov %v714_v55  }
 0x22a   : >> { %v719_v58 = vmul.f32 1.442695, %v718_v57  ;;  %v716_v62 = vmul.f32 1.442695, %v715_v56 }
 0x22c   : >> { %1906 = vpow2.f32 %v719_v58 }
 0x22d   : >> { %1908 = vpow2.f32 %v716_v62 }
 0x232   : >> { %v1907_v59 = vpop.eup %1906 }
 0x233   : >> { %v722_v60 = vsel %vm710_vm3, %v1907_v59, 0.0  ;;  %v727_v61 = vpack.c.bf16 %v1907_v59, %v1907_v59  ;;  %v1909_v63 = vpop.eup %1908 }
 0x234   : >> { %723 = vadd.xlane.f32.xlu0 %v722_v60  ;;  %v721_v0 = vmul.f32 %v2095_v42, %v1909_v63  ;;  %v726_v3 = vmul.f32 %v2091_v41, %v1909_v63 }
 0x235   : >> { %1610 = vmatmul.msk.bf16.vlgmr.msra.gmra.mxu1 %vm710_vm3, %v727_v61 }
 0x2a7   : >> { %v724_v1 = vpop.xlane.xlu0 %723 }
 0x2a8   : >> { %v725_v2 = vadd.f32 %v724_v1, %v721_v0  }
 0x2aa   : >> { %v2094_v42 = vmov %v725_v2   ;;  %1910 = vrcp.f32 (%p671_p12), %v725_v2  ;;  %v760_v9 = vand.u32 (%p671_p12), 2147483648, %v725_v2  ;;  %vm754_vm5 = vweird.f32 (%p671_p12), %v725_v2 }
 0x2ab   : > { %v758_v11 = vand.u32 (%p671_p12), 2147483647, %v725_v2 }
 0x2ac   : > { %v761_v13 = vor.u32 (%p671_p12), 1.1754944e-38, %v760_v9 }
 0x2ad   : > { %vm759_vm8 = vcmp.eq.f32.partialorder (%p671_p12), %v758_v11, 8.507059e+37 }
 0x2b0   : > { %v1911_v7 = vpop.eup (%p671_p12), %1910 }
 0x2b1   : > { %v750_v8 = vmul.f32 (%p671_p12), %v1911_v7, %v725_v2  ;;  %vm755_vm6 = vweird.f32 (%p671_p12), %v1911_v7 }
 0x2b2   : >> { %v744_v4 = vpop.f32.mrf.mxu1  ;;  %vm756_vm7 = vmor (%p671_p12), %vm754_vm5, %vm755_vm6 }
 0x2b3   : >> { %v748_v5 = vadd.f32 %v744_v4, %v726_v3   ;;  %v751_v10 = vsub.f32 (%p671_p12), 1.0, %v750_v8 }
 0x2b5   : >> { %v2090_v41 = vmov %v748_v5   ;;  %v752_v12 = vmul.f32 (%p671_p12), %v1911_v7, %v751_v10 }
 0x2b6   : > { %674 = sbr.rel (!%p671_p12) target bundleno = 293 (0x125), region = 159 }
 0x2b7   : > { %v753_v15 = vadd.f32 (%p671_p12), %v1911_v7, %v752_v12 }
 0x2b9   : > { %v757_v16 = vsel (%p671_p12), %vm756_vm7, %v1911_v7, %v753_v15 }
 0x2ba   : >> { %v746_v6 = vpop.f32.mrf.mxu1  ;;  %v762_v17 = vsel (%p671_p12), %vm759_vm8, %v761_v13, %v757_v16 }
 0x2bb   : > { %v763_v18 = vmul.f32 %v762_v17, %v748_v5 }
 0x2bd   : > { %764 = vst.msk [vmem:[#allocation4] sm:$0xff] %vm549_vm0, %v763_v18 }
 0x2be LB: >> { %v785_v22 = vunpack.c.l.b16 %v2352_v30  ;;  %s1611_s30 = sshll.u32 %s2119_s20, 3  ;;  %s2156_s29 = smov 96   ;;  %s2119_s20 = sphi %s2385_s20, %s768_s20   ;;  %v2115_v21 = vphi %v2113_v21, %v2114_v21   ;;  %v2111_v20 = vphi %v2109_v20, %v2110_v20   ;;  %v2107_v19 = vphi %v2105_v19, %v2106_v19  }
 0x2bf   : >> { %s775_s17 = sshra.s32 %s1611_s30, 3  ;;  %v808_v27 = vstv %s1611_s30  ;;  %s768_s20 = sadd.s32 1, %s2119_s20  }
 0x2c0   : >> { %v2391_v23 = vpack.c.b16 %v785_v22, %v785_v22  ;;  %s1612_s22 = sshll.u32 %s775_s17, 2  ;;  %v809_v28 = vadd.s32 %v808_v27, %v2357_v34  ;;  %p767_p13 = scmp.ge.s32.totalorder %s768_s20, 1 }
 0x2c1   : >> { %s1455_s27 = scalar_lea.vmem [#allocation2], %s1612_s22  ;;  %s1458_s23 = scalar_lea.vmem [#allocation3], %s1612_s22  ;;  %vm870_vm14 = vcmask (%p767_p13), 523520   ;;  %v2121_v30 = vmov (%p767_p13), 0.0   ;;  %v2125_v3 = vmov (%p767_p13), 0.0  }
 0x2c2   : >> { %787 = vrot.lane.b32.xlu0 %v2391_v23, %s2156_s29  ;;  %v1613_v24 = vld [vmem:[%s1455_s27 + $0x4] sm:$0xf]  ;;  %vm810_vm9 = vcmp.ge.s32.totalorder %v2355_v33, %v809_v28  ;;  %v2129_v4 = vmov (%p767_p13), -1e+30   ;;  %s2407_s20 = smov (%p767_p13), 0  }
 0x2c3   : >> { %v793_v25 = vsel %vm549_vm0, %v1613_v24, 0  ;;  %v1615_v36 = vld [vmem:[%s1458_s23 + $0x4] sm:$0xf] }
 0x2c4   : >> { %802 = vmatpush.bf16.xpose.msra.mxu0 %v793_v25  ;;  %v835_v37 = vsel %vm731_vm4, %v1615_v36, 0 }
 0x2c5   : >> { %844 = vmatpush.bf16.msra.mxu1 %v835_v37 }
 0x334   : >> { %v788_v26 = vpop.permute.xlu0 %787 }
 0x335   : >> { %1616 = vmatmul.msk.bf16.vlgmr.msra.gmra.mxu0 %vm549_vm0, %v788_v26 }
 0x3b2   : >> { %v804_v29 = vpop.f32.mrf.mxu0 }
 0x3b3   : >> { %v811_v31 = vsel %vm810_vm9, %v804_v29, -1e+30 }
 0x3b4   : >> { %v813_v32 = vsel %vm710_vm3, %v811_v31, -inf }
 0x3b5   : >> { %814 = vmax.xlane.f32.xlu0 %v813_v32 }
 0x3ba   : >> { %v806_v35 = vpop.f32.mrf.mxu0 }
 0x428   : >> { %v815_v38 = vpop.xlane.xlu0 %814 }
 0x429   : >> { %v816_v39 = vmax.f32 %v2115_v21, %v815_v38  }
 0x42b   : >> { %v817_v40 = vsub.f32 %v2115_v21, %v816_v39  ;;  %v820_v41 = vsub.f32 %v811_v31, %v816_v39  ;;  %v2114_v21 = vmov %v816_v39  }
 0x42d   : >> { %v821_v42 = vmul.f32 1.442695, %v820_v41  ;;  %v818_v46 = vmul.f32 1.442695, %v817_v40 }
 0x42f   : >> { %1912 = vpow2.f32 %v821_v42 }
 0x430   : >> { %1914 = vpow2.f32 %v818_v46 }
 0x435   : >> { %v1913_v43 = vpop.eup %1912 }
 0x436   : >> { %v824_v44 = vsel %vm710_vm3, %v1913_v43, 0.0  ;;  %v829_v45 = vpack.c.bf16 %v1913_v43, %v1913_v43  ;;  %v1915_v47 = vpop.eup %1914 }
 0x437   : >> { %825 = vadd.xlane.f32.xlu1 %v824_v44  ;;  %v823_v48 = vmul.f32 %v2111_v20, %v1915_v47  ;;  %v828_v51 = vmul.f32 %v2107_v19, %v1915_v47 }
 0x438   : >> { %1617 = vmatmul.msk.bf16.vlgmr.msra.gmra.mxu1 %vm710_vm3, %v829_v45 }
 0x4aa   : >> { %v826_v49 = vpop.xlane.xlu1 %825 }
 0x4ab   : >> { %v827_v50 = vadd.f32 %v826_v49, %v823_v48  }
 0x4ad   : >> { %v2110_v20 = vmov %v827_v50   ;;  %1916 = vrcp.f32 (%p767_p13), %v827_v50  ;;  %v862_v57 = vand.u32 (%p767_p13), 2147483648, %v827_v50  ;;  %vm856_vm10 = vweird.f32 (%p767_p13), %v827_v50 }
 0x4ae   : > { %v860_v59 = vand.u32 (%p767_p13), 2147483647, %v827_v50 }
 0x4af   : > { %v863_v61 = vor.u32 (%p767_p13), 1.1754944e-38, %v862_v57 }
 0x4b0   : > { %vm861_vm13 = vcmp.eq.f32.partialorder (%p767_p13), %v860_v59, 8.507059e+37 }
 0x4b3   : > { %v1917_v55 = vpop.eup (%p767_p13), %1916 }
 0x4b4   : > { %v852_v56 = vmul.f32 (%p767_p13), %v1917_v55, %v827_v50  ;;  %vm857_vm11 = vweird.f32 (%p767_p13), %v1917_v55 }
 0x4b5   : >> { %v846_v52 = vpop.f32.mrf.mxu1  ;;  %vm858_vm12 = vmor (%p767_p13), %vm856_vm10, %vm857_vm11 }
 0x4b6   : >> { %v850_v53 = vadd.f32 %v846_v52, %v828_v51   ;;  %v853_v58 = vsub.f32 (%p767_p13), 1.0, %v852_v56 }
 0x4b8   : >> { %v2106_v19 = vmov %v850_v53   ;;  %v854_v60 = vmul.f32 (%p767_p13), %v1917_v55, %v853_v58 }
 0x4b9   : > { %770 = sbr.rel (!%p767_p13) target bundleno = 702 (0x2be), region = 170 }
 0x4ba   : > { %v855_v62 = vadd.f32 (%p767_p13), %v1917_v55, %v854_v60 }
 0x4bc   : > { %v859_v63 = vsel (%p767_p13), %vm858_vm12, %v1917_v55, %v855_v62 }
 0x4bd   : >> { %v848_v54 = vpop.f32.mrf.mxu1  ;;  %v864_v0 = vsel (%p767_p13), %vm861_vm13, %v863_v61, %v859_v63 }
 0x4be   : > { %v865_v1 = vmul.f32 %v864_v0, %v850_v53 }
 0x4c0   : > { %867 = vrot.lane.b32.xlu0 %v865_v1, %s2153_s16 }
 0x532   : > { %v868_v2 = vpop.permute.xlu0 %867 }
 0x533   : > { %871 = vst.msk [vmem:[#allocation4] sm:$0xff] %vm870_vm14, %v868_v2 }
 0x534 LB: >> { %s2157_s30 = smov 64   ;;  %s1618_s16 = sshll.u32 %s2135_s20, 3  ;;  %s2135_s20 = sphi %s2407_s20, %s875_s20   ;;  %v2131_v4 = vphi %v2129_v4, %v2130_v4   ;;  %v2127_v3 = vphi %v2125_v3, %v2126_v3   ;;  %v2123_v30 = vphi %v2121_v30, %v2122_v30  }
 0x535   : >> { %894 = vrot.lane.b32.xlu0 %v2391_v23, %s2157_s30  ;;  %s882_s17 = sshra.s32 %s1618_s16, 3  ;;  %v915_v8 = vstv %s1618_s16  ;;  %s875_s20 = sadd.s32 1, %s2135_s20  }
 0x536   : >> { %s1619_s29 = sshll.u32 %s882_s17, 2  ;;  %v916_v9 = vadd.s32 %v915_v8, %v2357_v34  ;;  %p874_p0 = scmp.ge.s32.totalorder %s875_s20, 1 }
 0x537   : >> { %s1461_s22 = scalar_lea.vmem [#allocation2], %s1619_s29  ;;  %s1464_s27 = scalar_lea.vmem [#allocation3], %s1619_s29  ;;  %vm977_vm7 = vcmask (%p874_p0), 785920   ;;  %v2137_v50 = vmov (%p874_p0), 0.0   ;;  %v2141_v51 = vmov (%p874_p0), 0.0  }
 0x538   : >> { %v1620_v5 = vld [vmem:[%s1461_s22 + $0x8] sm:$0xf]  ;;  %vm917_vm15 = vcmp.ge.s32.totalorder %v2355_v33, %v916_v9  ;;  %v2145_v52 = vmov (%p874_p0), -1e+30   ;;  %s2426_s23 = smov (%p874_p0), 0  }
 0x539   : >> { %v900_v6 = vsel %vm549_vm0, %v1620_v5, 0  ;;  %v1622_v15 = vld [vmem:[%s1464_s27 + $0x8] sm:$0xf] }
 0x53a   : >> { %909 = vmatpush.bf16.xpose.msra.mxu0 %v900_v6  ;;  %v942_v16 = vsel %vm731_vm4, %v1622_v15, 0 }
 0x53b   : >> { %951 = vmatpush.bf16.msra.mxu1 %v942_v16 }
 0x5a7   : >> { %v895_v7 = vpop.permute.xlu0 %894 }
 0x5a8   : >> { %1623 = vmatmul.msk.bf16.vlgmr.msra.gmra.mxu0 %vm549_vm0, %v895_v7 }
 0x625   : >> { %v911_v10 = vpop.f32.mrf.mxu0 }
 0x626   : >> { %v918_v11 = vsel %vm917_vm15, %v911_v10, -1e+30 }
 0x627   : >> { %v920_v12 = vsel %vm710_vm3, %v918_v11, -inf }
 0x628   : >> { %921 = vmax.xlane.f32.xlu0 %v920_v12 }
 0x62d   : >> { %v913_v13 = vpop.f32.mrf.mxu0 }
 0x69b   : >> { %v922_v17 = vpop.xlane.xlu0 %921 }
 0x69c   : >> { %v923_v18 = vmax.f32 %v2131_v4, %v922_v17  }
 0x69e   : >> { %v924_v19 = vsub.f32 %v2131_v4, %v923_v18  ;;  %v927_v20 = vsub.f32 %v918_v11, %v923_v18  ;;  %v2130_v4 = vmov %v923_v18  }
 0x6a0   : >> { %v928_v21 = vmul.f32 1.442695, %v927_v20  ;;  %v925_v26 = vmul.f32 1.442695, %v924_v19 }
 0x6a2   : >> { %1918 = vpow2.f32 %v928_v21 }
 0x6a3   : >> { %1920 = vpow2.f32 %v925_v26 }
 0x6a8   : >> { %v1919_v22 = vpop.eup %1918 }
 0x6a9   : >> { %v931_v24 = vsel %vm710_vm3, %v1919_v22, 0.0  ;;  %v936_v25 = vpack.c.bf16 %v1919_v22, %v1919_v22  ;;  %v1921_v27 = vpop.eup %1920 }
 0x6aa   : >> { %932 = vadd.xlane.f32.xlu1 %v931_v24  ;;  %v930_v28 = vmul.f32 %v2127_v3, %v1921_v27  ;;  %v935_v32 = vmul.f32 %v2123_v30, %v1921_v27 }
 0x6ab   : >> { %1624 = vmatmul.msk.bf16.vlgmr.msra.gmra.mxu1 %vm710_vm3, %v936_v25 }
 0x71d   : >> { %v933_v29 = vpop.xlane.xlu1 %932 }
 0x71e   : >> { %v934_v31 = vadd.f32 %v933_v29, %v930_v28  }
 0x720   : >> { %v2126_v3 = vmov %v934_v31   ;;  %1922 = vrcp.f32 (%p874_p0), %v934_v31  ;;  %v969_v40 = vand.u32 (%p874_p0), 2147483648, %v934_v31  ;;  %vm963_vm1 = vweird.f32 (%p874_p0), %v934_v31 }
 0x721   : > { %v967_v42 = vand.u32 (%p874_p0), 2147483647, %v934_v31 }
 0x722   : > { %v970_v44 = vor.u32 (%p874_p0), 1.1754944e-38, %v969_v40 }
 0x723   : > { %vm968_vm6 = vcmp.eq.f32.partialorder (%p874_p0), %v967_v42, 8.507059e+37 }
 0x726   : > { %v1923_v38 = vpop.eup (%p874_p0), %1922 }
 0x727   : > { %v959_v39 = vmul.f32 (%p874_p0), %v1923_v38, %v934_v31  ;;  %vm964_vm2 = vweird.f32 (%p874_p0), %v1923_v38 }
 0x728   : >> { %v953_v35 = vpop.f32.mrf.mxu1  ;;  %vm965_vm5 = vmor (%p874_p0), %vm963_vm1, %vm964_vm2 }
 0x729   : >> { %v957_v36 = vadd.f32 %v953_v35, %v935_v32   ;;  %v960_v41 = vsub.f32 (%p874_p0), 1.0, %v959_v39 }
 0x72b   : >> { %v2122_v30 = vmov %v957_v36   ;;  %v961_v43 = vmul.f32 (%p874_p0), %v1923_v38, %v960_v41 }
 0x72c   : > { %877 = sbr.rel (!%p874_p0) target bundleno = 1332 (0x534), region = 181 }
 0x72d   : > { %v962_v45 = vadd.f32 (%p874_p0), %v1923_v38, %v961_v43 }
 0x72f   : > { %v966_v46 = vsel (%p874_p0), %vm965_vm5, %v1923_v38, %v962_v45 }
 0x730   : >> { %v955_v37 = vpop.f32.mrf.mxu1  ;;  %v971_v47 = vsel (%p874_p0), %vm968_vm6, %v970_v44, %v966_v46 }
 0x731   : > { %v972_v48 = vmul.f32 %v971_v47, %v957_v36 }
 0x733   : > { %974 = vrot.lane.b32.xlu0 %v972_v48, %s2155_s24 }
 0x7a5   : > { %v975_v49 = vpop.permute.xlu0 %974 }
 0x7a6   : > { %978 = vst.msk [vmem:[#allocation4] sm:$0xff] %vm977_vm7, %v975_v49 }
 0x7a7 LB: >> { %s2158_s20 = smov 32   ;;  %s1625_s24 = sshll.u32 %s2151_s23, 3  ;;  %s2151_s23 = sphi %s2426_s23, %s982_s23   ;;  %v2147_v52 = vphi %v2145_v52, %v2146_v52   ;;  %v2143_v51 = vphi %v2141_v51, %v2142_v51   ;;  %v2139_v50 = vphi %v2137_v50, %v2138_v50  }
 0x7a8   : >> { %1001 = vrot.lane.b32.xlu0 %v2391_v23, %s2158_s20  ;;  %s989_s30 = sshra.s32 %s1625_s24, 3  ;;  %v1022_v56 = vstv %s1625_s24  ;;  %s982_s23 = sadd.s32 1, %s2151_s23  }
 0x7a9   : >> { %s1626_s16 = sshll.u32 %s989_s30, 2  ;;  %v1023_v57 = vadd.s32 %v1022_v56, %v2357_v34  ;;  %p981_p1 = scmp.ge.s32.totalorder %s982_s23, 1 }
 0x7aa   : >> { %s1467_s17 = scalar_lea.vmem [#allocation2], %s1626_s16  ;;  %s1470_s29 = scalar_lea.vmem [#allocation3], %s1626_s16  ;;  %v1708_v17 = vld [vmem:[%s2573_s5 + $0x38] sm:$0xff] (%p981_p1)  ;;  %v1707_v18 = vld [vmem:[%s2573_s5 + $0x30] sm:$0xff] (%p981_p1)  ;;  %v1706_v20 = vld [vmem:[%s2573_s5 + $0x28] sm:$0xff] (%p981_p1)  ;;  %vm1084_vm11 = vcmask (%p981_p1), 1048320  }
 0x7ab   : >> { %v1627_v53 = vld [vmem:[%s1467_s17 + $0xc] sm:$0xf]  ;;  %vm1024_vm8 = vcmp.ge.s32.totalorder %v2355_v33, %v1023_v57  ;;  %v1705_v34 = vld [vmem:[%s2573_s5 + $0x20] sm:$0xff] (%p981_p1)  ;;  %v1704_v27 = vld [vmem:[%s2573_s5 + $0x18] sm:$0xff] (%p981_p1)  ;;  %v2159_v46 = vmov (%p981_p1), 32.0   ;;  %vm1327_vm7 = vcmask (%p981_p1), 523264  }
 0x7ac   : >> { %v1007_v54 = vsel %vm549_vm0, %v1627_v53, 0  ;;  %v1629_v62 = vld [vmem:[%s1470_s29 + $0xc] sm:$0xf]  ;;  %v1703_v32 = vld [vmem:[%s2573_s5 + $0x10] sm:$0xff] (%p981_p1)  ;;  %v1701_v36 = vld [vmem:[%s2573_s5] sm:$0xff] (%p981_p1)  ;;  %s2603_s29 = sand.u32 (%p981_p1), 1, %s2071_s19  }
 0x7ad   : >> { %1016 = vmatpush.bf16.xpose.msra.mxu0 %v1007_v54  ;;  %v1049_v63 = vsel %vm731_vm4, %v1629_v62, 0  ;;  %v1702_v35 = vld [vmem:[%s2573_s5 + $0x8] sm:$0xff] (%p981_p1)  ;;  %v1928_v40 = vld [vmem:[%s2574_s6] ss:$0 sm:$0xff] (%p981_p1)  ;;  %s1379_s22 = scalar_lea.sflag (%p981_p1), [#allocation6], %s2603_s29 }
 0x7ae   : >> { %1058 = vmatpush.bf16.msra.mxu1 %v1049_v63  ;;  %v1710_v57 = vld [vmem:[%s2577_s9 + $0x8] sm:$0xff] (%p981_p1) }
 0x81a   : >> { %v1002_v55 = vpop.permute.xlu0 %1001 }
 0x81b   : >> { %1630 = vmatmul.msk.bf16.vlgmr.msra.gmra.mxu0 %vm549_vm0, %v1002_v55 }
 0x81c   : > { %1156 = vmatpush.bf16.msra.mxu0 (%p981_p1), %v1708_v17 }
 0x820   : > { %1157 = vmatpush.bf16.msra.mxu0 (%p981_p1), %v1707_v18  ;;  %v1714_v18 = vld [vmem:[%s2579_s11 + $0x18] sm:$0xff] (%p981_p1) }
 0x821   : > { %1335 = vmatpush.bf16.msra.mxu2 (%p981_p1), %v1714_v18  ;;  %v1934_v18 = vld [vmem:[%s2582_s14] ss:$0 sm:$0xff] (%p981_p1) }
 0x824   : > { %1158 = vmatpush.bf16.msra.mxu0 (%p981_p1), %v1706_v20 }
 0x828   : > { %1159 = vmatpush.bf16.msra.mxu0 (%p981_p1), %v1705_v34 }
 0x82c   : > { %1160 = vmatpush.bf16.msra.mxu0 (%p981_p1), %v1704_v27 }
 0x830   : > { %1161 = vmatpush.bf16.msra.mxu0 (%p981_p1), %v1703_v32 }
 0x834   : > { %1162 = vmatpush.bf16.msra.mxu0 (%p981_p1), %v1702_v35 }
 0x838   : > { %1163 = vmatpush.bf16.msra.mxu0 (%p981_p1), %v1701_v36 }
 0x898   : >> { %v1018_v58 = vpop.f32.mrf.mxu0 }
 0x899   : >> { %v1025_v59 = vsel %vm1024_vm8, %v1018_v58, -1e+30  ;;  %v1709_v58 = vld [vmem:[%s2577_s9] sm:$0xff] (%p981_p1) }
 0x89a   : >> { %v1027_v60 = vsel %vm710_vm3, %v1025_v59, -inf }
 0x89b   : >> { %1028 = vmax.xlane.f32.xlu0 %v1027_v60 }
 0x8a0   : >> { %v1020_v61 = vpop.f32.mrf.mxu0 }
 0x90e   : >> { %v1029_v0 = vpop.xlane.xlu0 %1028 }
 0x90f   : >> { %v1030_v1 = vmax.f32 %v2147_v52, %v1029_v0  }
 0x911   : >> { %v1031_v2 = vsub.f32 %v2147_v52, %v1030_v1  ;;  %v1034_v30 = vsub.f32 %v1025_v59, %v1030_v1  ;;  %v2146_v52 = vmov %v1030_v1  }
 0x913   : >> { %v1035_v3 = vmul.f32 1.442695, %v1034_v30  ;;  %v1032_v7 = vmul.f32 1.442695, %v1031_v2 }
 0x915   : >> { %1924 = vpow2.f32 %v1035_v3  ;;  %v1929_v3 = vld [vmem:[%s2575_s7] ss:$0 sm:$0xff] (%p981_p1) }
 0x916   : >> { %1926 = vpow2.f32 %v1032_v7 }
 0x91b   : >> { %v1925_v4 = vpop.eup %1924 }
 0x91c   : >> { %v1038_v5 = vsel %vm710_vm3, %v1925_v4, 0.0  ;;  %v1043_v6 = vpack.c.bf16 %v1925_v4, %v1925_v4  ;;  %v1927_v8 = vpop.eup %1926 }
 0x91d   : >> { %1039 = vadd.xlane.f32.xlu1 %v1038_v5  ;;  %v1037_v9 = vmul.f32 %v2143_v51, %v1927_v8  ;;  %v1042_v12 = vmul.f32 %v2139_v50, %v1927_v8 }
 0x91e   : >> { %1631 = vmatmul.msk.bf16.vlgmr.msra.gmra.mxu1 %vm710_vm3, %v1043_v6  ;;  %v1930_v6 = vld [vmem:[%s2576_s8] ss:$0 sm:$0xff] (%p981_p1) }
 0x91f   : > { %1239 = vmatpush.bf16.msra.mxu1 (%p981_p1), %v1710_v57 }
 0x923   : > { %1240 = vmatpush.bf16.msra.mxu1 (%p981_p1), %v1709_v58 }
 0x990   : >> { %v1040_v10 = vpop.xlane.xlu1 %1039 }
 0x991   : >> { %v1041_v11 = vadd.f32 %v1040_v10, %v1037_v9   ;;  %v1931_v10 = vld [vmem:[%s2578_s10] ss:$0 sm:$0xff] (%p981_p1) }
 0x993   : >> { %v2142_v51 = vmov %v1041_v11   ;;  %1935 = vrcp.f32 (%p981_p1), %v1041_v11  ;;  %v1076_v22 = vand.u32 (%p981_p1), 2147483648, %v1041_v11  ;;  %vm1070_vm9 = vweird.f32 (%p981_p1), %v1041_v11 }
 0x994   : > { %v1074_v33 = vand.u32 (%p981_p1), 2147483647, %v1041_v11  ;;  %1937 = vrcp.f32 (%p981_p1), %v2159_v46 }
 0x995   : > { %v1077_v25 = vor.u32 (%p981_p1), 1.1754944e-38, %v1076_v22 }
 0x996   : > { %vm1075_vm10 = vcmp.eq.f32.partialorder (%p981_p1), %v1074_v33, 8.507059e+37 }
 0x999   : > { %v1936_v19 = vpop.eup (%p981_p1), %1935 }
 0x99a   : > { %v1066_v21 = vmul.f32 (%p981_p1), %v1936_v19, %v1041_v11  ;;  %vm1071_vm3 = vweird.f32 (%p981_p1), %v1936_v19  ;;  %v1938_v47 = vpop.eup (%p981_p1), %1937 }
 0x99b   : >> { %v1060_v13 = vpop.f32.mrf.mxu1  ;;  %vm1072_vm4 = vmor (%p981_p1), %vm1070_vm9, %vm1071_vm3  ;;  %v1176_v48 = vmul.f32 (%p981_p1), 32.0, %v1938_v47  ;;  %vm1180_vm12 = vweird.f32 (%p981_p1), %v1938_v47 }
 0x99c   : >> { %v1064_v15 = vadd.f32 %v1060_v13, %v1042_v12   ;;  %v1067_v24 = vsub.f32 (%p981_p1), 1.0, %v1066_v21 }
 0x99d   : > { %v1177_v49 = vsub.f32 (%p981_p1), 1.0, %v1176_v48 }
 0x99e   : >> { %v2138_v50 = vmov %v1064_v15   ;;  %v1068_v23 = vmul.f32 (%p981_p1), %v1936_v19, %v1067_v24  ;;  %v1713_v24 = vld [vmem:[%s2579_s11 + $0x10] sm:$0xff] (%p981_p1) }
 0x99f   : > { %984 = sbr.rel (!%p981_p1) target bundleno = 1959 (0x7a7), region = 192  ;;  %v1178_v50 = vmul.f32 (%p981_p1), %v1938_v47, %v1177_v49  ;;  %1336 = vmatpush.bf16.msra.mxu2 (%p981_p1), %v1713_v24 }
 0x9a0   : > { %v1069_v26 = vadd.f32 (%p981_p1), %v1936_v19, %v1068_v23  ;;  %v1712_v23 = vld [vmem:[%s2579_s11 + $0x8] sm:$0xff] (%p981_p1) }
 0x9a1   : > { %v1179_v51 = vadd.f32 (%p981_p1), %v1938_v47, %v1178_v50 }
 0x9a2   : > { %v1073_v28 = vsel (%p981_p1), %vm1072_vm4, %v1936_v19, %v1069_v26 }
 0x9a3   : >> { %v1062_v16 = vpop.f32.mrf.mxu1  ;;  %v1078_v29 = vsel (%p981_p1), %vm1075_vm10, %v1077_v25, %v1073_v28  ;;  %v2474_v52 = vsel (%p981_p1), %vm1180_vm12, %v1938_v47, %v1179_v51  ;;  %1337 = vmatpush.bf16.msra.mxu2 (%p981_p1), %v1712_v23  ;;  %v1711_v28 = vld [vmem:[%s2579_s11] sm:$0xff] (%p981_p1) }
 0x9a4   : > { %v1079_v31 = vmul.f32 %v1078_v29, %v1064_v15 }
 0x9a6   : > { %1081 = vrot.lane.b32.xlu0 %v1079_v31, %s2154_s18  ;;  %s1692_s18 = sshll.u32 %s2079_s21, 3  ;;  %s1392_s21 = sshll.u32 %s507_s25, 4  ;;  %s1393_s21 = int_to_ptr.vmem [resolvable:$true] %s1392_s21 }
 0x9a7   : > { %1338 = vmatpush.bf16.msra.mxu2 %v1711_v28  ;;  %s1390_s30 = scalar_lea.hbm %s2583_s15, %s1692_s18 }
 0x9a8   : > { %s1394_s17 = sshll.u32 %s1390_s30, 4  ;;  %s1965_s30 = scalar_lea.hbm %s2583_s15, 16  ;;  %s1395_s17 = int_to_ptr.hbm [resolvable:$true] %s1394_s17 }
 0x9a9   : > { %s1959_s18 = sshra.s32 %s1395_s17, 4  ;;  %s1960_s18 = int_to_ptr.hbm [resolvable:$true] %s1959_s18 }
 0x9aa   : > { %s1961_s27 = scalar_lea.hbm %s1960_s18, 8  ;;  %p1966_p6 = scmp.lt.s32.totalorder %s1960_s18, %s2583_s15 }
 0x9ab   : > { %p1962_p2 = scmp.ne.s32.totalorder %s1960_s18, %s1961_s27  ;;  %p1967_p7 = scmp.lt.s32.totalorder %s1965_s30, %s1961_s27 }
 0x9ad   : > { %p1963_p3 = pnand %p1962_p2, %p2280_p4  ;;  %p1968_p9 = por %p1967_p7, %p1966_p6 }
 0x9af   : > { %p1964_p5 = pneg %p1963_p3 }
 0x9b1   : > { %p1969_p10 = pnand %p1968_p9, %p1964_p5 }
 0xa18   : > { %v1082_v37 = vpop.permute.xlu0 %1081 }
 0xa19   : > { %1085 = vst.msk [vmem:[#allocation4] sm:$0xff] %vm1084_vm11, %v1082_v37 }
 0xa20   : > { %v1086_v38 = vld [vmem:[#allocation4] sm:$0xff] }
 0xa21   : > { %v1087_v39 = vpack.c.bf16 %v1086_v38, %v1086_v38 }
 0xa23   : > { %1164 = vmatmul.bf16.vlgmr.msra.gmra.mxu0 %v1087_v39 }
 0xaa0   : > { %v1165_v41 = vpop.f32.mrf.mxu0 }
 0xaa1   : > { %v1166_v42 = vadd.f32 %v1928_v40, %v1165_v41 }
 0xaa3   : > { %v1169_v43 = vadd.f32 %v1166_v42, %v2335_v14 }
 0xaa5   : > { %v1172_v44 = vsel %vm549_vm0, %v1169_v43, 0.0 }
 0xaa6   : > { %1173 = vadd.xlane.f32.xlu0 %v1172_v44 }
 0xaa8   : > { %v1167_v45 = vpop.f32.mrf.mxu0 }
 0xb19   : > { %v1174_v53 = vpop.xlane.xlu0 %1173 }
 0xb1a   : > { %v1182_v54 = vmul.f32 %v2474_v52, %v1174_v53 }
 0xb1c   : > { %v1183_v55 = vsub.f32 %v1169_v43, %v1182_v54 }
 0xb1e   : > { %v1184_v56 = vmul.f32 %v1183_v55, %v1183_v55 }
 0xb20   : > { %v1185_v14 = vsel %vm549_vm0, %v1184_v56, 0.0 }
 0xb21   : > { %1186 = vadd.xlane.f32.xlu1 %v1185_v14 }
 0xb94   : > { %v1187_v59 = vpop.xlane.xlu1 %1186 }
 0xb95   : > { %v1188_v60 = vmul.f32 %v1187_v59, %v2474_v52 }
 0xb97   : > { %v1189_v61 = vadd.f32 1e-05, %v1188_v60  ;;  %v1932_v60 = vld [vmem:[%s2580_s12] ss:$0 sm:$0xff] }
 0xb99   : > { %1939 = vrsqrt.f32 %v1189_v61  ;;  %vm1196_vm14 = vweird.f32 %v1189_v61 }
 0xb9f   : > { %v1940_v62 = vpop.eup %1939 }
 0xba0   : > { %v1191_v63 = vmul.f32 %v1940_v62, %v1189_v61  ;;  %vm1197_vm13 = vweird.f32 %v1940_v62 }
 0xba1   : > { %vm1198_vm15 = vmor %vm1196_vm14, %vm1197_vm13 }
 0xba2   : > { %v1192_v0 = vmul.f32 %v1940_v62, %v1191_v63 }
 0xba4   : > { %v1193_v1 = vmul.f32 0.5, %v1192_v0 }
 0xba6   : > { %v1194_v2 = vsub.f32 1.5, %v1193_v1 }
 0xba8   : > { %v1195_v30 = vmul.f32 %v1940_v62, %v1194_v2 }
 0xbaa   : > { %v1199_v4 = vsel %vm1198_vm15, %v1940_v62, %v1195_v30 }
 0xbab   : > { %v1200_v5 = vmul.f32 %v1199_v4, %v1183_v55 }
 0xbad   : > { %v1204_v7 = vmul.f32 %v1929_v3, %v1200_v5 }
 0xbaf   : > { %v2491_v8 = vadd.f32 %v1930_v6, %v1204_v7 }
 0xbb1   : > { %v1209_v9 = vpack.c.bf16 %v2491_v8, %v2491_v8 }
 0xbb3   : > { %1672 = vmatmul.msk.bf16.vlgmr.msra.gmra.mxu1 %vm549_vm0, %v1209_v9 }
 0xc30   : > { %v1242_v11 = vpop.f32.mrf.mxu1 }
 0xc31   : > { %v1243_v12 = vadd.f32 %v1931_v10, %v1242_v11 }
 0xc33   : > { %v1247_v13 = vmul.f32 0.70710677, %v1243_v12  ;;  %v1246_v14 = vmul.f32 0.5, %v1243_v12 }
 0xc35   : > { %v1248_v15 = vmul.f32 %v1247_v13, %v1247_v13 }
 0xc37   : > { %v1249_v16 = vmin.f32 %v1248_v15, 16.0 }
 0xc38   : > { %v1244_v17 = vpop.f32.mrf.mxu1 }
 0xc39   : > { %v1250_v19 = vmul.f32 2.1237322e-06, %v1249_v16  ;;  %v1261_v20 = vmul.f32 3.8918573e-05, %v1249_v16 }
 0xc3b   : > { %v1251_v21 = vadd.f32 0.00028619796, %v1250_v19  ;;  %v1262_v22 = vadd.f32 0.001143296, %v1261_v20 }
 0xc3d   : > { %v1252_v33 = vmul.f32 %v1251_v21, %v1249_v16  ;;  %v1263_v34 = vmul.f32 %v1262_v22, %v1249_v16 }
 0xc3f   : > { %v1264_v25 = vadd.f32 0.014752088, %v1263_v34  ;;  %v1253_v26 = vadd.f32 0.0036580483, %v1252_v33 }
 0xc41   : > { %v1265_v27 = vmul.f32 %v1264_v25, %v1249_v16  ;;  %v1254_v31 = vmul.f32 %v1253_v26, %v1249_v16 }
 0xc43   : > { %v1266_v29 = vadd.f32 0.112945676, %v1265_v27  ;;  %v1255_v36 = vadd.f32 0.05243302, %v1254_v31 }
 0xc45   : > { %v1267_v32 = vmul.f32 %v1266_v29, %v1249_v16  ;;  %v1256_v39 = vmul.f32 %v1255_v36, %v1249_v16 }
 0xc47   : > { %v1268_v35 = vadd.f32 0.4994258, %v1267_v32  ;;  %v1257_v40 = vadd.f32 0.18741608, %v1256_v39 }
 0xc49   : > { %v1269_v37 = vmul.f32 %v1268_v35, %v1249_v16  ;;  %v1258_v42 = vmul.f32 %v1257_v40, %v1249_v16  ;;  %v1933_v16 = vld [vmem:[%s2581_s13] ss:$0 sm:$0xff] }
 0xc4b   : > { %v1270_v38 = vadd.f32 1.0, %v1269_v37  ;;  %v1259_v46 = vadd.f32 1.1283791, %v1258_v42 }
 0xc4d   : > { %1941 = vrcp.f32 %v1270_v38  ;;  %v1282_v45 = vand.u32 2147483648, %v1270_v38  ;;  %v1280_v48 = vand.u32 2147483647, %v1270_v38  ;;  %vm1276_vm2 = vweird.f32 %v1270_v38 }
 0xc4e   : > { %v1260_v51 = vmul.f32 %v1259_v46, %v1247_v13 }
 0xc4f   : > { %v1283_v50 = vor.u32 1.1754944e-38, %v1282_v45  ;;  %vm1281_vm6 = vcmp.eq.f32.partialorder %v1280_v48, 8.507059e+37 }
 0xc53   : > { %v1942_v41 = vpop.eup %1941 }
 0xc54   : > { %v1272_v43 = vmul.f32 %v1942_v41, %v1270_v38  ;;  %vm1277_vm1 = vweird.f32 %v1942_v41 }
 0xc55   : > { %vm1278_vm5 = vmor %vm1276_vm2, %vm1277_vm1 }
 0xc56   : > { %v1273_v44 = vsub.f32 1.0, %v1272_v43 }
 0xc58   : > { %v1274_v47 = vmul.f32 %v1942_v41, %v1273_v44 }
 0xc5a   : > { %v1275_v49 = vadd.f32 %v1942_v41, %v1274_v47 }
 0xc5c   : > { %v1279_v53 = vsel %vm1278_vm5, %v1942_v41, %v1275_v49 }
 0xc5d   : > { %v1284_v54 = vsel %vm1281_vm6, %v1283_v50, %v1279_v53 }
 0xc5e   : > { %v1285_v55 = vmul.f32 %v1284_v54, %v1260_v51 }
 0xc60   : > { %v1673_v56 = vclamps-f32 %v1285_v55, 1.0 }
 0xc62   : > { %v1288_v57 = vadd.f32 1.0, %v1673_v56 }
 0xc64   : > { %v1289_v58 = vmul.f32 %v1288_v57, %v1246_v14 }
 0xc66   : > { %v1290_v59 = vpack.c.bf16 %v1289_v58, %v1289_v58 }
 0xc68   : > { %1690 = vmatmul.msk.bf16.vlgmr.msra.gmra.mxu2 %vm1327_vm7, %v1290_v59 }
 0xceb   : > { %v1340_v61 = vpop.f32.mrf.mxu2 }
 0xcec   : > { %v1341_v62 = vadd.f32 %v1932_v60, %v1340_v61 }
 0xcee   : > { %v1344_v63 = vadd.f32 %v1341_v62, %v2491_v8 }
 0xcf0   : > { %v1347_v0 = vsel %vm549_vm0, %v1344_v63, 0.0 }
 0xcf1   : > { %1348 = vadd.xlane.f32.xlu1 %v1347_v0 }
 0xcf3   : > { %v1342_v1 = vpop.f32.mrf.mxu2 }
 0xd64   : > { %v1349_v2 = vpop.xlane.xlu1 %1348 }
 0xd65   : > { %v1350_v30 = vmul.f32 %v1349_v2, %v2474_v52 }
 0xd67   : > { %v1351_v3 = vsub.f32 %v1344_v63, %v1350_v30 }
 0xd69   : > { %v1352_v4 = vmul.f32 %v1351_v3, %v1351_v3 }
 0xd6b   : > { %v1353_v5 = vsel %vm549_vm0, %v1352_v4, 0.0 }
 0xd6c   : > { %1354 = vadd.xlane.f32.xlu2 %v1353_v5 }
 0xddf   : > { %v1355_v6 = vpop.xlane.xlu2 %1354 }
 0xde0   : > { %v1356_v7 = vmul.f32 %v1355_v6, %v2474_v52 }
 0xde2   : > { %v1357_v9 = vadd.f32 1e-05, %v1356_v7 }
 0xde4   : > { %1943 = vrsqrt.f32 %v1357_v9  ;;  %vm1364_vm9 = vweird.f32 %v1357_v9 }
 0xdea   : > { %v1944_v8 = vpop.eup %1943 }
 0xdeb   : > { %v1359_v10 = vmul.f32 %v1944_v8, %v1357_v9  ;;  %vm1365_vm8 = vweird.f32 %v1944_v8 }
 0xdec   : > { %vm1366_vm3 = vmor %vm1364_vm9, %vm1365_vm8 }
 0xded   : > { %v1360_v11 = vmul.f32 %v1944_v8, %v1359_v10 }
 0xdef   : > { %v1361_v12 = vmul.f32 0.5, %v1360_v11 }
 0xdf1   : > { %v1362_v13 = vsub.f32 1.5, %v1361_v12 }
 0xdf3   : > { %v1363_v15 = vmul.f32 %v1944_v8, %v1362_v13 }
 0xdf5   : > { %v1367_v52 = vsel %vm1366_vm3, %v1944_v8, %v1363_v15 }
 0xdf6   : > { %v1368_v17 = vmul.f32 %v1367_v52, %v1351_v3 }
 0xdf8   : > { %v1372_v19 = vmul.f32 %v1933_v16, %v1368_v17 }
 0xdfa   : > { %v1376_v20 = vadd.f32 %v1934_v18, %v1372_v19 }
 0xdfc   : > { %1377 = vst.msk [vmem:[%s507_s25] sm:$0xff] %vm549_vm0, %v1376_v20 }
 0xdfd   : > { %1972 = shalt.err (!%p1969_p10)
}
 0xdfe   : > { %1715 = dma.vmem_to_hbm [thread:$0]  (%p2280_p4), %s1393_s21, 128, %s1395_s17, %s1379_s22  }
 0xdff PF: > { %s2604_s26 = sld [smem:[#allocation11_spill]] }
 0xe00   : > { %s2605_s25 = sld [smem:[#allocation8_spill]] }
 0xe05   : > { %p1721_p11 = scmp.ge.s32.totalorder %s2604_s26, 2 }
 0xe06   : > { %s1406_s0 = sand.u32 1, %s2605_s25  }
 0xe07   : > { %p1718_p12 = pnand %p1721_p11, %p2287_p8  ;;  %s1407_s20 = scalar_lea.sflag [#allocation6], %s1406_s0 }
 0xe09   : > { %p1719_p13 = pneg %p1718_p12 }
 0xe0b   : > { %2062 = dma.done.wait (%p1719_p13), %s1407_s20, 128  }
 0xe0c   : > { %2064 = vsyncadd (%p1719_p13), %s1407_s20, 4294967168  ;;  %s28_s23 = sadd.s32 1, %s2604_s26   ;;  %s2607_s27 = sld [smem:[#allocation9_spill]] }
 0xe0d   : > { %p25_p0 = scmp.ge.s32.totalorder %s28_s23, 4   ;;  %s2608_s20 = sld [smem:[#allocation14_spill]] }
 0xe0e   : > { %s2609_s21 = sld [smem:[#allocation10_spill]]  ;;  %s2611_s18 = smov %s2071_s19 }
 0xe0f   : > { %s2610_s22 = sld [smem:[#allocation12_spill]]  ;;  %27 = sbr.rel (!%p25_p0) target bundleno = 6 (0x6), region = 203 }
 0xe12   : > { %s2612_s19 = smov %s2607_s27 }
 0xe14   :  { %1413 = vsyncpa [#allocation6], 1 }
 0xe15   :  { %1415 = vsyncpa [#allocation6 + $0x1], 1 }

// kernel: tpu_custom_call.1
= control target key start
LH: loop header
LB: loop body
LE: loop exit
PB: predicated region body
PF: predicated region fallthrough
CT: control target
= control target key end

     0   :  { %s2568_s0 = inlined_call_operand.vmem [shape: f32[2,8,32], index: 0, kind: input, shape index: {}]   ;;  %s2569_s1 = inlined_call_operand.vmem [shape: bf16[32,128], index: 1, kind: input, shape index: {}]   ;;  %s2570_s2 = inlined_call_operand.vmem [shape: f32[1,128], index: 2, kind: input, shape index: {}]   ;;  %s2571_s3 = inlined_call_operand.vmem [shape: bf16[32,256], index: 3, kind: input, shape index: {}]   ;;  %s2572_s4 = inlined_call_operand.vmem [shape: f32[1,256], index: 4, kind: input, shape index: {}]   ;;  %s2573_s5 = inlined_call_operand.vmem [shape: bf16[128,32], index: 5, kind: input, shape index: {}]   ;;  %s2574_s6 = inlined_call_operand.vmem [shape: f32[1,32], index: 6, kind: input, shape index: {}]   ;;  %s2575_s7 = inlined_call_operand.vmem [shape: f32[1,32], index: 7, kind: input, shape index: {}]   ;;  %s2576_s8 = inlined_call_operand.vmem [shape: f32[1,32], index: 8, kind: input, shape index: {}]   ;;  %s2577_s9 = inlined_call_operand.vmem [shape: bf16[32,64], index: 9, kind: input, shape index: {}]   ;;  %s2578_s10 = inlined_call_operand.vmem [shape: f32[1,64], index: 10, kind: input, shape index: {}]   ;;  %s2579_s11 = inlined_call_operand.vmem [shape: bf16[64,32], index: 11, kind: input, shape index: {}]   ;;  %s2580_s12 = inlined_call_operand.vmem [shape: f32[1,32], index: 12, kind: input, shape index: {}]   ;;  %s2581_s13 = inlined_call_operand.vmem [shape: f32[1,32], index: 13, kind: input, shape index: {}]   ;;  %s2582_s14 = inlined_call_operand.vmem [shape: f32[1,32], index: 14, kind: input, shape index: {}]   ;;  %s2583_s15 = inlined_call_operand.hbm [shape: f32[2,8,32], index: 15, kind: output, shape index: {}]  }
   0x1   :  { %2592 = sst [smem:[#allocation15_spill]] %s2568_s0 }
   0x2   :  { %20 = vsyncpa [#allocation6], 0 }
   0x3   :  { %22 = vsyncpa [#allocation6 + $0x1], 0  ;;  %s2240_s18 = smov 0   ;;  %s2242_s19 = smov 0  }
   0x4   :  { %s2244_s20 = smov 0   ;;  %s2246_s21 = smov 0  }
   0x5   :  { %s2248_s22 = smov 0   ;;  %s2250_s23 = smov 0  }
   0x6 LB: > { %2593 = sst [smem:[#allocation8_spill]] %s2067_s18  ;;  %s1566_s24 = sadd.s32 4294967295, %s2087_s23   ;;  %s2087_s23 = sphi %s2250_s23, %s28_s23   ;;  %s2083_s22 = sphi %s2248_s22, %s2610_s22   ;;  %s2079_s21 = sphi %s2246_s21, %s2609_s21   ;;  %s2075_s20 = sphi %s2244_s20, %s2608_s20   ;;  %s2071_s19 = sphi %s2242_s19, %s2612_s19   ;;  %s2067_s18 = sphi %s2240_s18, %s2611_s18  }
   0x7   : > { %2594 = sst [smem:[#allocation9_spill]] %s2075_s20  ;;  %s1567_s25 = sadd.s32 4294967294, %s2087_s23  }
   0x8   : > { %2595 = sst [smem:[#allocation10_spill]] %s2083_s22  ;;  %s40_s26 = sadd.s32 1, %s2083_s22 }
   0x9   : > { %2596 = sst [smem:[#allocation11_spill]] %s2087_s23  ;;  %s371_s27 = sadd.s32 1, %s2075_s20 }
   0xa   : > { %p42_p0 = scmp.ge.s32.totalorder %s40_s26, 2  ;;  %p381_p1 = scmp.ne.s32.totalorder %s2075_s20, %s2071_s19 }
   0xb   : > { %p382_p2 = scmp.eq.s32.totalorder %s1566_s24, 1  ;;  %p387_p3 = scmp.ne.s32.totalorder %s2071_s19, %s2067_s18 }
   0xc   : > { %s2614_s26 = smov (%p42_p0, %s40_s26), 0  ;;  %p388_p5 = scmp.eq.s32.totalorder %s1567_s25, 1 }
   0xd   : > { %2597 = sst [smem:[#allocation12_spill]] %s2614_s26  ;;  %p2280_p4 = por %p382_p2, %p381_p1 }
   0xe   : > { %s366_s29 = ssub.s32 %s2083_s22, %s2614_s26  ;;  %p1570_p6 = scmp.ge.s32.totalorder %s2087_s23, 1 }
   0xf   : > { %p369_p7 = scmp.eq.s32.totalorder %s366_s29, 0  ;;  %p2287_p8 = por %p388_p5, %p387_p3 }
  0x10   : > { %p458_p9 = scmp.lt.s32.totalorder %s2087_s23, 3 }
  0x11   : > { %s2599_s30 = scalar_select %p2287_p8, 1, 0 }
  0x12   : > { %s2293_s16 = scalar_select %p369_p7, %s2075_s20, %s371_s27  }
  0x13   : > { %2600 = sst [smem:[#allocation13_spill]] %s2599_s30  ;;  %p459_p10 = pnand %p1570_p6, %p458_p9 }
  0x14   : > { %2601 = sst [smem:[#allocation14_spill]] %s2293_s16  ;;  %s2588_s17 = sand.u32 (!%p459_p10), 1, %s2071_s19  }
  0x15   : > { %462 = sbr.rel (%p459_p10) target bundleno = 3583 (0xdff), region = 80  ;;  %p508_p11 = scmp.lt.s32.totalorder (!%p459_p10), %s2079_s21, 1 }
  0x16   : > { %s2305_s26 = sshll.u32 (!%p459_p10), %s2588_s17, 3  ;;  %s2602_s0 = sld [smem:[#allocation15_spill]] (!%p459_p10) }
  0x17   : > { %s2153_s16 = smov (!%p459_p10), 32   ;;  %s2155_s24 = smov (!%p459_p10), 64  }
  0x18   : > { %s507_s25 = scalar_lea.vmem (!%p459_p10), [#allocation5], %s2305_s26 }
  0x1a   : > { %v1583_v0 = vld [vmem:[%s2571_s3 + $0x10] sm:$0xf]  ;;  %v1698_v1 = vld [vmem:[%s2571_s3 + $0x14] sm:$0xf0]  ;;  %v1697_v3 = vld [vmem:[%s2571_s3 + $0x14] sm:$0xf]  ;;  %v663_v32 = vlaneseq }
  0x1b   : > { %v1584_v2 = vor.u32 %v1698_v1, %v1583_v0  ;;  %v1585_v4 = vld [vmem:[%s2571_s3 + $0x18] sm:$0xf0]  ;;  %v1575_v6 = vld [vmem:[%s2571_s3] sm:$0xf]  ;;  %v1696_v7 = vld [vmem:[%s2571_s3 + $0x4] sm:$0xf0] }
  0x1c   : > { %v1588_v5 = vor.u32 %v1697_v3, %v1585_v4  ;;  %v1700_v8 = vld [vmem:[%s2569_s1 + $0x8] sm:$0xff]  ;;  %v1576_v9 = vor.u32 %v1696_v7, %v1575_v6  ;;  %v1695_v10 = vld [vmem:[%s2571_s3 + $0x4] sm:$0xf]  ;;  %s509_s18 = scalar_select %p508_p11, %s2079_s21, 1  ;;  %vm549_vm0 = vcmask 261120   ;;  %vm584_vm1 = vcmask 257024  }
  0x1d   : > { %559 = vmatpush.bf16.msra.mxu0 %v1584_v2  ;;  %v1577_v11 = vld [vmem:[%s2571_s3 + $0x8] sm:$0xf0]  ;;  %655 = vmatpush.bf16.msra.mxu2 %v1700_v8  ;;  %v1699_v13 = vld [vmem:[%s2569_s1] sm:$0xff]  ;;  %v2355_v33 = vshrl.u32 %v663_v32, 7  ;;  %v2357_v34 = vand.u32 127, %v663_v32  ;;  %v2089_v41 = vmov 0.0  }
  0x1e   : > { %572 = vmatpush.bf16.msra.mxu1 %v1588_v5  ;;  %v1580_v12 = vor.u32 %v1695_v10, %v1577_v11  ;;  %s1572_s30 = sshll.u32 %s509_s18, 3  ;;  %v523_v16 = vld [vmem:[%s2572_s4] sm:$0x3]  ;;  %s2154_s18 = smov 96   ;;  %v2093_v42 = vmov 0.0  }
  0x1f   : > { %s514_s23 = scalar_lea.vmem %s2602_s0, %s1572_s30  ;;  %v525_v17 = vperm.slane %v523_v16, 0  ;;  %v526_v18 = vperm.slane %v523_v16, 1  ;;  %v1905_v24 = vld [vmem:[%s2570_s2] ss:$0 sm:$0xff]  ;;  %v2097_v43 = vmov -1e+30  }
  0x20   : > { %v2335_v14 = vld [vmem:[%s514_s23] sm:$0xff]  ;;  %s2366_s30 = smov 0  }
  0x21   : > { %560 = vmatpush.bf16.msra.mxu0 %v1576_v9  ;;  %v517_v15 = vpack.c.bf16 %v2335_v14, %v2335_v14  ;;  %656 = vmatpush.bf16.msra.mxu2 %v1699_v13 }
  0x22   : > { %573 = vmatpush.bf16.msra.mxu1 %v1580_v12 }
  0x24   : > { %1589 = vmatmul.msk.bf16.vlgmr.msra.gmra.mxu0 %vm549_vm0, %v517_v15  ;;  %1605 = vmatmul.msk.bf16.vlgmr.msra.gmra.mxu2 %vm549_vm0, %v517_v15 }
  0x25   : > { %1590 = vmatmul.msk.bf16.vlgmr.msra.gmra.mxu1 %vm549_vm0, %v517_v15 }
  0xa1   : > { %v562_v19 = vpop.f32.mrf.mxu0 }
  0xa2   : > { %v563_v20 = vadd.f32 %v562_v19, %v525_v17  ;;  %v575_v21 = vpop.f32.mrf.mxu1 }
  0xa3   : > { %v576_v22 = vadd.f32 %v575_v21, %v526_v18 }
  0xa5   : > { %v579_v23 = vpack.c.bf16 %v576_v22, %v563_v20 }
  0xa7   : > { %585 = vst.msk [vmem:[#allocation2] sm:$0xf] %vm584_vm1, %v579_v23  ;;  %v587_v25 = vrot.slane %v579_v23, 4  ;;  %616 = vrot.lane.b32.xlu1 %v579_v23, %s2153_s16  ;;  %592 = vrot.lane.b32.xlu0 %v579_v23, %s2154_s18  ;;  %v658_v26 = vpop.f32.mrf.mxu2 }
  0xa8   : > { %v659_v28 = vadd.f32 %v1905_v24, %v658_v26 }
  0xa9   : > { %591 = vst.msk [vmem:[#allocation3] sm:$0xf] %vm584_vm1, %v587_v25  ;;  %v564_v27 = vpop.f32.mrf.mxu0 }
  0xaa   : > { %v577_v29 = vpop.f32.mrf.mxu1  ;;  %v2352_v30 = vpack.c.bf16 %v659_v28, %v659_v28 }
  0xaf   : > { %604 = vrot.lane.b32.xlu0 %v579_v23, %s2155_s24  ;;  %v660_v31 = vpop.f32.mrf.mxu2 }
 0x119   : > { %v617_v35 = vpop.permute.xlu1 %616  ;;  %v593_v36 = vpop.permute.xlu0 %592 }
 0x11a   : > { %1595 = vst.msk [vmem:[#allocation2 + $0xc] sm:$0xf] %vm584_vm1, %v617_v35  ;;  %v623_v37 = vrot.slane %v617_v35, 4  ;;  %v599_v38 = vrot.slane %v593_v36, 4 }
 0x11b   : > { %1591 = vst.msk [vmem:[#allocation2 + $0x4] sm:$0xf] %vm584_vm1, %v593_v36 }
 0x11c   : > { %1596 = vst.msk [vmem:[#allocation3 + $0xc] sm:$0xf] %vm584_vm1, %v623_v37 }
 0x11d   : > { %1592 = vst.msk [vmem:[#allocation3 + $0x4] sm:$0xf] %vm584_vm1, %v599_v38 }
 0x121   : > { %v605_v39 = vpop.permute.xlu0 %604 }
 0x122   : > { %1593 = vst.msk [vmem:[#allocation2 + $0x8] sm:$0xf] %vm584_vm1, %v605_v39  ;;  %v611_v40 = vrot.slane %v605_v39, 4 }
 0x124   : > { %1594 = vst.msk [vmem:[#allocation3 + $0x8] sm:$0xf] %vm584_vm1, %v611_v40 }
 0x125 LB: >> { %s1606_s17 = sshll.u32 %s2103_s30, 3  ;;  %vm710_vm3 = vcmask 64512   ;;  %vm731_vm4 = vcmask 1043456   ;;  %s672_s30 = sadd.s32 1, %s2103_s30   ;;  %s2103_s30 = sphi %s2366_s30, %s672_s30   ;;  %v2099_v43 = vphi %v2097_v43, %v2098_v43   ;;  %v2095_v42 = vphi %v2093_v42, %v2094_v42   ;;  %v2091_v41 = vphi %v2089_v41, %v2090_v41  }
 0x126   : >> { %s679_s29 = sshra.s32 %s1606_s17, 3  ;;  %v706_v46 = vstv %s1606_s17  ;;  %p671_p12 = scmp.ge.s32.totalorder %s672_s30, 1 }
 0x127   : >> { %s1607_s22 = sshll.u32 %s679_s29, 2  ;;  %v707_v47 = vadd.s32 %v706_v46, %v2357_v34  ;;  %v2105_v19 = vmov (%p671_p12), 0.0   ;;  %v2109_v20 = vmov (%p671_p12), 0.0   ;;  %v2113_v21 = vmov (%p671_p12), -1e+30   ;;  %s2385_s20 = smov (%p671_p12), 0  }
 0x128   : >> { %s682_s27 = scalar_lea.vmem [#allocation2], %s1607_s22  ;;  %s685_s23 = scalar_lea.vmem [#allocation3], %s1607_s22 }
 0x129   : >> { %v683_v44 = vld [vmem:[%s682_s27] sm:$0xf]  ;;  %vm708_vm2 = vcmp.ge.s32.totalorder %v2355_v33, %v707_v47 }
 0x12a   : >> { %v691_v45 = vsel %vm549_vm0, %v683_v44, 0 }
 0x12b   : >> { %700 = vmatpush.bf16.xpose.msra.mxu0 %v691_v45  ;;  %v686_v52 = vld [vmem:[%s685_s23] sm:$0xf] }
 0x12c   : >> { %v733_v53 = vsel %vm731_vm4, %v686_v52, 0 }
 0x12d   : >> { %742 = vmatpush.bf16.msra.mxu1 %v733_v53 }
 0x132   : >> { %1609 = vmatmul.msk.bf16.vlgmr.msra.gmra.mxu0 %vm549_vm0, %v2352_v30 }
 0x1af   : >> { %v702_v48 = vpop.f32.mrf.mxu0 }
 0x1b0   : >> { %v709_v49 = vsel %vm708_vm2, %v702_v48, -1e+30 }
 0x1b1   : >> { %v711_v50 = vsel %vm710_vm3, %v709_v49, -inf }
 0x1b2   : >> { %712 = vmax.xlane.f32.xlu0 %v711_v50 }
 0x1b7   : >> { %v704_v51 = vpop.f32.mrf.mxu0 }
 0x225   : >> { %v713_v54 = vpop.xlane.xlu0 %712 }
 0x226   : >> { %v714_v55 = vmax.f32 %v2099_v43, %v713_v54  }
 0x228   : >> { %v715_v56 = vsub.f32 %v2099_v43, %v714_v55  ;;  %v718_v57 = vsub.f32 %v709_v49, %v714_v55  ;;  %v2098_v43 = vmov %v714_v55  }
 0x22a   : >> { %v719_v58 = vmul.f32 1.442695, %v718_v57  ;;  %v716_v62 = vmul.f32 1.442695, %v715_v56 }
 0x22c   : >> { %1906 = vpow2.f32 %v719_v58 }
 0x22d   : >> { %1908 = vpow2.f32 %v716_v62 }
 0x232   : >> { %v1907_v59 = vpop.eup %1906 }
 0x233   : >> { %v722_v60 = vsel %vm710_vm3, %v1907_v59, 0.0  ;;  %v727_v61 = vpack.c.bf16 %v1907_v59, %v1907_v59  ;;  %v1909_v63 = vpop.eup %1908 }
 0x234   : >> { %723 = vadd.xlane.f32.xlu0 %v722_v60  ;;  %v721_v0 = vmul.f32 %v2095_v42, %v1909_v63  ;;  %v726_v3 = vmul.f32 %v2091_v41, %v1909_v63 }
 0x235   : >> { %1610 = vmatmul.msk.bf16.vlgmr.msra.gmra.mxu1 %vm710_vm3, %v727_v61 }
 0x2a7   : >> { %v724_v1 = vpop.xlane.xlu0 %723 }
 0x2a8   : >> { %v725_v2 = vadd.f32 %v724_v1, %v721_v0  }
 0x2aa   : >> { %v2094_v42 = vmov %v725_v2   ;;  %1910 = vrcp.f32 (%p671_p12), %v725_v2  ;;  %v760_v9 = vand.u32 (%p671_p12), 2147483648, %v725_v2  ;;  %vm754_vm5 = vweird.f32 (%p671_p12), %v725_v2 }
 0x2ab   : > { %v758_v11 = vand.u32 (%p671_p12), 2147483647, %v725_v2 }
 0x2ac   : > { %v761_v13 = vor.u32 (%p671_p12), 1.1754944e-38, %v760_v9 }
 0x2ad   : > { %vm759_vm8 = vcmp.eq.f32.partialorder (%p671_p12), %v758_v11, 8.507059e+37 }
 0x2b0   : > { %v1911_v7 = vpop.eup (%p671_p12), %1910 }
 0x2b1   : > { %v750_v8 = vmul.f32 (%p671_p12), %v1911_v7, %v725_v2  ;;  %vm755_vm6 = vweird.f32 (%p671_p12), %v1911_v7 }
 0x2b2   : >> { %v744_v4 = vpop.f32.mrf.mxu1  ;;  %vm756_vm7 = vmor (%p671_p12), %vm754_vm5, %vm755_vm6 }
 0x2b3   : >> { %v748_v5 = vadd.f32 %v744_v4, %v726_v3   ;;  %v751_v10 = vsub.f32 (%p671_p12), 1.0, %v750_v8 }
 0x2b5   : >> { %v2090_v41 = vmov %v748_v5   ;;  %v752_v12 = vmul.f32 (%p671_p12), %v1911_v7, %v751_v10 }
 0x2b6   : > { %674 = sbr.rel (!%p671_p12) target bundleno = 293 (0x125), region = 159 }
 0x2b7   : > { %v753_v15 = vadd.f32 (%p671_p12), %v1911_v7, %v752_v12 }
 0x2b9   : > { %v757_v16 = vsel (%p671_p12), %vm756_vm7, %v1911_v7, %v753_v15 }
 0x2ba   : >> { %v746_v6 = vpop.f32.mrf.mxu1  ;;  %v762_v17 = vsel (%p671_p12), %vm759_vm8, %v761_v13, %v757_v16 }
 0x2bb   : > { %v763_v18 = vmul.f32 %v762_v17, %v748_v5 }
 0x2bd   : > { %764 = vst.msk [vmem:[#allocation4] sm:$0xff] %vm549_vm0, %v763_v18 }
 0x2be LB: >> { %v785_v22 = vunpack.c.l.b16 %v2352_v30  ;;  %s1611_s30 = sshll.u32 %s2119_s20, 3  ;;  %s2156_s29 = smov 96   ;;  %s2119_s20 = sphi %s2385_s20, %s768_s20   ;;  %v2115_v21 = vphi %v2113_v21, %v2114_v21   ;;  %v2111_v20 = vphi %v2109_v20, %v2110_v20   ;;  %v2107_v19 = vphi %v2105_v19, %v2106_v19  }
 0x2bf   : >> { %s775_s17 = sshra.s32 %s1611_s30, 3  ;;  %v808_v27 = vstv %s1611_s30  ;;  %s768_s20 = sadd.s32 1, %s2119_s20  }
 0x2c0   : >> { %v2391_v23 = vpack.c.b16 %v785_v22, %v785_v22  ;;  %s1612_s22 = sshll.u32 %s775_s17, 2  ;;  %v809_v28 = vadd.s32 %v808_v27, %v2357_v34  ;;  %p767_p13 = scmp.ge.s32.totalorder %s768_s20, 1 }
 0x2c1   : >> { %s1455_s27 = scalar_lea.vmem [#allocation2], %s1612_s22  ;;  %s1458_s23 = scalar_lea.vmem [#allocation3], %s1612_s22  ;;  %vm870_vm14 = vcmask (%p767_p13), 523520   ;;  %v2121_v30 = vmov (%p767_p13), 0.0   ;;  %v2125_v3 = vmov (%p767_p13), 0.0  }
 0x2c2   : >> { %787 = vrot.lane.b32.xlu0 %v2391_v23, %s2156_s29  ;;  %v1613_v24 = vld [vmem:[%s1455_s27 + $0x4] sm:$0xf]  ;;  %vm810_vm9 = vcmp.ge.s32.totalorder %v2355_v33, %v809_v28  ;;  %v2129_v4 = vmov (%p767_p13), -1e+30   ;;  %s2407_s20 = smov (%p767_p13), 0  }
 0x2c3   : >> { %v793_v25 = vsel %vm549_vm0, %v1613_v24, 0  ;;  %v1615_v36 = vld [vmem:[%s1458_s23 + $0x4] sm:$0xf] }
 0x2c4   : >> { %802 = vmatpush.bf16.xpose.msra.mxu0 %v793_v25  ;;  %v835_v37 = vsel %vm731_vm4, %v1615_v36, 0 }
 0x2c5   : >> { %844 = vmatpush.bf16.msra.mxu1 %v835_v37 }
 0x334   : >> { %v788_v26 = vpop.permute.xlu0 %787 }
 0x335   : >> { %1616 = vmatmul.msk.bf16.vlgmr.msra.gmra.mxu0 %vm549_vm0, %v788_v26 }
 0x3b2   : >> { %v804_v29 = vpop.f32.mrf.mxu0 }
 0x3b3   : >> { %v811_v31 = vsel %vm810_vm9, %v804_v29, -1e+30 }
 0x3b4   : >> { %v813_v32 = vsel %vm710_vm3, %v811_v31, -inf }
 0x3b5   : >> { %814 = vmax.xlane.f32.xlu0 %v813_v32 }
 0x3ba   : >> { %v806_v35 = vpop.f32.mrf.mxu0 }
 0x428   : >> { %v815_v38 = vpop.xlane.xlu0 %814 }
 0x429   : >> { %v816_v39 = vmax.f32 %v2115_v21, %v815_v38  }
 0x42b   : >> { %v817_v40 = vsub.f32 %v2115_v21, %v816_v39  ;;  %v820_v41 = vsub.f32 %v811_v31, %v816_v39  ;;  %v2114_v21 = vmov %v816_v39  }
 0x42d   : >> { %v821_v42 = vmul.f32 1.442695, %v820_v41  ;;  %v818_v46 = vmul.f32 1.442695, %v817_v40 }
 0x42f   : >> { %1912 = vpow2.f32 %v821_v42 }
 0x430   : >> { %1914 = vpow2.f32 %v818_v46 }
 0x435   : >> { %v1913_v43 = vpop.eup %1912 }
 0x436   : >> { %v824_v44 = vsel %vm710_vm3, %v1913_v43, 0.0  ;;  %v829_v45 = vpack.c.bf16 %v1913_v43, %v1913_v43  ;;  %v1915_v47 = vpop.eup %1914 }
 0x437   : >> { %825 = vadd.xlane.f32.xlu1 %v824_v44  ;;  %v823_v48 = vmul.f32 %v2111_v20, %v1915_v47  ;;  %v828_v51 = vmul.f32 %v2107_v19, %v1915_v47 }
 0x438   : >> { %1617 = vmatmul.msk.bf16.vlgmr.msra.gmra.mxu1 %vm710_vm3, %v829_v45 }
 0x4aa   : >> { %v826_v49 = vpop.xlane.xlu1 %825 }
 0x4ab   : >> { %v827_v50 = vadd.f32 %v826_v49, %v823_v48  }
 0x4ad   : >> { %v2110_v20 = vmov %v827_v50   ;;  %1916 = vrcp.f32 (%p767_p13), %v827_v50  ;;  %v862_v57 = vand.u32 (%p767_p13), 2147483648, %v827_v50  ;;  %vm856_vm10 = vweird.f32 (%p767_p13), %v827_v50 }
 0x4ae   : > { %v860_v59 = vand.u32 (%p767_p13), 2147483647, %v827_v50 }
 0x4af   : > { %v863_v61 = vor.u32 (%p767_p13), 1.1754944e-38, %v862_v57 }
 0x4b0   : > { %vm861_vm13 = vcmp.eq.f32.partialorder (%p767_p13), %v860_v59, 8.507059e+37 }
 0x4b3   : > { %v1917_v55 = vpop.eup (%p767_p13), %1916 }
 0x4b4   : > { %v852_v56 = vmul.f32 (%p767_p13), %v1917_v55, %v827_v50  ;;  %vm857_vm11 = vweird.f32 (%p767_p13), %v1917_v55 }
 0x4b5   : >> { %v846_v52 = vpop.f32.mrf.mxu1  ;;  %vm858_vm12 = vmor (%p767_p13), %vm856_vm10, %vm857_vm11 }
 0x4b6   : >> { %v850_v53 = vadd.f32 %v846_v52, %v828_v51   ;;  %v853_v58 = vsub.f32 (%p767_p13), 1.0, %v852_v56 }
 0x4b8   : >> { %v2106_v19 = vmov %v850_v53   ;;  %v854_v60 = vmul.f32 (%p767_p13), %v1917_v55, %v853_v58 }
 0x4b9   : > { %770 = sbr.rel (!%p767_p13) target bundleno = 702 (0x2be), region = 170 }
 0x4ba   : > { %v855_v62 = vadd.f32 (%p767_p13), %v1917_v55, %v854_v60 }
 0x4bc   : > { %v859_v63 = vsel (%p767_p13), %vm858_vm12, %v1917_v55, %v855_v62 }
 0x4bd   : >> { %v848_v54 = vpop.f32.mrf.mxu1  ;;  %v864_v0 = vsel (%p767_p13), %vm861_vm13, %v863_v61, %v859_v63 }
 0x4be   : > { %v865_v1 = vmul.f32 %v864_v0, %v850_v53 }
 0x4c0   : > { %867 = vrot.lane.b32.xlu0 %v865_v1, %s2153_s16 }
 0x532   : > { %v868_v2 = vpop.permute.xlu0 %867 }
 0x533   : > { %871 = vst.msk [vmem:[#allocation4] sm:$0xff] %vm870_vm14, %v868_v2 }
 0x534 LB: >> { %s2157_s30 = smov 64   ;;  %s1618_s16 = sshll.u32 %s2135_s20, 3  ;;  %s2135_s20 = sphi %s2407_s20, %s875_s20   ;;  %v2131_v4 = vphi %v2129_v4, %v2130_v4   ;;  %v2127_v3 = vphi %v2125_v3, %v2126_v3   ;;  %v2123_v30 = vphi %v2121_v30, %v2122_v30  }
 0x535   : >> { %894 = vrot.lane.b32.xlu0 %v2391_v23, %s2157_s30  ;;  %s882_s17 = sshra.s32 %s1618_s16, 3  ;;  %v915_v8 = vstv %s1618_s16  ;;  %s875_s20 = sadd.s32 1, %s2135_s20  }
 0x536   : >> { %s1619_s29 = sshll.u32 %s882_s17, 2  ;;  %v916_v9 = vadd.s32 %v915_v8, %v2357_v34  ;;  %p874_p0 = scmp.ge.s32.totalorder %s875_s20, 1 }
 0x537   : >> { %s1461_s22 = scalar_lea.vmem [#allocation2], %s1619_s29  ;;  %s1464_s27 = scalar_lea.vmem [#allocation3], %s1619_s29  ;;  %vm977_vm7 = vcmask (%p874_p0), 785920   ;;  %v2137_v50 = vmov (%p874_p0), 0.0   ;;  %v2141_v51 = vmov (%p874_p0), 0.0  }
 0x538   : >> { %v1620_v5 = vld [vmem:[%s1461_s22 + $0x8] sm:$0xf]  ;;  %vm917_vm15 = vcmp.ge.s32.totalorder %v2355_v33, %v916_v9  ;;  %v2145_v52 = vmov (%p874_p0), -1e+30   ;;  %s2426_s23 = smov (%p874_p0), 0  }
 0x539   : >> { %v900_v6 = vsel %vm549_vm0, %v1620_v5, 0  ;;  %v1622_v15 = vld [vmem:[%s1464_s27 + $0x8] sm:$0xf] }
 0x53a   : >> { %909 = vmatpush.bf16.xpose.msra.mxu0 %v900_v6  ;;  %v942_v16 = vsel %vm731_vm4, %v1622_v15, 0 }
 0x53b   : >> { %951 = vmatpush.bf16.msra.mxu1 %v942_v16 }
 0x5a7   : >> { %v895_v7 = vpop.permute.xlu0 %894 }
 0x5a8   : >> { %1623 = vmatmul.msk.bf16.vlgmr.msra.gmra.mxu0 %vm549_vm0, %v895_v7 }
 0x625   : >> { %v911_v10 = vpop.f32.mrf.mxu0 }
 0x626   : >> { %v918_v11 = vsel %vm917_vm15, %v911_v10, -1e+30 }
 0x627   : >> { %v920_v12 = vsel %vm710_vm3, %v918_v11, -inf }
 0x628   : >> { %921 = vmax.xlane.f32.xlu0 %v920_v12 }
 0x62d   : >> { %v913_v13 = vpop.f32.mrf.mxu0 }
 0x69b   : >> { %v922_v17 = vpop.xlane.xlu0 %921 }
 0x69c   : >> { %v923_v18 = vmax.f32 %v2131_v4, %v922_v17  }
 0x69e   : >> { %v924_v19 = vsub.f32 %v2131_v4, %v923_v18  ;;  %v927_v20 = vsub.f32 %v918_v11, %v923_v18  ;;  %v2130_v4 = vmov %v923_v18  }
 0x6a0   : >> { %v928_v21 = vmul.f32 1.442695, %v927_v20  ;;  %v925_v26 = vmul.f32 1.442695, %v924_v19 }
 0x6a2   : >> { %1918 = vpow2.f32 %v928_v21 }
 0x6a3   : >> { %1920 = vpow2.f32 %v925_v26 }
 0x6a8   : >> { %v1919_v22 = vpop.eup %1918 }
 0x6a9   : >> { %v931_v24 = vsel %vm710_vm3, %v1919_v22, 0.0  ;;  %v936_v25 = vpack.c.bf16 %v1919_v22, %v1919_v22  ;;  %v1921_v27 = vpop.eup %1920 }
 0x6aa   : >> { %932 = vadd.xlane.f32.xlu1 %v931_v24  ;;  %v930_v28 = vmul.f32 %v2127_v3, %v1921_v27  ;;  %v935_v32 = vmul.f32 %v2123_v30, %v1921_v27 }
 0x6ab   : >> { %1624 = vmatmul.msk.bf16.vlgmr.msra.gmra.mxu1 %vm710_vm3, %v936_v25 }
 0x71d   : >> { %v933_v29 = vpop.xlane.xlu1 %932 }
 0x71e   : >> { %v934_v31 = vadd.f32 %v933_v29, %v930_v28  }
 0x720   : >> { %v2126_v3 = vmov %v934_v31   ;;  %1922 = vrcp.f32 (%p874_p0), %v934_v31  ;;  %v969_v40 = vand.u32 (%p874_p0), 2147483648, %v934_v31  ;;  %vm963_vm1 = vweird.f32 (%p874_p0), %v934_v31 }
 0x721   : > { %v967_v42 = vand.u32 (%p874_p0), 2147483647, %v934_v31 }
 0x722   : > { %v970_v44 = vor.u32 (%p874_p0), 1.1754944e-38, %v969_v40 }
 0x723   : > { %vm968_vm6 = vcmp.eq.f32.partialorder (%p874_p0), %v967_v42, 8.507059e+37 }
 0x726   : > { %v1923_v38 = vpop.eup (%p874_p0), %1922 }
 0x727   : > { %v959_v39 = vmul.f32 (%p874_p0), %v1923_v38, %v934_v31  ;;  %vm964_vm2 = vweird.f32 (%p874_p0), %v1923_v38 }
 0x728   : >> { %v953_v35 = vpop.f32.mrf.mxu1  ;;  %vm965_vm5 = vmor (%p874_p0), %vm963_vm1, %vm964_vm2 }
 0x729   : >> { %v957_v36 = vadd.f32 %v953_v35, %v935_v32   ;;  %v960_v41 = vsub.f32 (%p874_p0), 1.0, %v959_v39 }
 0x72b   : >> { %v2122_v30 = vmov %v957_v36   ;;  %v961_v43 = vmul.f32 (%p874_p0), %v1923_v38, %v960_v41 }
 0x72c   : > { %877 = sbr.rel (!%p874_p0) target bundleno = 1332 (0x534), region = 181 }
 0x72d   : > { %v962_v45 = vadd.f32 (%p874_p0), %v1923_v38, %v961_v43 }
 0x72f   : > { %v966_v46 = vsel (%p874_p0), %vm965_vm5, %v1923_v38, %v962_v45 }
 0x730   : >> { %v955_v37 = vpop.f32.mrf.mxu1  ;;  %v971_v47 = vsel (%p874_p0), %vm968_vm6, %v970_v44, %v966_v46 }
 0x731   : > { %v972_v48 = vmul.f32 %v971_v47, %v957_v36 }
 0x733   : > { %974 = vrot.lane.b32.xlu0 %v972_v48, %s2155_s24 }
 0x7a5   : > { %v975_v49 = vpop.permute.xlu0 %974 }
 0x7a6   : > { %978 = vst.msk [vmem:[#allocation4] sm:$0xff] %vm977_vm7, %v975_v49 }
 0x7a7 LB: >> { %s2158_s20 = smov 32   ;;  %s1625_s24 = sshll.u32 %s2151_s23, 3  ;;  %s2151_s23 = sphi %s2426_s23, %s982_s23   ;;  %v2147_v52 = vphi %v2145_v52, %v2146_v52   ;;  %v2143_v51 = vphi %v2141_v51, %v2142_v51   ;;  %v2139_v50 = vphi %v2137_v50, %v2138_v50  }
 0x7a8   : >> { %1001 = vrot.lane.b32.xlu0 %v2391_v23, %s2158_s20  ;;  %s989_s30 = sshra.s32 %s1625_s24, 3  ;;  %v1022_v56 = vstv %s1625_s24  ;;  %s982_s23 = sadd.s32 1, %s2151_s23  }
 0x7a9   : >> { %s1626_s16 = sshll.u32 %s989_s30, 2  ;;  %v1023_v57 = vadd.s32 %v1022_v56, %v2357_v34  ;;  %p981_p1 = scmp.ge.s32.totalorder %s982_s23, 1 }
 0x7aa   : >> { %s1467_s17 = scalar_lea.vmem [#allocation2], %s1626_s16  ;;  %s1470_s29 = scalar_lea.vmem [#allocation3], %s1626_s16  ;;  %v1708_v17 = vld [vmem:[%s2573_s5 + $0x38] sm:$0xff] (%p981_p1)  ;;  %v1707_v18 = vld [vmem:[%s2573_s5 + $0x30] sm:$0xff] (%p981_p1)  ;;  %v1706_v20 = vld [vmem:[%s2573_s5 + $0x28] sm:$0xff] (%p981_p1)  ;;  %vm1084_vm11 = vcmask (%p981_p1), 1048320  }
 0x7ab   : >> { %v1627_v53 = vld [vmem:[%s1467_s17 + $0xc] sm:$0xf]  ;;  %vm1024_vm8 = vcmp.ge.s32.totalorder %v2355_v33, %v1023_v57  ;;  %v1705_v34 = vld [vmem:[%s2573_s5 + $0x20] sm:$0xff] (%p981_p1)  ;;  %v1704_v27 = vld [vmem:[%s2573_s5 + $0x18] sm:$0xff] (%p981_p1)  ;;  %v2159_v46 = vmov (%p981_p1), 32.0   ;;  %vm1327_vm7 = vcmask (%p981_p1), 523264  }
 0x7ac   : >> { %v1007_v54 = vsel %vm549_vm0, %v1627_v53, 0  ;;  %v1629_v62 = vld [vmem:[%s1470_s29 + $0xc] sm:$0xf]  ;;  %v1703_v32 = vld [vmem:[%s2573_s5 + $0x10] sm:$0xff] (%p981_p1)  ;;  %v1701_v36 = vld [vmem:[%s2573_s5] sm:$0xff] (%p981_p1)  ;;  %s2603_s29 = sand.u32 (%p981_p1), 1, %s2071_s19  }
 0x7ad   : >> { %1016 = vmatpush.bf16.xpose.msra.mxu0 %v1007_v54  ;;  %v1049_v63 = vsel %vm731_vm4, %v1629_v62, 0  ;;  %v1702_v35 = vld [vmem:[%s2573_s5 + $0x8] sm:$0xff] (%p981_p1)  ;;  %v1928_v40 = vld [vmem:[%s2574_s6] ss:$0 sm:$0xff] (%p981_p1)  ;;  %s1379_s22 = scalar_lea.sflag (%p981_p1), [#allocation6], %s2603_s29 }
 0x7ae   : >> { %1058 = vmatpush.bf16.msra.mxu1 %v1049_v63  ;;  %v1710_v57 = vld [vmem:[%s2577_s9 + $0x8] sm:$0xff] (%p981_p1) }
 0x81a   : >> { %v1002_v55 = vpop.permute.xlu0 %1001 }
 0x81b   : >> { %1630 = vmatmul.msk.bf16.vlgmr.msra.gmra.mxu0 %vm549_vm0, %v1002_v55 }
 0x81c   : > { %1156 = vmatpush.bf16.msra.mxu0 (%p981_p1), %v1708_v17 }
 0x820   : > { %1157 = vmatpush.bf16.msra.mxu0 (%p981_p1), %v1707_v18  ;;  %v1714_v18 = vld [vmem:[%s2579_s11 + $0x18] sm:$0xff] (%p981_p1) }
 0x821   : > { %1335 = vmatpush.bf16.msra.mxu2 (%p981_p1), %v1714_v18  ;;  %v1934_v18 = vld [vmem:[%s2582_s14] ss:$0 sm:$0xff] (%p981_p1) }
 0x824   : > { %1158 = vmatpush.bf16.msra.mxu0 (%p981_p1), %v1706_v20 }
 0x828   : > { %1159 = vmatpush.bf16.msra.mxu0 (%p981_p1), %v1705_v34 }
 0x82c   : > { %1160 = vmatpush.bf16.msra.mxu0 (%p981_p1), %v1704_v27 }
 0x830   : > { %1161 = vmatpush.bf16.msra.mxu0 (%p981_p1), %v1703_v32 }
 0x834   : > { %1162 = vmatpush.bf16.msra.mxu0 (%p981_p1), %v1702_v35 }
 0x838   : > { %1163 = vmatpush.bf16.msra.mxu0 (%p981_p1), %v1701_v36 }
 0x898   : >> { %v1018_v58 = vpop.f32.mrf.mxu0 }
 0x899   : >> { %v1025_v59 = vsel %vm1024_vm8, %v1018_v58, -1e+30  ;;  %v1709_v58 = vld [vmem:[%s2577_s9] sm:$0xff] (%p981_p1) }
 0x89a   : >> { %v1027_v60 = vsel %vm710_vm3, %v1025_v59, -inf }
 0x89b   : >> { %1028 = vmax.xlane.f32.xlu0 %v1027_v60 }
 0x8a0   : >> { %v1020_v61 = vpop.f32.mrf.mxu0 }
 0x90e   : >> { %v1029_v0 = vpop.xlane.xlu0 %1028 }
 0x90f   : >> { %v1030_v1 = vmax.f32 %v2147_v52, %v1029_v0  }
 0x911   : >> { %v1031_v2 = vsub.f32 %v2147_v52, %v1030_v1  ;;  %v1034_v30 = vsub.f32 %v1025_v59, %v1030_v1  ;;  %v2146_v52 = vmov %v1030_v1  }
 0x913   : >> { %v1035_v3 = vmul.f32 1.442695, %v1034_v30  ;;  %v1032_v7 = vmul.f32 1.442695, %v1031_v2 }
 0x915   : >> { %1924 = vpow2.f32 %v1035_v3  ;;  %v1929_v3 = vld [vmem:[%s2575_s7] ss:$0 sm:$0xff] (%p981_p1) }
 0x916   : >> { %1926 = vpow2.f32 %v1032_v7 }
 0x91b   : >> { %v1925_v4 = vpop.eup %1924 }
 0x91c   : >> { %v1038_v5 = vsel %vm710_vm3, %v1925_v4, 0.0  ;;  %v1043_v6 = vpack.c.bf16 %v1925_v4, %v1925_v4  ;;  %v1927_v8 = vpop.eup %1926 }
 0x91d   : >> { %1039 = vadd.xlane.f32.xlu1 %v1038_v5  ;;  %v1037_v9 = vmul.f32 %v2143_v51, %v1927_v8  ;;  %v1042_v12 = vmul.f32 %v2139_v50, %v1927_v8 }
 0x91e   : >> { %1631 = vmatmul.msk.bf16.vlgmr.msra.gmra.mxu1 %vm710_vm3, %v1043_v6  ;;  %v1930_v6 = vld [vmem:[%s2576_s8] ss:$0 sm:$0xff] (%p981_p1) }
 0x91f   : > { %1239 = vmatpush.bf16.msra.mxu1 (%p981_p1), %v1710_v57 }
 0x923   : > { %1240 = vmatpush.bf16.msra.mxu1 (%p981_p1), %v1709_v58 }
 0x990   : >> { %v1040_v10 = vpop.xlane.xlu1 %1039 }
 0x991   : >> { %v1041_v11 = vadd.f32 %v1040_v10, %v1037_v9   ;;  %v1931_v10 = vld [vmem:[%s2578_s10] ss:$0 sm:$0xff] (%p981_p1) }
 0x993   : >> { %v2142_v51 = vmov %v1041_v11   ;;  %1935 = vrcp.f32 (%p981_p1), %v1041_v11  ;;  %v1076_v22 = vand.u32 (%p981_p1), 2147483648, %v1041_v11  ;;  %vm1070_vm9 = vweird.f32 (%p981_p1), %v1041_v11 }
 0x994   : > { %v1074_v33 = vand.u32 (%p981_p1), 2147483647, %v1041_v11  ;;  %1937 = vrcp.f32 (%p981_p1), %v2159_v46 }
 0x995   : > { %v1077_v25 = vor.u32 (%p981_p1), 1.1754944e-38, %v1076_v22 }
 0x996   : > { %vm1075_vm10 = vcmp.eq.f32.partialorder (%p981_p1), %v1074_v33, 8.507059e+37 }
 0x999   : > { %v1936_v19 = vpop.eup (%p981_p1), %1935 }
 0x99a   : > { %v1066_v21 = vmul.f32 (%p981_p1), %v1936_v19, %v1041_v11  ;;  %vm1071_vm3 = vweird.f32 (%p981_p1), %v1936_v19  ;;  %v1938_v47 = vpop.eup (%p981_p1), %1937 }
 0x99b   : >> { %v1060_v13 = vpop.f32.mrf.mxu1  ;;  %vm1072_vm4 = vmor (%p981_p1), %vm1070_vm9, %vm1071_vm3  ;;  %v1176_v48 = vmul.f32 (%p981_p1), 32.0, %v1938_v47  ;;  %vm1180_vm12 = vweird.f32 (%p981_p1), %v1938_v47 }
 0x99c   : >> { %v1064_v15 = vadd.f32 %v1060_v13, %v1042_v12   ;;  %v1067_v24 = vsub.f32 (%p981_p1), 1.0, %v1066_v21 }
 0x99d   : > { %v1177_v49 = vsub.f32 (%p981_p1), 1.0, %v1176_v48 }
 0x99e   : >> { %v2138_v50 = vmov %v1064_v15   ;;  %v1068_v23 = vmul.f32 (%p981_p1), %v1936_v19, %v1067_v24  ;;  %v1713_v24 = vld [vmem:[%s2579_s11 + $0x10] sm:$0xff] (%p981_p1) }
 0x99f   : > { %984 = sbr.rel (!%p981_p1) target bundleno = 1959 (0x7a7), region = 192  ;;  %v1178_v50 = vmul.f32 (%p981_p1), %v1938_v47, %v1177_v49  ;;  %1336 = vmatpush.bf16.msra.mxu2 (%p981_p1), %v1713_v24 }
 0x9a0   : > { %v1069_v26 = vadd.f32 (%p981_p1), %v1936_v19, %v1068_v23  ;;  %v1712_v23 = vld [vmem:[%s2579_s11 + $0x8] sm:$0xff] (%p981_p1) }
 0x9a1   : > { %v1179_v51 = vadd.f32 (%p981_p1), %v1938_v47, %v1178_v50 }
 0x9a2   : > { %v1073_v28 = vsel (%p981_p1), %vm1072_vm4, %v1936_v19, %v1069_v26 }
 0x9a3   : >> { %v1062_v16 = vpop.f32.mrf.mxu1  ;;  %v1078_v29 = vsel (%p981_p1), %vm1075_vm10, %v1077_v25, %v1073_v28  ;;  %v2474_v52 = vsel (%p981_p1), %vm1180_vm12, %v1938_v47, %v1179_v51  ;;  %1337 = vmatpush.bf16.msra.mxu2 (%p981_p1), %v1712_v23  ;;  %v1711_v28 = vld [vmem:[%s2579_s11] sm:$0xff] (%p981_p1) }
 0x9a4   : > { %v1079_v31 = vmul.f32 %v1078_v29, %v1064_v15 }
 0x9a6   : > { %1081 = vrot.lane.b32.xlu0 %v1079_v31, %s2154_s18  ;;  %s1692_s18 = sshll.u32 %s2079_s21, 3  ;;  %s1392_s21 = sshll.u32 %s507_s25, 4  ;;  %s1393_s21 = int_to_ptr.vmem [resolvable:$true] %s1392_s21 }
 0x9a7   : > { %1338 = vmatpush.bf16.msra.mxu2 %v1711_v28  ;;  %s1390_s30 = scalar_lea.hbm %s2583_s15, %s1692_s18 }
 0x9a8   : > { %s1394_s17 = sshll.u32 %s1390_s30, 4  ;;  %s1965_s30 = scalar_lea.hbm %s2583_s15, 16  ;;  %s1395_s17 = int_to_ptr.hbm [resolvable:$true] %s1394_s17 }
 0x9a9   : > { %s1959_s18 = sshra.s32 %s1395_s17, 4  ;;  %s1960_s18 = int_to_ptr.hbm [resolvable:$true] %s1959_s18 }
 0x9aa   : > { %s1961_s27 = scalar_lea.hbm %s1960_s18, 8  ;;  %p1966_p6 = scmp.lt.s32.totalorder %s1960_s18, %s2583_s15 }
 0x9ab   : > { %p1962_p2 = scmp.ne.s32.totalorder %s1960_s18, %s1961_s27  ;;  %p1967_p7 = scmp.lt.s32.totalorder %s1965_s30, %s1961_s27 }
 0x9ad   : > { %p1963_p3 = pnand %p1962_p2, %p2280_p4  ;;  %p1968_p9 = por %p1967_p7, %p1966_p6 }
 0x9af   : > { %p1964_p5 = pneg %p1963_p3 }
 0x9b1   : > { %p1969_p10 = pnand %p1968_p9, %p1964_p5 }
 0xa18   : > { %v1082_v37 = vpop.permute.xlu0 %1081 }
 0xa19   : > { %1085 = vst.msk [vmem:[#allocation4] sm:$0xff] %vm1084_vm11, %v1082_v37 }
 0xa20   : > { %v1086_v38 = vld [vmem:[#allocation4] sm:$0xff] }
 0xa21   : > { %v1087_v39 = vpack.c.bf16 %v1086_v38, %v1086_v38 }
 0xa23   : > { %1164 = vmatmul.bf16.vlgmr.msra.gmra.mxu0 %v1087_v39 }
 0xaa0   : > { %v1165_v41 = vpop.f32.mrf.mxu0 }
 0xaa1   : > { %v1166_v42 = vadd.f32 %v1928_v40, %v1165_v41 }
 0xaa3   : > { %v1169_v43 = vadd.f32 %v1166_v42, %v2335_v14 }
 0xaa5   : > { %v1172_v44 = vsel %vm549_vm0, %v1169_v43, 0.0 }
 0xaa6   : > { %1173 = vadd.xlane.f32.xlu0 %v1172_v44 }
 0xaa8   : > { %v1167_v45 = vpop.f32.mrf.mxu0 }
 0xb19   : > { %v1174_v53 = vpop.xlane.xlu0 %1173 }
 0xb1a   : > { %v1182_v54 = vmul.f32 %v2474_v52, %v1174_v53 }
 0xb1c   : > { %v1183_v55 = vsub.f32 %v1169_v43, %v1182_v54 }
 0xb1e   : > { %v1184_v56 = vmul.f32 %v1183_v55, %v1183_v55 }
 0xb20   : > { %v1185_v14 = vsel %vm549_vm0, %v1184_v56, 0.0 }
 0xb21   : > { %1186 = vadd.xlane.f32.xlu1 %v1185_v14 }
 0xb94   : > { %v1187_v59 = vpop.xlane.xlu1 %1186 }
 0xb95   : > { %v1188_v60 = vmul.f32 %v1187_v59, %v2474_v52 }
 0xb97   : > { %v1189_v61 = vadd.f32 1e-05, %v1188_v60  ;;  %v1932_v60 = vld [vmem:[%s2580_s12] ss:$0 sm:$0xff] }
 0xb99   : > { %1939 = vrsqrt.f32 %v1189_v61  ;;  %vm1196_vm14 = vweird.f32 %v1189_v61 }
 0xb9f   : > { %v1940_v62 = vpop.eup %1939 }
 0xba0   : > { %v1191_v63 = vmul.f32 %v1940_v62, %v1189_v61  ;;  %vm1197_vm13 = vweird.f32 %v1940_v62 }
 0xba1   : > { %vm1198_vm15 = vmor %vm1196_vm14, %vm1197_vm13 }
 0xba2   : > { %v1192_v0 = vmul.f32 %v1940_v62, %v1191_v63 }
 0xba4   : > { %v1193_v1 = vmul.f32 0.5, %v1192_v0 }
 0xba6   : > { %v1194_v2 = vsub.f32 1.5, %v1193_v1 }
 0xba8   : > { %v1195_v30 = vmul.f32 %v1940_v62, %v1194_v2 }
 0xbaa   : > { %v1199_v4 = vsel %vm1198_vm15, %v1940_v62, %v1195_v30 }
 0xbab   : > { %v1200_v5 = vmul.f32 %v1199_v4, %v1183_v55 }
 0xbad   : > { %v1204_v7 = vmul.f32 %v1929_v3, %v1200_v5 }
 0xbaf   : > { %v2491_v8 = vadd.f32 %v1930_v6, %v1204_v7 }
 0xbb1   : > { %v1209_v9 = vpack.c.bf16 %v2491_v8, %v2491_v8 }
 0xbb3   : > { %1672 = vmatmul.msk.bf16.vlgmr.msra.gmra.mxu1 %vm549_vm0, %v1209_v9 }
 0xc30   : > { %v1242_v11 = vpop.f32.mrf.mxu1 }
 0xc31   : > { %v1243_v12 = vadd.f32 %v1931_v10, %v1242_v11 }
 0xc33   : > { %v1247_v13 = vmul.f32 0.70710677, %v1243_v12  ;;  %v1246_v14 = vmul.f32 0.5, %v1243_v12 }
 0xc35   : > { %v1248_v15 = vmul.f32 %v1247_v13, %v1247_v13 }
 0xc37   : > { %v1249_v16 = vmin.f32 %v1248_v15, 16.0 }
 0xc38   : > { %v1244_v17 = vpop.f32.mrf.mxu1 }
 0xc39   : > { %v1250_v19 = vmul.f32 2.1237322e-06, %v1249_v16  ;;  %v1261_v20 = vmul.f32 3.8918573e-05, %v1249_v16 }
 0xc3b   : > { %v1251_v21 = vadd.f32 0.00028619796, %v1250_v19  ;;  %v1262_v22 = vadd.f32 0.001143296, %v1261_v20 }
 0xc3d   : > { %v1252_v33 = vmul.f32 %v1251_v21, %v1249_v16  ;;  %v1263_v34 = vmul.f32 %v1262_v22, %v1249_v16 }
 0xc3f   : > { %v1264_v25 = vadd.f32 0.014752088, %v1263_v34  ;;  %v1253_v26 = vadd.f32 0.0036580483, %v1252_v33 }
 0xc41   : > { %v1265_v27 = vmul.f32 %v1264_v25, %v1249_v16  ;;  %v1254_v31 = vmul.f32 %v1253_v26, %v1249_v16 }
 0xc43   : > { %v1266_v29 = vadd.f32 0.112945676, %v1265_v27  ;;  %v1255_v36 = vadd.f32 0.05243302, %v1254_v31 }
 0xc45   : > { %v1267_v32 = vmul.f32 %v1266_v29, %v1249_v16  ;;  %v1256_v39 = vmul.f32 %v1255_v36, %v1249_v16 }
 0xc47   : > { %v1268_v35 = vadd.f32 0.4994258, %v1267_v32  ;;  %v1257_v40 = vadd.f32 0.18741608, %v1256_v39 }
 0xc49   : > { %v1269_v37 = vmul.f32 %v1268_v35, %v1249_v16  ;;  %v1258_v42 = vmul.f32 %v1257_v40, %v1249_v16  ;;  %v1933_v16 = vld [vmem:[%s2581_s13] ss:$0 sm:$0xff] }
 0xc4b   : > { %v1270_v38 = vadd.f32 1.0, %v1269_v37  ;;  %v1259_v46 = vadd.f32 1.1283791, %v1258_v42 }
 0xc4d   : > { %1941 = vrcp.f32 %v1270_v38  ;;  %v1282_v45 = vand.u32 2147483648, %v1270_v38  ;;  %v1280_v48 = vand.u32 2147483647, %v1270_v38  ;;  %vm1276_vm2 = vweird.f32 %v1270_v38 }
 0xc4e   : > { %v1260_v51 = vmul.f32 %v1259_v46, %v1247_v13 }
 0xc4f   : > { %v1283_v50 = vor.u32 1.1754944e-38, %v1282_v45  ;;  %vm1281_vm6 = vcmp.eq.f32.partialorder %v1280_v48, 8.507059e+37 }
 0xc53   : > { %v1942_v41 = vpop.eup %1941 }
 0xc54   : > { %v1272_v43 = vmul.f32 %v1942_v41, %v1270_v38  ;;  %vm1277_vm1 = vweird.f32 %v1942_v41 }
 0xc55   : > { %vm1278_vm5 = vmor %vm1276_vm2, %vm1277_vm1 }
 0xc56   : > { %v1273_v44 = vsub.f32 1.0, %v1272_v43 }
 0xc58   : > { %v1274_v47 = vmul.f32 %v1942_v41, %v1273_v44 }
 0xc5a   : > { %v1275_v49 = vadd.f32 %v1942_v41, %v1274_v47 }
 0xc5c   : > { %v1279_v53 = vsel %vm1278_vm5, %v1942_v41, %v1275_v49 }
 0xc5d   : > { %v1284_v54 = vsel %vm1281_vm6, %v1283_v50, %v1279_v53 }
 0xc5e   : > { %v1285_v55 = vmul.f32 %v1284_v54, %v1260_v51 }
 0xc60   : > { %v1673_v56 = vclamps-f32 %v1285_v55, 1.0 }
 0xc62   : > { %v1288_v57 = vadd.f32 1.0, %v1673_v56 }
 0xc64   : > { %v1289_v58 = vmul.f32 %v1288_v57, %v1246_v14 }
 0xc66   : > { %v1290_v59 = vpack.c.bf16 %v1289_v58, %v1289_v58 }
 0xc68   : > { %1690 = vmatmul.msk.bf16.vlgmr.msra.gmra.mxu2 %vm1327_vm7, %v1290_v59 }
 0xceb   : > { %v1340_v61 = vpop.f32.mrf.mxu2 }
 0xcec   : > { %v1341_v62 = vadd.f32 %v1932_v60, %v1340_v61 }
 0xcee   : > { %v1344_v63 = vadd.f32 %v1341_v62, %v2491_v8 }
 0xcf0   : > { %v1347_v0 = vsel %vm549_vm0, %v1344_v63, 0.0 }
 0xcf1   : > { %1348 = vadd.xlane.f32.xlu1 %v1347_v0 }
 0xcf3   : > { %v1342_v1 = vpop.f32.mrf.mxu2 }
 0xd64   : > { %v1349_v2 = vpop.xlane.xlu1 %1348 }
 0xd65   : > { %v1350_v30 = vmul.f32 %v1349_v2, %v2474_v52 }
 0xd67   : > { %v1351_v3 = vsub.f32 %v1344_v63, %v1350_v30 }
 0xd69   : > { %v1352_v4 = vmul.f32 %v1351_v3, %v1351_v3 }
 0xd6b   : > { %v1353_v5 = vsel %vm549_vm0, %v1352_v4, 0.0 }
 0xd6c   : > { %1354 = vadd.xlane.f32.xlu2 %v1353_v5 }
 0xddf   : > { %v1355_v6 = vpop.xlane.xlu2 %1354 }
 0xde0   : > { %v1356_v7 = vmul.f32 %v1355_v6, %v2474_v52 }
 0xde2   : > { %v1357_v9 = vadd.f32 1e-05, %v1356_v7 }
 0xde4   : > { %1943 = vrsqrt.f32 %v1357_v9  ;;  %vm1364_vm9 = vweird.f32 %v1357_v9 }
 0xdea   : > { %v1944_v8 = vpop.eup %1943 }
 0xdeb   : > { %v1359_v10 = vmul.f32 %v1944_v8, %v1357_v9  ;;  %vm1365_vm8 = vweird.f32 %v1944_v8 }
 0xdec   : > { %vm1366_vm3 = vmor %vm1364_vm9, %vm1365_vm8 }
 0xded   : > { %v1360_v11 = vmul.f32 %v1944_v8, %v1359_v10 }
 0xdef   : > { %v1361_v12 = vmul.f32 0.5, %v1360_v11 }
 0xdf1   : > { %v1362_v13 = vsub.f32 1.5, %v1361_v12 }
 0xdf3   : > { %v1363_v15 = vmul.f32 %v1944_v8, %v1362_v13 }
 0xdf5   : > { %v1367_v52 = vsel %vm1366_vm3, %v1944_v8, %v1363_v15 }
 0xdf6   : > { %v1368_v17 = vmul.f32 %v1367_v52, %v1351_v3 }
 0xdf8   : > { %v1372_v19 = vmul.f32 %v1933_v16, %v1368_v17 }
 0xdfa   : > { %v1376_v20 = vadd.f32 %v1934_v18, %v1372_v19 }
 0xdfc   : > { %1377 = vst.msk [vmem:[%s507_s25] sm:$0xff] %vm549_vm0, %v1376_v20 }
 0xdfd   : > { %1972 = shalt.err (!%p1969_p10)
}
 0xdfe   : > { %1715 = dma.vmem_to_hbm [thread:$0]  (%p2280_p4), %s1393_s21, 128, %s1395_s17, %s1379_s22  }
 0xdff PF: > { %s2604_s26 = sld [smem:[#allocation11_spill]] }
 0xe00   : > { %s2605_s25 = sld [smem:[#allocation8_spill]] }
 0xe05   : > { %p1721_p11 = scmp.ge.s32.totalorder %s2604_s26, 2 }
 0xe06   : > { %s1406_s0 = sand.u32 1, %s2605_s25  }
 0xe07   : > { %p1718_p12 = pnand %p1721_p11, %p2287_p8  ;;  %s1407_s20 = scalar_lea.sflag [#allocation6], %s1406_s0 }
 0xe09   : > { %p1719_p13 = pneg %p1718_p12 }
 0xe0b   : > { %2062 = dma.done.wait (%p1719_p13), %s1407_s20, 128  }
 0xe0c   : > { %2064 = vsyncadd (%p1719_p13), %s1407_s20, 4294967168  ;;  %s28_s23 = sadd.s32 1, %s2604_s26   ;;  %s2607_s27 = sld [smem:[#allocation9_spill]] }
 0xe0d   : > { %p25_p0 = scmp.ge.s32.totalorder %s28_s23, 4   ;;  %s2608_s20 = sld [smem:[#allocation14_spill]] }
 0xe0e   : > { %s2609_s21 = sld [smem:[#allocation10_spill]]  ;;  %s2611_s18 = smov %s2071_s19 }
 0xe0f   : > { %s2610_s22 = sld [smem:[#allocation12_spill]]  ;;  %27 = sbr.rel (!%p25_p0) target bundleno = 6 (0x6), region = 203 }
 0xe12   : > { %s2612_s19 = smov %s2607_s27 }
 0xe14   :  { %1413 = vsyncpa [#allocation6], 1 }
 0xe15   :  { %1415 = vsyncpa [#allocation6 + $0x1], 1 }

</bundles_post_ra>
